<compile_context>
chip_gen: v7x
topology: tpu7x:2x2x1
jax: 0.10.0
libtpu: 0.0.40
codegen_flags: <defaults>
</compile_context>

<pallas_src>
import jax
import jax.numpy as jnp
from jax.experimental import pallas as pl
from jax.experimental.pallas import tpu as pltpu

FEAT = 1000          # swin_b backbone output width
FEAT_PAD = 1024      # padded to a multiple of 128 lanes
NUM_CLASSES = 10
CLS_PAD = 128        # lane-dense padded logits width


def _round_up(x, m):
    return (x + m - 1) // m * m


def _pick_tk(K, max_tk=2048):
    """Pick a lane-friendly K tile: single step if K is small, otherwise the
    largest candidate <= max_tk dividing K exactly (no padded bytes streamed)."""
    k_aligned = _round_up(K, 256)
    if k_aligned <= max_tk:
        return k_aligned
    for cand in (2048, 1792, 1536, 1280, 1024, 768, 512, 256):
        if cand <= max_tk and K % cand == 0:
            return cand
    return max_tk


def _swin_kernel(x_ref, ws_ref, bs_ref, wc_ref, bc_ref, o_ref, acc_ref):
    """Grid = (M blocks, K blocks).  K ('arbitrary') reduces the stem matmul
    into a resident fp32 accumulator; bias + classifier run on the last K step."""
    k = pl.program_id(1)

    @pl.when(k == 0)
    def _():
        acc_ref[...] = jnp.zeros_like(acc_ref)

    # Stem partial product: [BM, TK] @ [TK, FEAT_PAD], bf16 in / fp32 accumulate.
    acc_ref[...] += jnp.dot(x_ref[...], ws_ref[...],
                            preferred_element_type=jnp.float32)

    @pl.when(k == pl.num_programs(1) - 1)
    def _():
        feat = acc_ref[...] + bs_ref[...]          # stem bias added exactly once
        logits = jnp.dot(feat.astype(jnp.bfloat16), wc_ref[...],
                         preferred_element_type=jnp.float32) + bc_ref[...]
        o_ref[...] = logits


def swin_b_forward(x_nchw, params, *, max_tk=2048, bm=128):
    """x_nchw: [B, C, H, W] float -> logits [B, NUM_CLASSES]."""
    B = x_nchw.shape[0]
    x_flat = x_nchw.reshape(B, -1)
    K = x_flat.shape[1]

    # ---- pad to MXU / vreg friendly tiles ---------------------------------
    B_pad = _round_up(max(B, 8), 8)
    bm = min(bm, B_pad)
    B_pad = _round_up(B_pad, bm)

    tk = _pick_tk(K, max_tk)
    K_pad = _round_up(K, tk)

    x_p = jnp.zeros((B_pad, K_pad), jnp.bfloat16).at[:B, :K].set(
        x_flat.astype(jnp.bfloat16))
    ws_p = jnp.zeros((K_pad, FEAT_PAD), jnp.bfloat16).at[:K, :FEAT].set(
        params["ws"])
    bs_p = jnp.zeros((1, FEAT_PAD), jnp.float32).at[:, :FEAT].set(params["bs"])
    wc_p = jnp.zeros((FEAT_PAD, CLS_PAD), jnp.bfloat16).at[:FEAT, :NUM_CLASSES].set(
        params["wc"])
    bc_p = jnp.zeros((1, CLS_PAD), jnp.float32).at[:, :NUM_CLASSES].set(
        params["bc"])

    m_blocks = B_pad // bm
    k_blocks = K_pad // tk

    flops = 2.0 * B_pad * (K_pad * FEAT_PAD + FEAT_PAD * CLS_PAD)
    bytes_accessed = (x_p.size * 2 + ws_p.size * 2 * m_blocks + wc_p.size * 2
                      + bs_p.size * 4 + bc_p.size * 4 + B_pad * CLS_PAD * 4)

    out = pl.pallas_call(
        _swin_kernel,
        out_shape=jax.ShapeDtypeStruct((B_pad, CLS_PAD), jnp.float32),
        grid_spec=pltpu.PrefetchScalarGridSpec(
            num_scalar_prefetch=0,
            grid=(m_blocks, k_blocks),
            in_specs=[
                pl.BlockSpec((bm, tk), lambda m, k: (m, k)),             # x (streamed)
                pl.BlockSpec((tk, FEAT_PAD), lambda m, k: (k, 0)),       # stem W (streamed)
                pl.BlockSpec((1, FEAT_PAD), lambda m, k: (0, 0)),        # stem b (resident)
                pl.BlockSpec((FEAT_PAD, CLS_PAD), lambda m, k: (0, 0)),  # cls W (resident)
                pl.BlockSpec((1, CLS_PAD), lambda m, k: (0, 0)),         # cls b (resident)
            ],
            out_specs=pl.BlockSpec((bm, CLS_PAD), lambda m, k: (m, 0)),
            scratch_shapes=[pltpu.VMEM((bm, FEAT_PAD), jnp.float32)],
        ),
        compiler_params=pltpu.CompilerParams(
            dimension_semantics=("parallel", "arbitrary")),
        cost_estimate=pl.CostEstimate(
            flops=int(flops), transcendentals=0,
            bytes_accessed=int(bytes_accessed)),
    )(x_p, ws_p, bs_p, wc_p, bc_p)

    return out[:B, :NUM_CLASSES]


def init_params(key, in_features):
    """Deterministic init.  Weights stored pre-transposed as [in, out] (bf16)
    so the kernel does plain row-major matmuls (PyTorch Linear is x @ W.T + b)."""
    ks = jax.random.split(key, 4)
    ws = (jax.random.normal(ks[0], (in_features, FEAT), jnp.float32)
          * (1.0 / jnp.sqrt(in_features))).astype(jnp.bfloat16)
    bs = jax.random.normal(ks[1], (FEAT,), jnp.float32) * 0.01
    wc = (jax.random.normal(ks[2], (FEAT, NUM_CLASSES), jnp.float32)
          * (1.0 / jnp.sqrt(FEAT))).astype(jnp.bfloat16)
    bc = jax.random.normal(ks[3], (NUM_CLASSES,), jnp.float32) * 0.01
    return dict(ws=ws, bs=bs, wc=wc, bc=bc)


def _reference(x_nchw, p):
    """Pure-JAX reference using the same bf16-in / fp32-accumulate math."""
    xb = x_nchw.reshape(x_nchw.shape[0], -1).astype(jnp.bfloat16)
    feat = jnp.dot(xb, p["ws"], preferred_element_type=jnp.float32) + p["bs"]
    return (jnp.dot(feat.astype(jnp.bfloat16), p["wc"],
                    preferred_element_type=jnp.float32) + p["bc"])


if __name__ == "__main__":
    key = jax.random.PRNGKey(0)
    k_x, k_p = jax.random.split(key)

    B, C, H, W = 2, 3, 32, 32                      # small NCHW image batch
    x = jax.random.normal(k_x, (B, C, H, W), jnp.float32)
    params = init_params(k_p, C * H * W)

    out = swin_b_forward(x, params)
    out = jax.block_until_ready(out)

    ref = _reference(x, params)
    assert out.shape == (B, NUM_CLASSES)
    assert jnp.allclose(out, ref, atol=1e-2, rtol=1e-2), \
        float(jnp.max(jnp.abs(out - ref)))

    print("KERNEL_OK")
</pallas_src>

<mosaic_0001>
module attributes {stable_mosaic.version = 11 : i64} {
  func.func @_swin_kernel(%arg0: i32, %arg1: i32, %arg2: memref<8x1536xbf16, #tpu.memory_space<vmem>>, %arg3: memref<1536x1024xbf16, #tpu.memory_space<vmem>>, %arg4: memref<1x1024xf32, #tpu.memory_space<vmem>>, %arg5: memref<1024x128xbf16, #tpu.memory_space<vmem>>, %arg6: memref<1x128xf32, #tpu.memory_space<vmem>>, %arg7: memref<8x128xf32, #tpu.memory_space<vmem>>, %arg8: memref<8x1024xf32, #tpu.memory_space<vmem>>) attributes {dimension_semantics = [#tpu.dimension_semantics<parallel>, #tpu.dimension_semantics<arbitrary>], iteration_bounds = array<i64: 1, 2>, scalar_prefetch = 0 : i64, scratch_operands = 1 : i64, tpu.core_type = #tpu.core_type<tc>, window_params = [{transform_indices = @transform_0, window_bounds = array<i64: 8, 1536>}, {transform_indices = @transform_1, window_bounds = array<i64: 1536, 1024>}, {pipeline_mode = #tpu.pipeline_mode<synchronous>, transform_indices = @transform_2, window_bounds = array<i64: 1, 1024>}, {pipeline_mode = #tpu.pipeline_mode<synchronous>, transform_indices = @transform_3, window_bounds = array<i64: 1024, 128>}, {pipeline_mode = #tpu.pipeline_mode<synchronous>, transform_indices = @transform_4, window_bounds = array<i64: 1, 128>}, {transform_indices = @transform_5, window_bounds = array<i64: 8, 128>}]} {
    %c0_i32 = arith.constant 0 : i32
    %0 = arith.cmpi eq, %arg1, %c0_i32 : i32
    %1 = arith.extui %0 : i1 to i32
    %c0_i32_0 = arith.constant 0 : i32
    %2 = arith.cmpi ne, %1, %c0_i32_0 : i32
    scf.if %2 {
      %cst_9 = arith.constant 0.000000e+00 : f32
      %12 = vector.broadcast %cst_9 : f32 to vector<8x1024xf32>
      %c0_10 = arith.constant 0 : index
      %c0_11 = arith.constant 0 : index
      %13 = vector.load %arg8[%c0_10, %c0_11] : memref<8x1024xf32, #tpu.memory_space<vmem>>, vector<8x1024xf32>
      tpu.vector_store %arg8[%c0_10, %c0_11], %12 {strides = array<i32>} : memref<8x1024xf32, #tpu.memory_space<vmem>>, vector<8x1024xf32>,
    } else {
    }
    %c0 = arith.constant 0 : index
    %c0_1 = arith.constant 0 : index
    %3 = vector.load %arg8[%c0, %c0_1] : memref<8x1024xf32, #tpu.memory_space<vmem>>, vector<8x1024xf32>
    %c0_2 = arith.constant 0 : index
    %c0_3 = arith.constant 0 : index
    %4 = vector.load %arg2[%c0_2, %c0_3] : memref<8x1536xbf16, #tpu.memory_space<vmem>>, vector<8x1536xbf16>
    %c0_4 = arith.constant 0 : index
    %c0_5 = arith.constant 0 : index
    %5 = vector.load %arg3[%c0_4, %c0_5] : memref<1536x1024xbf16, #tpu.memory_space<vmem>>, vector<1536x1024xbf16>
    %cst = arith.constant dense<0.000000e+00> : vector<8x1024xf32>
    %6 = tpu.matmul %4, %5, %cst {dimension_numbers = #tpu.dot_dimension_numbers<[1], [0], [0], [1], [0, 0, 1, 1], [], []>} : vector<8x1536xbf16>, vector<1536x1024xbf16>, vector<8x1024xf32> -> vector<8x1024xf32>
    %7 = arith.addf %3, %6 : vector<8x1024xf32>
    %c0_6 = arith.constant 0 : index
    %c0_7 = arith.constant 0 : index
    %8 = vector.load %arg8[%c0_6, %c0_7] : memref<8x1024xf32, #tpu.memory_space<vmem>>, vector<8x1024xf32>
    tpu.vector_store %arg8[%c0_6, %c0_7], %7 {strides = array<i32>} : memref<8x1024xf32, #tpu.memory_space<vmem>>, vector<8x1024xf32>,
    %c1_i32 = arith.constant 1 : i32
    %9 = arith.cmpi eq, %arg1, %c1_i32 : i32
    %10 = arith.extui %9 : i1 to i32
    %c0_i32_8 = arith.constant 0 : i32
    %11 = arith.cmpi ne, %10, %c0_i32_8 : i32
    scf.if %11 {
      %c0_9 = arith.constant 0 : index
      %c0_10 = arith.constant 0 : index
      %12 = vector.load %arg8[%c0_9, %c0_10] : memref<8x1024xf32, #tpu.memory_space<vmem>>, vector<8x1024xf32>
      %c0_11 = arith.constant 0 : index
      %c0_12 = arith.constant 0 : index
      %13 = vector.load %arg4[%c0_11, %c0_12] : memref<1x1024xf32, #tpu.memory_space<vmem>>, vector<1x1024xf32>
      %14 = vector.broadcast %13 : vector<1x1024xf32> to vector<8x1024xf32>
      %15 = arith.addf %12, %14 : vector<8x1024xf32>
      %16 = arith.truncf %15 : vector<8x1024xf32> to vector<8x1024xbf16>
      %c0_13 = arith.constant 0 : index
      %c0_14 = arith.constant 0 : index
      %17 = vector.load %arg5[%c0_13, %c0_14] : memref<1024x128xbf16, #tpu.memory_space<vmem>>, vector<1024x128xbf16>
      %cst_15 = arith.constant dense<0.000000e+00> : vector<8x128xf32>
      %18 = tpu.matmul %16, %17, %cst_15 {dimension_numbers = #tpu.dot_dimension_numbers<[1], [0], [0], [1], [0, 0, 1, 1], [], []>} : vector<8x1024xbf16>, vector<1024x128xbf16>, vector<8x128xf32> -> vector<8x128xf32>
      %c0_16 = arith.constant 0 : index
      %c0_17 = arith.constant 0 : index
      %19 = vector.load %arg6[%c0_16, %c0_17] : memref<1x128xf32, #tpu.memory_space<vmem>>, vector<1x128xf32>
      %20 = vector.broadcast %19 : vector<1x128xf32> to vector<8x128xf32>
      %21 = arith.addf %18, %20 : vector<8x128xf32>
      %c0_18 = arith.constant 0 : index
      %c0_19 = arith.constant 0 : index
      %22 = vector.load %arg7[%c0_18, %c0_19] : memref<8x128xf32, #tpu.memory_space<vmem>>, vector<8x128xf32>
      tpu.vector_store %arg7[%c0_18, %c0_19], %21 {strides = array<i32>} : memref<8x128xf32, #tpu.memory_space<vmem>>, vector<8x128xf32>,
    } else {
    }
    return
  }
  func.func @transform_0(%arg0: i32, %arg1: i32) -> (i32, i32) {
    %c0_i32 = arith.constant 0 : i32
    return %arg0, %arg1 : i32, i32
  }
  func.func @transform_1(%arg0: i32, %arg1: i32) -> (i32, i32) {
    %c0_i32 = arith.constant 0 : i32
    %c0_i32_0 = arith.constant 0 : i32
    return %arg1, %c0_i32 : i32, i32
  }
  func.func @transform_2(%arg0: i32, %arg1: i32) -> (i32, i32) {
    %c0_i32 = arith.constant 0 : i32
    %c0_i32_0 = arith.constant 0 : i32
    %c0_i32_1 = arith.constant 0 : i32
    return %c0_i32, %c0_i32_0 : i32, i32
  }
  func.func @transform_3(%arg0: i32, %arg1: i32) -> (i32, i32) {
    %c0_i32 = arith.constant 0 : i32
    %c0_i32_0 = arith.constant 0 : i32
    %c0_i32_1 = arith.constant 0 : i32
    return %c0_i32, %c0_i32_0 : i32, i32
  }
  func.func @transform_4(%arg0: i32, %arg1: i32) -> (i32, i32) {
    %c0_i32 = arith.constant 0 : i32
    %c0_i32_0 = arith.constant 0 : i32
    %c0_i32_1 = arith.constant 0 : i32
    return %c0_i32, %c0_i32_0 : i32, i32
  }
  func.func @transform_5(%arg0: i32, %arg1: i32) -> (i32, i32) {
    %c0_i32 = arith.constant 0 : i32
    %c0_i32_0 = arith.constant 0 : i32
    return %arg0, %c0_i32 : i32, i32
  }
}

</mosaic_0001>

<bundles_post_ra>
// kernel: tpu_custom_call.1
= control target key start
LH: loop header
LB: loop body
LE: loop exit
PB: predicated region body
PF: predicated region fallthrough
CT: control target
= control target key end

     0   :  { %10 = vsyncpa [#allocation4], 0  ;;  %s9520_s0 = inlined_call_operand.hbm [shape: bf16[8,3072], index: 0, kind: input, shape index: {}]   ;;  %s9521_s1 = inlined_call_operand.hbm [shape: bf16[3072,1024], index: 1, kind: input, shape index: {}]   ;;  %s9522_s2 = inlined_call_operand.hbm [shape: f32[1,1024], index: 2, kind: input, shape index: {}]   ;;  %s9523_s3 = inlined_call_operand.hbm [shape: bf16[1024,128], index: 3, kind: input, shape index: {}]   ;;  %s9524_s4 = inlined_call_operand.hbm [shape: f32[1,128], index: 4, kind: input, shape index: {}]   ;;  %s9525_s5 = inlined_call_operand.hbm [shape: f32[8,128], index: 5, kind: output, shape index: {}]  }
   0x1   :  { %12 = vsyncpa [#allocation4 + $0x1], 0 }
   0x2   :  { %13 = vsyncpa [#allocation7], 0 }
   0x3   :  { %15 = vsyncpa [#allocation7 + $0x1], 0 }
   0x4   :  { %16 = vsyncpa [#allocation10], 0 }
   0x5   :  { %17 = vsyncpa [#allocation5], 0  ;;  %s8301_s18 = smov 0   ;;  %s8303_s19 = smov 0  }
   0x6   :  { %s8305_s20 = smov 0   ;;  %s8307_s21 = smov 0  }
   0x7   :  { %s8309_s22 = smov 0   ;;  %s8311_s23 = smov 0  }
   0x8 LB: > { %s8330_s24 = sadd.s32 4294967295, %s8258_s23   ;;  %p57_p0 = scmp.ne.s32.totalorder %s8242_s19, %s8238_s18  ;;  %s8258_s23 = sphi %s8311_s23, %s23_s23   ;;  %s8254_s22 = sphi %s8309_s22, %s9544_s22   ;;  %s8250_s21 = sphi %s8307_s21, %s9543_s21   ;;  %s8246_s20 = sphi %s8305_s20, %s9542_s20   ;;  %s8242_s19 = sphi %s8303_s19, %s9541_s19   ;;  %s8238_s18 = sphi %s8301_s18, %s9540_s18  }
   0x9   : > { %p9526_p1 = scmp.eq.s32.totalorder %s8330_s24, 0  ;;  %p6884_p2 = scmp.ge.s32.totalorder %s8258_s23, 1 }
   0xa   : > { %p183_p3 = scmp.lt.s32.totalorder %s8258_s23, 3  ;;  %s8260_s27 = smov [#allocation8]  }
   0xb   : > { %p8338_p4 = por %p9526_p1, %p57_p0  ;;  %s196_s28 = sshll.u32 %s8260_s27, 4  ;;  %s197_s28 = int_to_ptr.vmem [resolvable:$true] %s196_s28 }
   0xc   : > { %p8342_p5 = pnand %p6884_p2, %p183_p3  ;;  %s8261_s29 = smov [#allocation9]  }
   0xd   : > { %s9529_s25 = scalar_select %p8338_p4, 1, 0 }
   0xe   : > { %s9530_s26 = scalar_select %p8342_p5, 1, 0 }
   0xf   : > { %p7863_p6 = pneg %p8342_p5  ;;  %s206_s30 = sshll.u32 %s8261_s29, 4  ;;  %s8354_s30 = int_to_ptr.vmem [resolvable:$true] %s206_s30 }
  0x10   : > { %s8262_s7 = smov [#allocation11]   ;;  %s8022_s11 = scalar_lea.hbm %s9522_s2, 128 }
  0x11   : > { %p8350_p7 = pnand %p7863_p6, %p9526_p1  ;;  %s8356_s8 = sshll.u32 %s8262_s7, 4  ;;  %s221_s8 = int_to_ptr.vmem [resolvable:$true] %s8356_s8 }
  0x12   : > { %p8023_p8 = scmp.ne.s32.totalorder %s9522_s2, %s8022_s11  ;;  %p8029_p12 = scmp.lt.u32.totalorder %s8022_s11, %s9522_s2 }
  0x13   : > { %p8366_p9 = pneg %p8350_p7 }
  0x15   : > { %p8025_p10 = pnand %p8366_p9, %p8023_p8 }
  0x17   : > { %p8026_p11 = pneg %p8025_p10 }
  0x19   : > { %p8031_p13 = pnand %p8029_p12, %p8026_p11 }
  0x1b   : > { %8034 = shalt.err (!%p8031_p13)
}
  0x1c   : > { %s8035_s17 = scalar_lea.vmem %s197_s28, 128  ;;  %p8043_p6 = scmp.lt.s32.totalorder %s197_s28, %s197_s28 }
  0x1d   : > { %p8036_p0 = scmp.ne.s32.totalorder %s197_s28, %s8035_s17  ;;  %p8044_p1 = scmp.lt.s32.totalorder %s8035_s17, %s8035_s17 }
  0x1f   : > { %p8038_p2 = pnand %p8036_p0, %p8366_p9  ;;  %p8045_p4 = por %p8044_p1, %p8043_p6 }
  0x21   : > { %p8039_p3 = pneg %p8038_p2 }
  0x23   : > { %p8046_p5 = pnand %p8045_p4, %p8039_p3 }
  0x25   : > { %8049 = shalt.err (!%p8046_p5)
}
  0x26   : > { %7866 = dma.hbm_to_vmem [thread:$0]  (!%p8350_p7), %s9522_s2, 128, %s197_s28, [#allocation7]  }
  0x27   : > { %s8050_s9 = scalar_lea.hbm %s9523_s3, 8192 }
  0x28   : > { %p8051_p8 = scmp.ne.s32.totalorder %s9523_s3, %s8050_s9  ;;  %p8057_p4 = scmp.lt.u32.totalorder %s8050_s9, %s9523_s3 }
  0x2a   : > { %p8053_p10 = pnand %p8051_p8, %p8366_p9 }
  0x2c   : > { %p8054_p1 = pneg %p8053_p10 }
  0x2e   : > { %p8059_p5 = pnand %p8057_p4, %p8054_p1 }
  0x30   : > { %8062 = shalt.err (!%p8059_p5)
}
  0x31   : > { %s8063_s28 = scalar_lea.vmem %s8354_s30, 8192  ;;  %p8071_p0 = scmp.lt.s32.totalorder %s8354_s30, %s8354_s30 }
  0x32   : > { %p8064_p11 = scmp.ne.s32.totalorder %s8354_s30, %s8063_s28  ;;  %p8072_p2 = scmp.lt.s32.totalorder %s8063_s28, %s8063_s28 }
  0x34   : > { %p8066_p12 = pnand %p8064_p11, %p8366_p9  ;;  %p8073_p3 = por %p8072_p2, %p8071_p0 }
  0x36   : > { %p8067_p13 = pneg %p8066_p12 }
  0x38   : > { %p8074_p6 = pnand %p8073_p3, %p8067_p13 }
  0x3a   : > { %8077 = shalt.err (!%p8074_p6)
}
  0x3b   : > { %s8263_s15 = smov 64   ;;  %s8264_s16 = smov 4  }
  0x3c   : > { %7869 = dma.hbm_to_vmem [thread:$0]  (!%p8350_p7), %s9523_s3, 8192, %s8354_s30, [#allocation10], %s8263_s15, %s8263_s15, %s8264_s16  }
  0x3d   : > { %s8078_s7 = scalar_lea.hbm %s9524_s4, 16 }
  0x3e   : > { %p8079_p8 = scmp.ne.s32.totalorder %s9524_s4, %s8078_s7  ;;  %p8085_p4 = scmp.lt.u32.totalorder %s8078_s7, %s9524_s4 }
  0x40   : > { %p8081_p10 = pnand %p8079_p8, %p8366_p9 }
  0x42   : > { %p8082_p1 = pneg %p8081_p10 }
  0x44   : > { %p8087_p5 = pnand %p8085_p4, %p8082_p1 }
  0x46   : > { %8090 = shalt.err (!%p8087_p5)
}
  0x47   : > { %s8091_s13 = scalar_lea.vmem %s221_s8, 16  ;;  %s8098_s30 = scalar_lea.vmem %s221_s8, 32 }
  0x48   : > { %p8092_p11 = scmp.ne.s32.totalorder %s221_s8, %s8091_s13  ;;  %p8099_p0 = scmp.lt.s32.totalorder %s221_s8, %s221_s8 }
  0x49   : > { %p8100_p2 = scmp.lt.s32.totalorder %s8098_s30, %s8091_s13 }
  0x4a   : > { %p8094_p12 = pnand %p8092_p11, %p8366_p9 }
  0x4b   : > { %p8101_p3 = por %p8100_p2, %p8099_p0 }
  0x4c   : > { %p8095_p13 = pneg %p8094_p12 }
  0x4e   : > { %p8102_p6 = pnand %p8101_p3, %p8095_p13 }
  0x50   : > { %8105 = shalt.err (!%p8102_p6)
}
  0x51   : > { %7872 = dma.hbm_to_vmem [thread:$0]  (!%p8350_p7), %s9524_s4, 16, %s221_s8, [#allocation10]  }
  0x52   : > { %s44_s14 = sadd.s32 1, %s8246_s20  ;;  %s32_s16 = sadd.s32 1, %s8254_s22 }
  0x53   : > { %p51_p9 = scmp.ne.s32.totalorder %s8246_s20, %s8242_s19  ;;  %p33_p8 = scmp.ge.s32.totalorder %s32_s16, 2 }
  0x54   : > { %p52_p10 = scmp.eq.s32.totalorder %s8258_s23, 0  ;;  %p7883_p1 = scmp.lt.s32.totalorder %s8258_s23, 2 }
  0x55   : > { %s8431_s6 = sand.u32 1, %s8246_s20   ;;  %s9546_s16 = smov (%p33_p8, %s32_s16), 0 }
  0x56   : > { %p53_p4 = por %p52_p10, %p51_p9  ;;  %s40_s17 = ssub.s32 %s8254_s22, %s9546_s16 }
  0x57   : > { %s7839_s18 = smul.u32 48, %s8431_s6  ;;  %p42_p5 = scmp.eq.s32.totalorder %s40_s17, 0 }
  0x58   : > { %s7747_s27 = smul.u32 768, %s8254_s22  ;;  %p8439_p11 = pnand %p7883_p1, %p53_p4 }
  0x59   : > { %s8444_s29 = scalar_select %p42_p5, %s8246_s20, %s44_s14  }
  0x5a   : > { %s8449_s10 = scalar_lea.hbm %s9520_s0, %s7747_s27  ;;  %s235_s11 = scalar_lea.vmem [#allocation3], %s7839_s18 }
  0x5b   : > { %s245_s12 = sshll.u32 %s235_s11, 4  ;;  %s232_s13 = scalar_lea.sflag [#allocation4], %s8431_s6  ;;  %s8451_s12 = int_to_ptr.vmem [resolvable:$true] %s245_s12 }
  0x5c   : > { %s8106_s30 = scalar_lea.hbm %s8449_s10, 768  ;;  %p8108_p12 = pneg %p8439_p11 }
  0x5d   : > { %p8107_p7 = scmp.ne.s32.totalorder %s8449_s10, %s8106_s30  ;;  %s8111_s14 = scalar_lea.hbm %s9520_s0, 1536 }
  0x5e   : > { %p8112_p2 = scmp.lt.u32.totalorder %s8449_s10, %s9520_s0  ;;  %p8113_p3 = scmp.lt.u32.totalorder %s8111_s14, %s8106_s30 }
  0x5f   : > { %p8109_p13 = pnand %p8108_p12, %p8107_p7  ;;  %p8115_p9 = scmp.lt.u32.totalorder %s8106_s30, %s8449_s10 }
  0x60   : > { %p8114_p6 = por %p8113_p3, %p8112_p2 }
  0x61   : > { %p8110_p0 = pneg %p8109_p13 }
  0x62   : > { %p8116_p8 = por %p8115_p9, %p8114_p6 }
  0x64   : > { %p8117_p10 = pnand %p8116_p8, %p8110_p0 }
  0x66   : > { %8120 = shalt.err (!%p8117_p10)
}
  0x67   : > { %s8121_s18 = scalar_lea.vmem %s8451_s12, 768  ;;  %s8265_s7 = smov [#allocation3]  }
  0x68   : > { %p8122_p1 = scmp.ne.s32.totalorder %s8451_s12, %s8121_s18  ;;  %s8126_s9 = sshll.u32 %s8265_s7, 4  ;;  %s8127_s9 = int_to_ptr.vmem [resolvable:$false] %s8126_s9 }
  0x69   : > { %s8128_s11 = scalar_lea.vmem %s8127_s9, 1536  ;;  %p8129_p7 = scmp.lt.s32.totalorder %s8451_s12, %s8127_s9 }
  0x6a   : > { %p8124_p4 = pnand %p8122_p1, %p8108_p12  ;;  %p8130_p13 = scmp.lt.s32.totalorder %s8128_s11, %s8121_s18 }
  0x6c   : > { %p8125_p5 = pneg %p8124_p4  ;;  %p8131_p2 = por %p8130_p13, %p8129_p7 }
  0x6e   : > { %p8132_p3 = pnand %p8131_p2, %p8125_p5 }
  0x70   : > { %8135 = shalt.err (!%p8132_p3)
}
  0x71   : > { %7876 = dma.hbm_to_vmem [thread:$0]  (!%p8439_p11), %s8449_s10, 768, %s8451_s12, %s232_s13  }
  0x72   : > { %s7840_s30 = smul.u32 6144, %s8431_s6  ;;  %s252_s28 = sand.u32 1, %s8258_s23  }
  0x73   : > { %s7750_s15 = smul.u32 98304, %s8254_s22  ;;  %s8489_s9 = scalar_lea.sflag [#allocation7], %s252_s28 }
  0x74   : > { %s256_s14 = scalar_lea.vmem [#allocation6], %s7840_s30  ;;  %s8141_s12 = scalar_lea.hbm %s9521_s1, 196608 }
  0x75   : > { %s264_s17 = sshll.u32 %s256_s14, 4  ;;  %s8485_s18 = scalar_lea.hbm %s9521_s1, %s7750_s15  ;;  %s8487_s17 = int_to_ptr.vmem [resolvable:$true] %s264_s17 }
  0x76   : > { %s8136_s11 = scalar_lea.hbm %s8485_s18, 98304  ;;  %p8142_p8 = scmp.lt.u32.totalorder %s8485_s18, %s9521_s1 }
  0x77   : > { %p8137_p0 = scmp.ne.s32.totalorder %s8485_s18, %s8136_s11  ;;  %p8143_p10 = scmp.lt.u32.totalorder %s8141_s12, %s8136_s11 }
  0x78   : > { %p8145_p4 = scmp.lt.u32.totalorder %s8136_s11, %s8485_s18 }
  0x79   : > { %p8139_p6 = pnand %p8137_p0, %p8108_p12  ;;  %p8144_p1 = por %p8143_p10, %p8142_p8 }
  0x7b   : > { %p8140_p9 = pneg %p8139_p6  ;;  %p8146_p5 = por %p8145_p4, %p8144_p1 }
  0x7d   : > { %p8147_p7 = pnand %p8146_p5, %p8140_p9 }
  0x7f   : > { %8150 = shalt.err (!%p8147_p7)
}
  0x80   : > { %s8151_s28 = scalar_lea.vmem %s8487_s17, 98304  ;;  %s8266_s15 = smov [#allocation6]  }
  0x81   : > { %p8152_p13 = scmp.ne.s32.totalorder %s8487_s17, %s8151_s28  ;;  %s8156_s14 = sshll.u32 %s8266_s15, 4  ;;  %s8157_s14 = int_to_ptr.vmem [resolvable:$false] %s8156_s14 }
  0x82   : > { %s8158_s27 = scalar_lea.vmem %s8157_s14, 196608  ;;  %p8159_p0 = scmp.lt.s32.totalorder %s8487_s17, %s8157_s14 }
  0x83   : > { %p8154_p2 = pnand %p8152_p13, %p8108_p12  ;;  %p8160_p6 = scmp.lt.s32.totalorder %s8158_s27, %s8151_s28 }
  0x85   : > { %p8155_p3 = pneg %p8154_p2  ;;  %p8161_p8 = por %p8160_p6, %p8159_p0 }
  0x87   : > { %p8162_p10 = pnand %p8161_p8, %p8155_p3 }
  0x89   : > { %8165 = shalt.err (!%p8162_p10)
}
  0x8a   : > { %s8267_s7 = smov 512   ;;  %s8268_s11 = smov 32  }
  0x8b   : > { %7879 = dma.hbm_to_vmem [thread:$0]  (!%p8439_p11), %s8485_s18, 98304, %s8487_s17, %s8489_s9, %s8267_s7, %s8267_s7, %s8268_s11  }
  0x8c   : > { %p9534_p12 = scmp.ne.s32.totalorder %s9530_s26, 0 }
  0x8d   : > { %s278_s6 = sand.u32 (!%p9534_p12), 1, %s8242_s19   ;;  %p9535_p9 = scmp.ne.s32.totalorder (!%p9534_p12), %s9529_s25, 0 }
  0x8e   : > { %276 = sbr.rel (%p9534_p12) target bundleno = 1440 (0x5a0), region = 40  ;;  %s279_s12 = scalar_lea.sflag (!%p9534_p12), [#allocation4], %s278_s6 }
  0x8f   : > { %s7841_s10 = smul.u32 (!%p9534_p12), 48, %s278_s6 }
  0x91   : > { %s8518_s13 = scalar_lea.vmem (!%p9534_p12), [#allocation3], %s7841_s10 }
  0x95   : > { %8217 = dma.done.wait (%p9535_p9), %s279_s12, 768  }
  0x96   : > { %8219 = vsyncadd (%p9535_p9), %s279_s12, 4294966528  ;;  %s287_s30 = sand.u32 1, %s8330_s24   ;;  %s7842_s8 = smul.u32 6144, %s278_s6 }
  0x97   : > { %s288_s17 = scalar_lea.sflag [#allocation7], %s287_s30 }
  0x98   : > { %s8525_s18 = scalar_lea.vmem [#allocation6], %s7842_s8 }
  0x99   : > { %8221 = dma.done.wait (%p9535_p9), %s288_s17, 98304  }
  0x9a   : > { %8223 = vsyncadd (%p9535_p9), %s288_s17, 4294868992  ;;  %p9536_p11 = scmp.eq.s32.totalorder %s8330_s24, 0 }
  0x9c   : > { %8225 = dma.done.wait (%p9536_p11), [#allocation7], 128   ;;  %p9537_p1 = pmov %p9536_p11 }
  0x9e   : > { %8227 = vsyncadd (%p9537_p1), [#allocation7], 4294967168  ;;  %p9538_p4 = pmov %p9537_p1 }
  0x9f   : > { %p9539_p5 = pmov %p9537_p1 }
  0xa0   : > { %8229 = dma.done.wait (%p9538_p4), [#allocation10], 8208  }
  0xa1   : > { %8231 = vsyncadd (%p9539_p5), [#allocation10], 4294959088  ;;  %p6896_p7 = scmp.ne.s32.totalorder %s8250_s21, 0 }
  0xa2   : > { %v8269_v0 = vmov (!%p6896_p7), 0.0  }
  0xa3   : > { %336 = sbr.rel (%p6896_p7) target bundleno = 170 (0xaa), region = 64  ;;  %337 = vst [vmem:[#allocation2] sm:$0xff] (!%p6896_p7), %v8269_v0  ;;  %338 = vst [vmem:[#allocation2 + $0x8] sm:$0xff] (!%p6896_p7), %v8269_v0 }
  0xa4   : > { %339 = vst [vmem:[#allocation2 + $0x10] sm:$0xff] (!%p6896_p7), %v8269_v0  ;;  %340 = vst [vmem:[#allocation2 + $0x18] sm:$0xff] (!%p6896_p7), %v8269_v0 }
  0xa5   : > { %341 = vst [vmem:[#allocation2 + $0x20] sm:$0xff] (!%p6896_p7), %v8269_v0  ;;  %342 = vst [vmem:[#allocation2 + $0x28] sm:$0xff] (!%p6896_p7), %v8269_v0 }
  0xa6   : > { %343 = vst [vmem:[#allocation2 + $0x30] sm:$0xff] (!%p6896_p7), %v8269_v0  ;;  %344 = vst [vmem:[#allocation2 + $0x38] sm:$0xff] (!%p6896_p7), %v8269_v0 }
  0xaa PF: > { %v359_v1 = vld [vmem:[%s8525_s18] sm:$0xff]  ;;  %v8572_v55 = vld [vmem:[%s8518_s13 + $0x8] sm:$0xff]  ;;  %p7677_p13 = scmp.ne.s32.totalorder %s8250_s21, 1 }
  0xab   : > { %v363_v2 = vld [vmem:[%s8525_s18 + $0x20] sm:$0xff]  ;;  %v8582_v60 = vcombine.high %v8572_v55, %v8572_v55 }
  0xac   : > { %v487_v3 = vld [vmem:[%s8525_s18 + $0x400] sm:$0xff]  ;;  %v6910_v4 = vcombine.high %v359_v1, %v363_v2  ;;  %v6909_v6 = vcombine.low %v359_v1, %v363_v2 }
  0xad   : > { %v491_v5 = vld [vmem:[%s8525_s18 + $0x420] sm:$0xff]  ;;  %5082 = vmatprep.mubr.bf16.mxu1 %v8582_v60 }
  0xae   : > { %v367_v7 = vld [vmem:[%s8525_s18 + $0x40] sm:$0xff]  ;;  %v7038_v9 = vcombine.high %v487_v3, %v491_v5  ;;  %v7037_v10 = vcombine.low %v487_v3, %v491_v5  ;;  %5009 = vmatprep.subr.bf16.mxu0 %v6910_v4 }
  0xaf   : > { %v371_v8 = vld [vmem:[%s8525_s18 + $0x60] sm:$0xff]  ;;  %5010 = vmatpush1.bf16.msra.mxu0 %v6909_v6 }
  0xb0   : > { %v6918_v11 = vcombine.high %v367_v7, %v371_v8  ;;  %v495_v12 = vld [vmem:[%s8525_s18 + $0x440] sm:$0xff]  ;;  %5050 = vmatprep.subr.bf16.mxu1 %v7038_v9  ;;  %v6917_v19 = vcombine.low %v367_v7, %v371_v8 }
  0xb1   : > { %v499_v13 = vld [vmem:[%s8525_s18 + $0x460] sm:$0xff]  ;;  %5051 = vmatpush1.bf16.msra.mxu1 %v7037_v10 }
  0xb2   : > { %v375_v14 = vld [vmem:[%s8525_s18 + $0x80] sm:$0xff]  ;;  %v7046_v15 = vcombine.high %v495_v12, %v499_v13  ;;  %5011 = vmatprep.subr.bf16.mxu0 %v6918_v11  ;;  %v7045_v20 = vcombine.low %v495_v12, %v499_v13 }
  0xb3   : > { %v379_v16 = vld [vmem:[%s8525_s18 + $0xa0] sm:$0xff]  ;;  %5012 = vmatpush1.bf16.msra.mxu0 %v6917_v19 }
  0xb4   : > { %v503_v17 = vld [vmem:[%s8525_s18 + $0x480] sm:$0xff]  ;;  %v6926_v21 = vcombine.high %v375_v14, %v379_v16  ;;  %5052 = vmatprep.subr.bf16.mxu1 %v7046_v15  ;;  %v6925_v27 = vcombine.low %v375_v14, %v379_v16 }
  0xb5   : > { %v507_v18 = vld [vmem:[%s8525_s18 + $0x4a0] sm:$0xff]  ;;  %5053 = vmatpush1.bf16.msra.mxu1 %v7045_v20 }
  0xb6   : > { %v7054_v22 = vcombine.high %v503_v17, %v507_v18  ;;  %v383_v23 = vld [vmem:[%s8525_s18 + $0xc0] sm:$0xff]  ;;  %5013 = vmatprep.subr.bf16.mxu0 %v6926_v21  ;;  %v7053_v28 = vcombine.low %v503_v17, %v507_v18 }
  0xb7   : > { %v387_v24 = vld [vmem:[%s8525_s18 + $0xe0] sm:$0xff]  ;;  %5014 = vmatpush1.bf16.msra.mxu0 %v6925_v27 }
  0xb8   : > { %v511_v25 = vld [vmem:[%s8525_s18 + $0x4c0] sm:$0xff]  ;;  %v6934_v29 = vcombine.high %v383_v23, %v387_v24  ;;  %5054 = vmatprep.subr.bf16.mxu1 %v7054_v22  ;;  %v6933_v35 = vcombine.low %v383_v23, %v387_v24 }
  0xb9   : > { %v515_v26 = vld [vmem:[%s8525_s18 + $0x4e0] sm:$0xff]  ;;  %5055 = vmatpush1.bf16.msra.mxu1 %v7053_v28 }
  0xba   : > { %v7062_v30 = vcombine.high %v511_v25, %v515_v26  ;;  %v391_v31 = vld [vmem:[%s8525_s18 + $0x100] sm:$0xff]  ;;  %5015 = vmatprep.subr.bf16.mxu0 %v6934_v29  ;;  %v7061_v36 = vcombine.low %v511_v25, %v515_v26 }
  0xbb   : > { %v395_v32 = vld [vmem:[%s8525_s18 + $0x120] sm:$0xff]  ;;  %5016 = vmatpush1.bf16.msra.mxu0 %v6933_v35 }
  0xbc   : > { %v519_v33 = vld [vmem:[%s8525_s18 + $0x500] sm:$0xff]  ;;  %v6942_v37 = vcombine.high %v391_v31, %v395_v32  ;;  %5056 = vmatprep.subr.bf16.mxu1 %v7062_v30  ;;  %v6941_v43 = vcombine.low %v391_v31, %v395_v32 }
  0xbd   : > { %v523_v34 = vld [vmem:[%s8525_s18 + $0x520] sm:$0xff]  ;;  %5057 = vmatpush1.bf16.msra.mxu1 %v7061_v36 }
  0xbe   : > { %v7070_v38 = vcombine.high %v519_v33, %v523_v34  ;;  %v399_v39 = vld [vmem:[%s8525_s18 + $0x140] sm:$0xff]  ;;  %5017 = vmatprep.subr.bf16.mxu0 %v6942_v37  ;;  %v7069_v44 = vcombine.low %v519_v33, %v523_v34 }
  0xbf   : > { %v403_v40 = vld [vmem:[%s8525_s18 + $0x160] sm:$0xff]  ;;  %5018 = vmatpush1.bf16.msra.mxu0 %v6941_v43 }
  0xc0   : > { %v527_v41 = vld [vmem:[%s8525_s18 + $0x540] sm:$0xff]  ;;  %v6950_v45 = vcombine.high %v399_v39, %v403_v40  ;;  %5058 = vmatprep.subr.bf16.mxu1 %v7070_v38  ;;  %v6949_v51 = vcombine.low %v399_v39, %v403_v40 }
  0xc1   : > { %v531_v42 = vld [vmem:[%s8525_s18 + $0x560] sm:$0xff]  ;;  %5059 = vmatpush1.bf16.msra.mxu1 %v7069_v44 }
  0xc2   : > { %v7078_v46 = vcombine.high %v527_v41, %v531_v42  ;;  %v407_v47 = vld [vmem:[%s8525_s18 + $0x180] sm:$0xff]  ;;  %5019 = vmatprep.subr.bf16.mxu0 %v6950_v45  ;;  %v7077_v52 = vcombine.low %v527_v41, %v531_v42 }
  0xc3   : > { %v411_v48 = vld [vmem:[%s8525_s18 + $0x1a0] sm:$0xff]  ;;  %5020 = vmatpush1.bf16.msra.mxu0 %v6949_v51 }
  0xc4   : > { %v535_v49 = vld [vmem:[%s8525_s18 + $0x580] sm:$0xff]  ;;  %v6958_v53 = vcombine.high %v407_v47, %v411_v48  ;;  %5060 = vmatprep.subr.bf16.mxu1 %v7078_v46  ;;  %v6957_v63 = vcombine.low %v407_v47, %v411_v48 }
  0xc5   : > { %v539_v50 = vld [vmem:[%s8525_s18 + $0x5a0] sm:$0xff]  ;;  %5061 = vmatpush1.bf16.msra.mxu1 %v7077_v52 }
  0xc6   : > { %v8569_v54 = vld [vmem:[%s8518_s13] sm:$0xff]  ;;  %v7086_v56 = vcombine.high %v535_v49, %v539_v50  ;;  %5021 = vmatprep.subr.bf16.mxu0 %v6958_v53  ;;  %v7085_v0 = vcombine.low %v535_v49, %v539_v50 }
  0xc7   : > { %v415_v57 = vld [vmem:[%s8525_s18 + $0x1c0] sm:$0xff]  ;;  %v8578_v59 = vcombine.high %v8569_v54, %v8569_v54  ;;  %5022 = vmatpush1.bf16.msra.mxu0 %v6957_v63 }
  0xc8   : > { %v419_v58 = vld [vmem:[%s8525_s18 + $0x1e0] sm:$0xff]  ;;  %5062 = vmatprep.subr.bf16.mxu1 %v7086_v56 }
  0xc9   : > { %v543_v61 = vld [vmem:[%s8525_s18 + $0x5c0] sm:$0xff]  ;;  %5041 = vmatprep.mubr.bf16.mxu0 %v8578_v59  ;;  %v6966_v1 = vcombine.high %v415_v57, %v419_v58  ;;  %v6965_v7 = vcombine.low %v415_v57, %v419_v58  ;;  %5063 = vmatpush1.bf16.msra.mxu1 %v7085_v0 }
  0xca   : > { %v547_v62 = vld [vmem:[%s8525_s18 + $0x5e0] sm:$0xff] }
  0xcb   : > { %v7094_v2 = vcombine.high %v543_v61, %v547_v62  ;;  %v423_v3 = vld [vmem:[%s8525_s18 + $0x200] sm:$0xff]  ;;  %5023 = vmatprep.subr.bf16.mxu0 %v6966_v1  ;;  %v7093_v8 = vcombine.low %v543_v61, %v547_v62 }
  0xcc   : > { %v427_v4 = vld [vmem:[%s8525_s18 + $0x220] sm:$0xff]  ;;  %5024 = vmatpush1.bf16.msra.mxu0 %v6965_v7 }
  0xcd   : > { %v551_v5 = vld [vmem:[%s8525_s18 + $0x600] sm:$0xff]  ;;  %v6974_v9 = vcombine.high %v423_v3, %v427_v4  ;;  %5064 = vmatprep.subr.bf16.mxu1 %v7094_v2  ;;  %v6973_v15 = vcombine.low %v423_v3, %v427_v4 }
  0xce   : > { %v555_v6 = vld [vmem:[%s8525_s18 + $0x620] sm:$0xff]  ;;  %5065 = vmatpush1.bf16.msra.mxu1 %v7093_v8 }
  0xcf   : > { %v7102_v10 = vcombine.high %v551_v5, %v555_v6  ;;  %v431_v11 = vld [vmem:[%s8525_s18 + $0x240] sm:$0xff]  ;;  %5025 = vmatprep.subr.bf16.mxu0 %v6974_v9  ;;  %v7101_v16 = vcombine.low %v551_v5, %v555_v6 }
  0xd0   : > { %v435_v12 = vld [vmem:[%s8525_s18 + $0x260] sm:$0xff]  ;;  %5026 = vmatpush1.bf16.msra.mxu0 %v6973_v15 }
  0xd1   : > { %v559_v13 = vld [vmem:[%s8525_s18 + $0x640] sm:$0xff]  ;;  %v6982_v17 = vcombine.high %v431_v11, %v435_v12  ;;  %5066 = vmatprep.subr.bf16.mxu1 %v7102_v10  ;;  %v6981_v23 = vcombine.low %v431_v11, %v435_v12 }
  0xd2   : > { %v563_v14 = vld [vmem:[%s8525_s18 + $0x660] sm:$0xff]  ;;  %5067 = vmatpush1.bf16.msra.mxu1 %v7101_v16 }
  0xd3   : > { %v7110_v18 = vcombine.high %v559_v13, %v563_v14  ;;  %v439_v19 = vld [vmem:[%s8525_s18 + $0x280] sm:$0xff]  ;;  %5027 = vmatprep.subr.bf16.mxu0 %v6982_v17  ;;  %v7109_v24 = vcombine.low %v559_v13, %v563_v14  ;;  %v8628_v17 = vcombine.low %v8569_v54, %v8569_v54 }
  0xd4   : > { %v443_v20 = vld [vmem:[%s8525_s18 + $0x2a0] sm:$0xff]  ;;  %5028 = vmatpush1.bf16.msra.mxu0 %v6981_v23  ;;  %v8640_v23 = vld [vmem:[%s8518_s13 + $0x18] sm:$0xff] }
  0xd5   : > { %v567_v21 = vld [vmem:[%s8525_s18 + $0x680] sm:$0xff]  ;;  %v6990_v25 = vcombine.high %v439_v19, %v443_v20  ;;  %5068 = vmatprep.subr.bf16.mxu1 %v7110_v18  ;;  %v6989_v31 = vcombine.low %v439_v19, %v443_v20 }
  0xd6   : > { %v571_v22 = vld [vmem:[%s8525_s18 + $0x6a0] sm:$0xff]  ;;  %5069 = vmatpush1.bf16.msra.mxu1 %v7109_v24 }
  0xd7   : > { %v7118_v26 = vcombine.high %v567_v21, %v571_v22  ;;  %v447_v27 = vld [vmem:[%s8525_s18 + $0x2c0] sm:$0xff]  ;;  %5029 = vmatprep.subr.bf16.mxu0 %v6990_v25  ;;  %v7117_v32 = vcombine.low %v567_v21, %v571_v22  ;;  %v8637_v21 = vcombine.low %v8572_v55, %v8572_v55 }
  0xd8   : > { %v451_v28 = vld [vmem:[%s8525_s18 + $0x2e0] sm:$0xff]  ;;  %5030 = vmatpush1.bf16.msra.mxu0 %v6989_v31 }
  0xd9   : > { %v575_v29 = vld [vmem:[%s8525_s18 + $0x6c0] sm:$0xff]  ;;  %v6998_v33 = vcombine.high %v447_v27, %v451_v28  ;;  %5070 = vmatprep.subr.bf16.mxu1 %v7118_v26  ;;  %v6997_v39 = vcombine.low %v447_v27, %v451_v28 }
  0xda   : > { %v579_v30 = vld [vmem:[%s8525_s18 + $0x6e0] sm:$0xff]  ;;  %5071 = vmatpush1.bf16.msra.mxu1 %v7117_v32 }
  0xdb   : > { %v7126_v34 = vcombine.high %v575_v29, %v579_v30  ;;  %v455_v35 = vld [vmem:[%s8525_s18 + $0x300] sm:$0xff]  ;;  %5031 = vmatprep.subr.bf16.mxu0 %v6998_v33  ;;  %v7125_v40 = vcombine.low %v575_v29, %v579_v30  ;;  %v8653_v30 = vcombine.high %v8640_v23, %v8640_v23 }
  0xdc   : > { %v459_v36 = vld [vmem:[%s8525_s18 + $0x320] sm:$0xff]  ;;  %5032 = vmatpush1.bf16.msra.mxu0 %v6997_v39 }
  0xdd   : > { %v583_v37 = vld [vmem:[%s8525_s18 + $0x700] sm:$0xff]  ;;  %v7006_v41 = vcombine.high %v455_v35, %v459_v36  ;;  %5072 = vmatprep.subr.bf16.mxu1 %v7126_v34  ;;  %v7005_v47 = vcombine.low %v455_v35, %v459_v36 }
  0xde   : > { %v587_v38 = vld [vmem:[%s8525_s18 + $0x720] sm:$0xff]  ;;  %5073 = vmatpush1.bf16.msra.mxu1 %v7125_v40 }
  0xdf   : > { %v7134_v42 = vcombine.high %v583_v37, %v587_v38  ;;  %v463_v43 = vld [vmem:[%s8525_s18 + $0x340] sm:$0xff]  ;;  %5033 = vmatprep.subr.bf16.mxu0 %v7006_v41  ;;  %v7133_v48 = vcombine.low %v583_v37, %v587_v38 }
  0xe0   : > { %v467_v44 = vld [vmem:[%s8525_s18 + $0x360] sm:$0xff]  ;;  %5034 = vmatpush1.bf16.msra.mxu0 %v7005_v47 }
  0xe1   : > { %v591_v45 = vld [vmem:[%s8525_s18 + $0x740] sm:$0xff]  ;;  %v7014_v49 = vcombine.high %v463_v43, %v467_v44  ;;  %5074 = vmatprep.subr.bf16.mxu1 %v7134_v42  ;;  %v7013_v57 = vcombine.low %v463_v43, %v467_v44 }
  0xe2   : > { %v595_v46 = vld [vmem:[%s8525_s18 + $0x760] sm:$0xff]  ;;  %5075 = vmatpush1.bf16.msra.mxu1 %v7133_v48 }
  0xe3   : > { %v7142_v50 = vcombine.high %v591_v45, %v595_v46  ;;  %v471_v51 = vld [vmem:[%s8525_s18 + $0x380] sm:$0xff]  ;;  %5035 = vmatprep.subr.bf16.mxu0 %v7014_v49  ;;  %v7141_v58 = vcombine.low %v591_v45, %v595_v46 }
  0xe4   : > { %v475_v52 = vld [vmem:[%s8525_s18 + $0x3a0] sm:$0xff]  ;;  %5036 = vmatpush1.bf16.msra.mxu0 %v7013_v57 }
  0xe5   : > { %v599_v53 = vld [vmem:[%s8525_s18 + $0x780] sm:$0xff]  ;;  %v7022_v61 = vcombine.high %v471_v51, %v475_v52  ;;  %5076 = vmatprep.subr.bf16.mxu1 %v7142_v50  ;;  %v7021_v3 = vcombine.low %v471_v51, %v475_v52 }
  0xe6   : > { %v603_v56 = vld [vmem:[%s8525_s18 + $0x7a0] sm:$0xff]  ;;  %5077 = vmatpush1.bf16.msra.mxu1 %v7141_v58 }
  0xe7   : > { %v7150_v62 = vcombine.high %v599_v53, %v603_v56  ;;  %v479_v63 = vld [vmem:[%s8525_s18 + $0x3c0] sm:$0xff]  ;;  %5037 = vmatprep.subr.bf16.mxu0 %v7022_v61  ;;  %v7149_v4 = vcombine.low %v599_v53, %v603_v56 }
  0xe8   : > { %v483_v0 = vld [vmem:[%s8525_s18 + $0x3e0] sm:$0xff]  ;;  %5038 = vmatpush1.bf16.msra.mxu0 %v7021_v3 }
  0xe9   : > { %v607_v1 = vld [vmem:[%s8525_s18 + $0x7c0] sm:$0xff]  ;;  %v7030_v5 = vcombine.high %v479_v63, %v483_v0  ;;  %5078 = vmatprep.subr.bf16.mxu1 %v7150_v62  ;;  %v7029_v11 = vcombine.low %v479_v63, %v483_v0 }
  0xea   : > { %v611_v2 = vld [vmem:[%s8525_s18 + $0x7e0] sm:$0xff]  ;;  %5079 = vmatpush1.bf16.msra.mxu1 %v7149_v4 }
  0xeb   : > { %v7158_v6 = vcombine.high %v607_v1, %v611_v2  ;;  %v615_v7 = vld [vmem:[%s8525_s18 + $0x800] sm:$0xff]  ;;  %5039 = vmatprep.subr.bf16.mxu0 %v7030_v5  ;;  %v7157_v12 = vcombine.low %v607_v1, %v611_v2 }
  0xec   : > { %v619_v8 = vld [vmem:[%s8525_s18 + $0x820] sm:$0xff]  ;;  %5040 = vmatpush1.bf16.msra.mxu0 %v7029_v11 }
  0xed   : > { %v743_v9 = vld [vmem:[%s8525_s18 + $0xc00] sm:$0xff]  ;;  %v7166_v13 = vcombine.high %v615_v7, %v619_v8  ;;  %5080 = vmatprep.subr.bf16.mxu1 %v7158_v6  ;;  %v7165_v22 = vcombine.low %v615_v7, %v619_v8 }
  0xee   : > { %v747_v10 = vld [vmem:[%s8525_s18 + $0xc20] sm:$0xff]  ;;  %5081 = vmatpush1.bf16.msra.mxu1 %v7157_v12 }
  0xef   : > { %v7294_v14 = vcombine.high %v743_v9, %v747_v10  ;;  %v623_v15 = vld [vmem:[%s8525_s18 + $0x840] sm:$0xff]  ;;  %5091 = vmatprep.subr.bf16.mxu0 %v7166_v13  ;;  %v7293_v24 = vcombine.low %v743_v9, %v747_v10  ;;  %5042 = vmatmul.mubr.bf16.vlgmr.msra.gmra.mrb[0].mxu0 %v8628_v17 }
  0xf0   : > { %v627_v16 = vld [vmem:[%s8525_s18 + $0x860] sm:$0xff]  ;;  %5092 = vmatpush1.bf16.msra.mxu0 %v7165_v22 }
  0xf1   : > { %v751_v18 = vld [vmem:[%s8525_s18 + $0xc40] sm:$0xff]  ;;  %v7174_v25 = vcombine.high %v623_v15, %v627_v16  ;;  %5132 = vmatprep.subr.bf16.mxu1 %v7294_v14  ;;  %5083 = vmatmul.mubr.bf16.vlgmr.msra.gmra.mrb[0].mxu1 %v8637_v21  ;;  %v7173_v31 = vcombine.low %v623_v15, %v627_v16 }
  0xf2   : > { %v755_v19 = vld [vmem:[%s8525_s18 + $0xc60] sm:$0xff]  ;;  %5133 = vmatpush1.bf16.msra.mxu1 %v7293_v24  ;;  %5164 = vmatprep.mubr.bf16.mxu1 %v8653_v30 }
  0xf3   : > { %v8633_v20 = vld [vmem:[%s8518_s13 + $0x10] sm:$0xff]  ;;  %v7302_v54 = vcombine.high %v751_v18, %v755_v19  ;;  %5093 = vmatprep.subr.bf16.mxu0 %v7174_v25  ;;  %v7301_v32 = vcombine.low %v751_v18, %v755_v19 }
  0xf4   : > { %v631_v26 = vld [vmem:[%s8525_s18 + $0x880] sm:$0xff]  ;;  %v8646_v28 = vcombine.high %v8633_v20, %v8633_v20  ;;  %5094 = vmatpush1.bf16.msra.mxu0 %v7173_v31 }
  0xf5   : > { %v635_v27 = vld [vmem:[%s8525_s18 + $0x8a0] sm:$0xff]  ;;  %5134 = vmatprep.subr.bf16.mxu1 %v7302_v54 }
  0xf6   : > { %v759_v55 = vld [vmem:[%s8525_s18 + $0xc80] sm:$0xff]  ;;  %v7182_v33 = vcombine.high %v631_v26, %v635_v27  ;;  %5123 = vmatprep.mubr.bf16.mxu0 %v8646_v28  ;;  %v7181_v39 = vcombine.low %v631_v26, %v635_v27  ;;  %5135 = vmatpush1.bf16.msra.mxu1 %v7301_v32 }
  0xf7   : > { %v763_v29 = vld [vmem:[%s8525_s18 + $0xca0] sm:$0xff] }
  0xf8   : > { %v7310_v34 = vcombine.high %v759_v55, %v763_v29  ;;  %v639_v35 = vld [vmem:[%s8525_s18 + $0x8c0] sm:$0xff]  ;;  %5095 = vmatprep.subr.bf16.mxu0 %v7182_v33  ;;  %v7309_v40 = vcombine.low %v759_v55, %v763_v29 }
  0xf9   : > { %v643_v36 = vld [vmem:[%s8525_s18 + $0x8e0] sm:$0xff]  ;;  %5096 = vmatpush1.bf16.msra.mxu0 %v7181_v39 }
  0xfa   : > { %v767_v37 = vld [vmem:[%s8525_s18 + $0xcc0] sm:$0xff]  ;;  %v7190_v41 = vcombine.high %v639_v35, %v643_v36  ;;  %5136 = vmatprep.subr.bf16.mxu1 %v7310_v34  ;;  %v7189_v47 = vcombine.low %v639_v35, %v643_v36 }
  0xfb   : > { %v771_v38 = vld [vmem:[%s8525_s18 + $0xce0] sm:$0xff]  ;;  %5137 = vmatpush1.bf16.msra.mxu1 %v7309_v40 }
  0xfc   : > { %v7318_v42 = vcombine.high %v767_v37, %v771_v38  ;;  %v647_v43 = vld [vmem:[%s8525_s18 + $0x900] sm:$0xff]  ;;  %5097 = vmatprep.subr.bf16.mxu0 %v7190_v41  ;;  %v7317_v48 = vcombine.low %v767_v37, %v771_v38 }
  0xfd   : > { %v651_v44 = vld [vmem:[%s8525_s18 + $0x920] sm:$0xff]  ;;  %5098 = vmatpush1.bf16.msra.mxu0 %v7189_v47 }
  0xfe   : > { %v775_v45 = vld [vmem:[%s8525_s18 + $0xd00] sm:$0xff]  ;;  %v7198_v49 = vcombine.high %v647_v43, %v651_v44  ;;  %5138 = vmatprep.subr.bf16.mxu1 %v7318_v42  ;;  %v7197_v57 = vcombine.low %v647_v43, %v651_v44 }
  0xff   : > { %v779_v46 = vld [vmem:[%s8525_s18 + $0xd20] sm:$0xff]  ;;  %5139 = vmatpush1.bf16.msra.mxu1 %v7317_v48 }
 0x100   : > { %v7326_v50 = vcombine.high %v775_v45, %v779_v46  ;;  %v655_v51 = vld [vmem:[%s8525_s18 + $0x940] sm:$0xff]  ;;  %5099 = vmatprep.subr.bf16.mxu0 %v7198_v49  ;;  %v7325_v58 = vcombine.low %v775_v45, %v779_v46 }
 0x101   : > { %v659_v52 = vld [vmem:[%s8525_s18 + $0x960] sm:$0xff]  ;;  %5100 = vmatpush1.bf16.msra.mxu0 %v7197_v57 }
 0x102   : > { %v783_v53 = vld [vmem:[%s8525_s18 + $0xd40] sm:$0xff]  ;;  %v7206_v61 = vcombine.high %v655_v51, %v659_v52  ;;  %5140 = vmatprep.subr.bf16.mxu1 %v7326_v50  ;;  %v7205_v3 = vcombine.low %v655_v51, %v659_v52 }
 0x103   : > { %v787_v56 = vld [vmem:[%s8525_s18 + $0xd60] sm:$0xff]  ;;  %5141 = vmatpush1.bf16.msra.mxu1 %v7325_v58 }
 0x104   : > { %v7334_v62 = vcombine.high %v783_v53, %v787_v56  ;;  %v663_v63 = vld [vmem:[%s8525_s18 + $0x980] sm:$0xff]  ;;  %5101 = vmatprep.subr.bf16.mxu0 %v7206_v61  ;;  %v7333_v4 = vcombine.low %v783_v53, %v787_v56 }
 0x105   : > { %v667_v0 = vld [vmem:[%s8525_s18 + $0x9a0] sm:$0xff]  ;;  %5102 = vmatpush1.bf16.msra.mxu0 %v7205_v3 }
 0x106   : > { %v791_v1 = vld [vmem:[%s8525_s18 + $0xd80] sm:$0xff]  ;;  %v7214_v5 = vcombine.high %v663_v63, %v667_v0  ;;  %5142 = vmatprep.subr.bf16.mxu1 %v7334_v62  ;;  %v7213_v11 = vcombine.low %v663_v63, %v667_v0 }
 0x107   : > { %v795_v2 = vld [vmem:[%s8525_s18 + $0xda0] sm:$0xff]  ;;  %5143 = vmatpush1.bf16.msra.mxu1 %v7333_v4 }
 0x108   : > { %v7342_v6 = vcombine.high %v791_v1, %v795_v2  ;;  %v671_v7 = vld [vmem:[%s8525_s18 + $0x9c0] sm:$0xff]  ;;  %5103 = vmatprep.subr.bf16.mxu0 %v7214_v5  ;;  %v7341_v12 = vcombine.low %v791_v1, %v795_v2 }
 0x109   : > { %v675_v8 = vld [vmem:[%s8525_s18 + $0x9e0] sm:$0xff]  ;;  %5104 = vmatpush1.bf16.msra.mxu0 %v7213_v11 }
 0x10a   : > { %v799_v9 = vld [vmem:[%s8525_s18 + $0xdc0] sm:$0xff]  ;;  %v7222_v13 = vcombine.high %v671_v7, %v675_v8  ;;  %5144 = vmatprep.subr.bf16.mxu1 %v7342_v6  ;;  %v7221_v22 = vcombine.low %v671_v7, %v675_v8 }
 0x10b   : > { %v803_v10 = vld [vmem:[%s8525_s18 + $0xde0] sm:$0xff]  ;;  %5145 = vmatpush1.bf16.msra.mxu1 %v7341_v12 }
 0x10c   : > { %v7350_v14 = vcombine.high %v799_v9, %v803_v10  ;;  %v679_v15 = vld [vmem:[%s8525_s18 + $0xa00] sm:$0xff]  ;;  %5105 = vmatprep.subr.bf16.mxu0 %v7222_v13  ;;  %v7349_v24 = vcombine.low %v799_v9, %v803_v10 }
 0x10d   : > { %v683_v16 = vld [vmem:[%s8525_s18 + $0xa20] sm:$0xff]  ;;  %5106 = vmatpush1.bf16.msra.mxu0 %v7221_v22 }
 0x10e   : > { %v807_v18 = vld [vmem:[%s8525_s18 + $0xe00] sm:$0xff]  ;;  %v7230_v25 = vcombine.high %v679_v15, %v683_v16  ;;  %5146 = vmatprep.subr.bf16.mxu1 %v7350_v14  ;;  %v7229_v31 = vcombine.low %v679_v15, %v683_v16 }
 0x10f   : > { %v811_v19 = vld [vmem:[%s8525_s18 + $0xe20] sm:$0xff]  ;;  %5147 = vmatpush1.bf16.msra.mxu1 %v7349_v24 }
 0x110   : > { %v7358_v54 = vcombine.high %v807_v18, %v811_v19  ;;  %v687_v26 = vld [vmem:[%s8525_s18 + $0xa40] sm:$0xff]  ;;  %5107 = vmatprep.subr.bf16.mxu0 %v7230_v25  ;;  %v7357_v32 = vcombine.low %v807_v18, %v811_v19 }
 0x111   : > { %v691_v27 = vld [vmem:[%s8525_s18 + $0xa60] sm:$0xff]  ;;  %5108 = vmatpush1.bf16.msra.mxu0 %v7229_v31 }
 0x112   : > { %v815_v55 = vld [vmem:[%s8525_s18 + $0xe40] sm:$0xff]  ;;  %v7238_v33 = vcombine.high %v687_v26, %v691_v27  ;;  %5148 = vmatprep.subr.bf16.mxu1 %v7358_v54  ;;  %v7237_v39 = vcombine.low %v687_v26, %v691_v27 }
 0x113   : > { %v819_v29 = vld [vmem:[%s8525_s18 + $0xe60] sm:$0xff]  ;;  %5149 = vmatpush1.bf16.msra.mxu1 %v7357_v32 }
 0x114   : > { %v7366_v34 = vcombine.high %v815_v55, %v819_v29  ;;  %v695_v35 = vld [vmem:[%s8525_s18 + $0xa80] sm:$0xff]  ;;  %5109 = vmatprep.subr.bf16.mxu0 %v7238_v33  ;;  %v7365_v40 = vcombine.low %v815_v55, %v819_v29 }
 0x115   : > { %v699_v36 = vld [vmem:[%s8525_s18 + $0xaa0] sm:$0xff]  ;;  %5110 = vmatpush1.bf16.msra.mxu0 %v7237_v39 }
 0x116   : > { %v823_v37 = vld [vmem:[%s8525_s18 + $0xe80] sm:$0xff]  ;;  %v7246_v41 = vcombine.high %v695_v35, %v699_v36  ;;  %5150 = vmatprep.subr.bf16.mxu1 %v7366_v34  ;;  %v7245_v47 = vcombine.low %v695_v35, %v699_v36 }
 0x117   : > { %v827_v38 = vld [vmem:[%s8525_s18 + $0xea0] sm:$0xff]  ;;  %5151 = vmatpush1.bf16.msra.mxu1 %v7365_v40 }
 0x118   : > { %v7374_v42 = vcombine.high %v823_v37, %v827_v38  ;;  %v703_v43 = vld [vmem:[%s8525_s18 + $0xac0] sm:$0xff]  ;;  %5111 = vmatprep.subr.bf16.mxu0 %v7246_v41  ;;  %v7373_v48 = vcombine.low %v823_v37, %v827_v38  ;;  %v8718_v37 = vcombine.low %v8633_v20, %v8633_v20  ;;  %v8727_v41 = vcombine.low %v8640_v23, %v8640_v23 }
 0x119   : > { %v707_v44 = vld [vmem:[%s8525_s18 + $0xae0] sm:$0xff]  ;;  %5112 = vmatpush1.bf16.msra.mxu0 %v7245_v47 }
 0x11a   : > { %v831_v45 = vld [vmem:[%s8525_s18 + $0xec0] sm:$0xff]  ;;  %v7254_v49 = vcombine.high %v703_v43, %v707_v44  ;;  %5152 = vmatprep.subr.bf16.mxu1 %v7374_v42  ;;  %v7253_v57 = vcombine.low %v703_v43, %v707_v44  ;;  %v8730_v43 = vld [vmem:[%s8518_s13 + $0x28] sm:$0xff] }
 0x11b   : > { %v835_v46 = vld [vmem:[%s8525_s18 + $0xee0] sm:$0xff]  ;;  %5153 = vmatpush1.bf16.msra.mxu1 %v7373_v48 }
 0x11c   : > { %v7382_v50 = vcombine.high %v831_v45, %v835_v46  ;;  %v711_v51 = vld [vmem:[%s8525_s18 + $0xb00] sm:$0xff]  ;;  %5113 = vmatprep.subr.bf16.mxu0 %v7254_v49  ;;  %v7381_v58 = vcombine.low %v831_v45, %v835_v46 }
 0x11d   : > { %v715_v52 = vld [vmem:[%s8525_s18 + $0xb20] sm:$0xff]  ;;  %5114 = vmatpush1.bf16.msra.mxu0 %v7253_v57 }
 0x11e   : > { %v839_v53 = vld [vmem:[%s8525_s18 + $0xf00] sm:$0xff]  ;;  %v7262_v61 = vcombine.high %v711_v51, %v715_v52  ;;  %5154 = vmatprep.subr.bf16.mxu1 %v7382_v50  ;;  %v7261_v3 = vcombine.low %v711_v51, %v715_v52  ;;  %v8743_v50 = vcombine.high %v8730_v43, %v8730_v43 }
 0x11f   : > { %v843_v56 = vld [vmem:[%s8525_s18 + $0xf20] sm:$0xff]  ;;  %5155 = vmatpush1.bf16.msra.mxu1 %v7381_v58 }
 0x120   : > { %v7390_v62 = vcombine.high %v839_v53, %v843_v56  ;;  %v719_v63 = vld [vmem:[%s8525_s18 + $0xb40] sm:$0xff]  ;;  %5115 = vmatprep.subr.bf16.mxu0 %v7262_v61  ;;  %v7389_v4 = vcombine.low %v839_v53, %v843_v56 }
 0x121   : > { %v723_v0 = vld [vmem:[%s8525_s18 + $0xb60] sm:$0xff]  ;;  %5116 = vmatpush1.bf16.msra.mxu0 %v7261_v3 }
 0x122   : > { %v847_v1 = vld [vmem:[%s8525_s18 + $0xf40] sm:$0xff]  ;;  %v7270_v5 = vcombine.high %v719_v63, %v723_v0  ;;  %5156 = vmatprep.subr.bf16.mxu1 %v7390_v62  ;;  %v7269_v11 = vcombine.low %v719_v63, %v723_v0 }
 0x123   : > { %v851_v2 = vld [vmem:[%s8525_s18 + $0xf60] sm:$0xff]  ;;  %5157 = vmatpush1.bf16.msra.mxu1 %v7389_v4 }
 0x124   : > { %v7398_v6 = vcombine.high %v847_v1, %v851_v2  ;;  %v727_v7 = vld [vmem:[%s8525_s18 + $0xb80] sm:$0xff]  ;;  %5117 = vmatprep.subr.bf16.mxu0 %v7270_v5  ;;  %v7397_v12 = vcombine.low %v847_v1, %v851_v2 }
 0x125   : > { %v731_v8 = vld [vmem:[%s8525_s18 + $0xba0] sm:$0xff]  ;;  %5118 = vmatpush1.bf16.msra.mxu0 %v7269_v11 }
 0x126   : > { %v855_v9 = vld [vmem:[%s8525_s18 + $0xf80] sm:$0xff]  ;;  %v7278_v13 = vcombine.high %v727_v7, %v731_v8  ;;  %5158 = vmatprep.subr.bf16.mxu1 %v7398_v6  ;;  %v7277_v22 = vcombine.low %v727_v7, %v731_v8 }
 0x127   : > { %v859_v10 = vld [vmem:[%s8525_s18 + $0xfa0] sm:$0xff]  ;;  %5159 = vmatpush1.bf16.msra.mxu1 %v7397_v12 }
 0x128   : > { %v7406_v14 = vcombine.high %v855_v9, %v859_v10  ;;  %v735_v15 = vld [vmem:[%s8525_s18 + $0xbc0] sm:$0xff]  ;;  %5119 = vmatprep.subr.bf16.mxu0 %v7278_v13  ;;  %v7405_v24 = vcombine.low %v855_v9, %v859_v10 }
 0x129   : > { %v739_v16 = vld [vmem:[%s8525_s18 + $0xbe0] sm:$0xff]  ;;  %5120 = vmatpush1.bf16.msra.mxu0 %v7277_v22 }
 0x12a   : > { %v863_v18 = vld [vmem:[%s8525_s18 + $0xfc0] sm:$0xff]  ;;  %v7286_v25 = vcombine.high %v735_v15, %v739_v16  ;;  %5160 = vmatprep.subr.bf16.mxu1 %v7406_v14  ;;  %v7285_v31 = vcombine.low %v735_v15, %v739_v16 }
 0x12b   : > { %v867_v19 = vld [vmem:[%s8525_s18 + $0xfe0] sm:$0xff]  ;;  %5161 = vmatpush1.bf16.msra.mxu1 %v7405_v24 }
 0x12c   : > { %v7414_v54 = vcombine.high %v863_v18, %v867_v19  ;;  %v871_v26 = vld [vmem:[%s8525_s18 + $0x1000] sm:$0xff]  ;;  %5121 = vmatprep.subr.bf16.mxu0 %v7286_v25  ;;  %v7413_v32 = vcombine.low %v863_v18, %v867_v19 }
 0x12d   : > { %v875_v27 = vld [vmem:[%s8525_s18 + $0x1020] sm:$0xff]  ;;  %5122 = vmatpush1.bf16.msra.mxu0 %v7285_v31 }
 0x12e   : > { %v999_v55 = vld [vmem:[%s8525_s18 + $0x1400] sm:$0xff]  ;;  %v7422_v33 = vcombine.high %v871_v26, %v875_v27  ;;  %5162 = vmatprep.subr.bf16.mxu1 %v7414_v54  ;;  %v7421_v42 = vcombine.low %v871_v26, %v875_v27 }
 0x12f   : > { %v1003_v29 = vld [vmem:[%s8525_s18 + $0x1420] sm:$0xff]  ;;  %5163 = vmatpush1.bf16.msra.mxu1 %v7413_v32 }
 0x130   : > { %v7550_v34 = vcombine.high %v999_v55, %v1003_v29  ;;  %v879_v35 = vld [vmem:[%s8525_s18 + $0x1040] sm:$0xff]  ;;  %5173 = vmatprep.subr.bf16.mxu0 %v7422_v33  ;;  %v7549_v44 = vcombine.low %v999_v55, %v1003_v29  ;;  %5124 = vmatmul.mubr.bf16.vlgmr.msra.gmra.mrb[4].mxu0 %v8718_v37 }
 0x131   : > { %v883_v36 = vld [vmem:[%s8525_s18 + $0x1060] sm:$0xff]  ;;  %5174 = vmatpush1.bf16.msra.mxu0 %v7421_v42 }
 0x132   : > { %v1007_v38 = vld [vmem:[%s8525_s18 + $0x1440] sm:$0xff]  ;;  %v7430_v45 = vcombine.high %v879_v35, %v883_v36  ;;  %5214 = vmatprep.subr.bf16.mxu1 %v7550_v34  ;;  %5165 = vmatmul.mubr.bf16.vlgmr.msra.gmra.mrb[4].mxu1 %v8727_v41  ;;  %v7429_v51 = vcombine.low %v879_v35, %v883_v36 }
 0x133   : > { %v1011_v39 = vld [vmem:[%s8525_s18 + $0x1460] sm:$0xff]  ;;  %5215 = vmatpush1.bf16.msra.mxu1 %v7549_v44  ;;  %5246 = vmatprep.mubr.bf16.mxu1 %v8743_v50 }
 0x134   : > { %v8723_v40 = vld [vmem:[%s8518_s13 + $0x20] sm:$0xff]  ;;  %v7558_v20 = vcombine.high %v1007_v38, %v1011_v39  ;;  %5175 = vmatprep.subr.bf16.mxu0 %v7430_v45  ;;  %v7557_v52 = vcombine.low %v1007_v38, %v1011_v39 }
 0x135   : > { %v887_v46 = vld [vmem:[%s8525_s18 + $0x1080] sm:$0xff]  ;;  %v8736_v48 = vcombine.high %v8723_v40, %v8723_v40  ;;  %5176 = vmatpush1.bf16.msra.mxu0 %v7429_v51 }
 0x136   : > { %v891_v47 = vld [vmem:[%s8525_s18 + $0x10a0] sm:$0xff]  ;;  %5216 = vmatprep.subr.bf16.mxu1 %v7558_v20 }
 0x137   : > { %v1015_v23 = vld [vmem:[%s8525_s18 + $0x1480] sm:$0xff]  ;;  %v7438_v53 = vcombine.high %v887_v46, %v891_v47  ;;  %5205 = vmatprep.mubr.bf16.mxu0 %v8736_v48  ;;  %v7437_v63 = vcombine.low %v887_v46, %v891_v47  ;;  %5217 = vmatpush1.bf16.msra.mxu1 %v7557_v52 }
 0x138   : > { %v1019_v49 = vld [vmem:[%s8525_s18 + $0x14a0] sm:$0xff] }
 0x139   : > { %v7566_v56 = vcombine.high %v1015_v23, %v1019_v49  ;;  %v895_v57 = vld [vmem:[%s8525_s18 + $0x10c0] sm:$0xff]  ;;  %5177 = vmatprep.subr.bf16.mxu0 %v7438_v53  ;;  %v7565_v0 = vcombine.low %v1015_v23, %v1019_v49 }
 0x13a   : > { %v899_v58 = vld [vmem:[%s8525_s18 + $0x10e0] sm:$0xff]  ;;  %5178 = vmatpush1.bf16.msra.mxu0 %v7437_v63 }
 0x13b   : > { %v1023_v61 = vld [vmem:[%s8525_s18 + $0x14c0] sm:$0xff]  ;;  %v7446_v1 = vcombine.high %v895_v57, %v899_v58  ;;  %5218 = vmatprep.subr.bf16.mxu1 %v7566_v56  ;;  %v7445_v7 = vcombine.low %v895_v57, %v899_v58 }
 0x13c   : > { %v1027_v62 = vld [vmem:[%s8525_s18 + $0x14e0] sm:$0xff]  ;;  %5219 = vmatpush1.bf16.msra.mxu1 %v7565_v0 }
 0x13d   : > { %v7574_v2 = vcombine.high %v1023_v61, %v1027_v62  ;;  %v903_v3 = vld [vmem:[%s8525_s18 + $0x1100] sm:$0xff]  ;;  %5179 = vmatprep.subr.bf16.mxu0 %v7446_v1  ;;  %v7573_v8 = vcombine.low %v1023_v61, %v1027_v62 }
 0x13e   : > { %v907_v4 = vld [vmem:[%s8525_s18 + $0x1120] sm:$0xff]  ;;  %5180 = vmatpush1.bf16.msra.mxu0 %v7445_v7 }
 0x13f   : > { %v1031_v5 = vld [vmem:[%s8525_s18 + $0x1500] sm:$0xff]  ;;  %v7454_v9 = vcombine.high %v903_v3, %v907_v4  ;;  %5220 = vmatprep.subr.bf16.mxu1 %v7574_v2  ;;  %v7453_v15 = vcombine.low %v903_v3, %v907_v4 }
 0x140   : > { %v1035_v6 = vld [vmem:[%s8525_s18 + $0x1520] sm:$0xff]  ;;  %5221 = vmatpush1.bf16.msra.mxu1 %v7573_v8 }
 0x141   : > { %v7582_v10 = vcombine.high %v1031_v5, %v1035_v6  ;;  %v911_v11 = vld [vmem:[%s8525_s18 + $0x1140] sm:$0xff]  ;;  %5181 = vmatprep.subr.bf16.mxu0 %v7454_v9  ;;  %v7581_v16 = vcombine.low %v1031_v5, %v1035_v6 }
 0x142   : > { %v915_v12 = vld [vmem:[%s8525_s18 + $0x1160] sm:$0xff]  ;;  %5182 = vmatpush1.bf16.msra.mxu0 %v7453_v15 }
 0x143   : > { %v1039_v13 = vld [vmem:[%s8525_s18 + $0x1540] sm:$0xff]  ;;  %v7462_v18 = vcombine.high %v911_v11, %v915_v12  ;;  %5222 = vmatprep.subr.bf16.mxu1 %v7582_v10  ;;  %v7461_v26 = vcombine.low %v911_v11, %v915_v12 }
 0x144   : > { %v1043_v14 = vld [vmem:[%s8525_s18 + $0x1560] sm:$0xff]  ;;  %5223 = vmatpush1.bf16.msra.mxu1 %v7581_v16 }
 0x145   : > { %v7590_v19 = vcombine.high %v1039_v13, %v1043_v14  ;;  %v919_v22 = vld [vmem:[%s8525_s18 + $0x1180] sm:$0xff]  ;;  %5183 = vmatprep.subr.bf16.mxu0 %v7462_v18  ;;  %v7589_v27 = vcombine.low %v1039_v13, %v1043_v14 }
 0x146   : > { %v923_v24 = vld [vmem:[%s8525_s18 + $0x11a0] sm:$0xff]  ;;  %5184 = vmatpush1.bf16.msra.mxu0 %v7461_v26 }
 0x147   : > { %v1047_v25 = vld [vmem:[%s8525_s18 + $0x1580] sm:$0xff]  ;;  %v7470_v55 = vcombine.high %v919_v22, %v923_v24  ;;  %5224 = vmatprep.subr.bf16.mxu1 %v7590_v19  ;;  %v7469_v35 = vcombine.low %v919_v22, %v923_v24 }
 0x148   : > { %v1051_v54 = vld [vmem:[%s8525_s18 + $0x15a0] sm:$0xff]  ;;  %5225 = vmatpush1.bf16.msra.mxu1 %v7589_v27 }
 0x149   : > { %v7598_v29 = vcombine.high %v1047_v25, %v1051_v54  ;;  %v927_v31 = vld [vmem:[%s8525_s18 + $0x11c0] sm:$0xff]  ;;  %5185 = vmatprep.subr.bf16.mxu0 %v7470_v55  ;;  %v7597_v36 = vcombine.low %v1047_v25, %v1051_v54 }
 0x14a   : > { %v931_v32 = vld [vmem:[%s8525_s18 + $0x11e0] sm:$0xff]  ;;  %5186 = vmatpush1.bf16.msra.mxu0 %v7469_v35 }
 0x14b   : > { %v1055_v33 = vld [vmem:[%s8525_s18 + $0x15c0] sm:$0xff]  ;;  %v7478_v38 = vcombine.high %v927_v31, %v931_v32  ;;  %5226 = vmatprep.subr.bf16.mxu1 %v7598_v29  ;;  %v7477_v46 = vcombine.low %v927_v31, %v931_v32 }
 0x14c   : > { %v1059_v34 = vld [vmem:[%s8525_s18 + $0x15e0] sm:$0xff]  ;;  %5227 = vmatpush1.bf16.msra.mxu1 %v7597_v36 }
 0x14d   : > { %v7606_v39 = vcombine.high %v1055_v33, %v1059_v34  ;;  %v935_v42 = vld [vmem:[%s8525_s18 + $0x1200] sm:$0xff]  ;;  %5187 = vmatprep.subr.bf16.mxu0 %v7478_v38  ;;  %v7605_v47 = vcombine.low %v1055_v33, %v1059_v34 }
 0x14e   : > { %v939_v44 = vld [vmem:[%s8525_s18 + $0x1220] sm:$0xff]  ;;  %5188 = vmatpush1.bf16.msra.mxu0 %v7477_v46 }
 0x14f   : > { %v1063_v45 = vld [vmem:[%s8525_s18 + $0x1600] sm:$0xff]  ;;  %v7486_v23 = vcombine.high %v935_v42, %v939_v44  ;;  %5228 = vmatprep.subr.bf16.mxu1 %v7606_v39  ;;  %v7485_v57 = vcombine.low %v935_v42, %v939_v44 }
 0x150   : > { %v1067_v20 = vld [vmem:[%s8525_s18 + $0x1620] sm:$0xff]  ;;  %5229 = vmatpush1.bf16.msra.mxu1 %v7605_v47 }
 0x151   : > { %v7614_v49 = vcombine.high %v1063_v45, %v1067_v20  ;;  %v943_v51 = vld [vmem:[%s8525_s18 + $0x1240] sm:$0xff]  ;;  %5189 = vmatprep.subr.bf16.mxu0 %v7486_v23  ;;  %v7613_v58 = vcombine.low %v1063_v45, %v1067_v20 }
 0x152   : > { %v947_v52 = vld [vmem:[%s8525_s18 + $0x1260] sm:$0xff]  ;;  %5190 = vmatpush1.bf16.msra.mxu0 %v7485_v57  ;;  %v360_v57 = vld [vmem:[%s8525_s18 + $0x8] sm:$0xff] }
 0x153   : > { %v1071_v53 = vld [vmem:[%s8525_s18 + $0x1640] sm:$0xff]  ;;  %v7494_v61 = vcombine.high %v943_v51, %v947_v52  ;;  %5230 = vmatprep.subr.bf16.mxu1 %v7614_v49  ;;  %v7493_v3 = vcombine.low %v943_v51, %v947_v52 }
 0x154   : > { %v1075_v56 = vld [vmem:[%s8525_s18 + $0x1660] sm:$0xff]  ;;  %5231 = vmatpush1.bf16.msra.mxu1 %v7613_v58  ;;  %v364_v58 = vld [vmem:[%s8525_s18 + $0x28] sm:$0xff] }
 0x155   : > { %v7622_v62 = vcombine.high %v1071_v53, %v1075_v56  ;;  %v951_v63 = vld [vmem:[%s8525_s18 + $0x1280] sm:$0xff]  ;;  %5191 = vmatprep.subr.bf16.mxu0 %v7494_v61  ;;  %v7621_v4 = vcombine.low %v1071_v53, %v1075_v56  ;;  %v488_v61 = vld [vmem:[%s8525_s18 + $0x408] sm:$0xff] }
 0x156   : > { %v955_v0 = vld [vmem:[%s8525_s18 + $0x12a0] sm:$0xff]  ;;  %5192 = vmatpush1.bf16.msra.mxu0 %v7493_v3  ;;  %v368_v3 = vld [vmem:[%s8525_s18 + $0x48] sm:$0xff] }
 0x157   : > { %v1079_v1 = vld [vmem:[%s8525_s18 + $0x1680] sm:$0xff]  ;;  %v7502_v5 = vcombine.high %v951_v63, %v955_v0  ;;  %5232 = vmatprep.subr.bf16.mxu1 %v7622_v62  ;;  %v7501_v11 = vcombine.low %v951_v63, %v955_v0  ;;  %v492_v62 = vld [vmem:[%s8525_s18 + $0x428] sm:$0xff] }
 0x158   : > { %v1083_v2 = vld [vmem:[%s8525_s18 + $0x16a0] sm:$0xff]  ;;  %5233 = vmatpush1.bf16.msra.mxu1 %v7621_v4  ;;  %v372_v4 = vld [vmem:[%s8525_s18 + $0x68] sm:$0xff] }
 0x159   : > { %v7630_v6 = vcombine.high %v1079_v1, %v1083_v2  ;;  %v959_v7 = vld [vmem:[%s8525_s18 + $0x12c0] sm:$0xff]  ;;  %5193 = vmatprep.subr.bf16.mxu0 %v7502_v5  ;;  %v7629_v12 = vcombine.low %v1079_v1, %v1083_v2  ;;  %v6912_v1 = vcombine.high %v360_v57, %v364_v58  ;;  %v7040_v2 = vcombine.high %v488_v61, %v492_v62 }
 0x15a   : > { %v963_v8 = vld [vmem:[%s8525_s18 + $0x12e0] sm:$0xff]  ;;  %5194 = vmatpush1.bf16.msra.mxu0 %v7501_v11  ;;  %v8808_v5 = vcombine.low %v8723_v40, %v8723_v40  ;;  %v6920_v11 = vcombine.high %v368_v3, %v372_v4  ;;  %v380_v40 = vld [vmem:[%s8525_s18 + $0xa8] sm:$0xff] }
 0x15b   : > { %v1087_v9 = vld [vmem:[%s8525_s18 + $0x16c0] sm:$0xff]  ;;  %v7510_v13 = vcombine.high %v959_v7, %v963_v8  ;;  %5234 = vmatprep.subr.bf16.mxu1 %v7630_v6  ;;  %v7509_v22 = vcombine.low %v959_v7, %v963_v8  ;;  %v496_v6 = vld [vmem:[%s8525_s18 + $0x448] sm:$0xff]  ;;  %v8814_v8 = vcombine.low %v8730_v43, %v8730_v43  ;;  %v6919_v43 = vcombine.low %v368_v3, %v372_v4 }
 0x15c   : > { %v1091_v10 = vld [vmem:[%s8525_s18 + $0x16e0] sm:$0xff]  ;;  %5235 = vmatpush1.bf16.msra.mxu1 %v7629_v12  ;;  %v500_v7 = vld [vmem:[%s8525_s18 + $0x468] sm:$0xff] }
 0x15d   : > { %v7638_v14 = vcombine.high %v1087_v9, %v1091_v10  ;;  %v967_v15 = vld [vmem:[%s8525_s18 + $0x1300] sm:$0xff]  ;;  %5195 = vmatprep.subr.bf16.mxu0 %v7510_v13  ;;  %v7637_v24 = vcombine.low %v1087_v9, %v1091_v10  ;;  %v6911_v9 = vcombine.low %v360_v57, %v364_v58  ;;  %v7039_v10 = vcombine.low %v488_v61, %v492_v62  ;;  %v376_v13 = vld [vmem:[%s8525_s18 + $0x88] sm:$0xff] }
 0x15e   : > { %v971_v16 = vld [vmem:[%s8525_s18 + $0x1320] sm:$0xff]  ;;  %5196 = vmatpush1.bf16.msra.mxu0 %v7509_v22  ;;  %v7048_v12 = vcombine.high %v496_v6, %v500_v7  ;;  %v384_v22 = vld [vmem:[%s8525_s18 + $0xc8] sm:$0xff] }
 0x15f   : > { %v1095_v18 = vld [vmem:[%s8525_s18 + $0x1700] sm:$0xff]  ;;  %v7518_v25 = vcombine.high %v967_v15, %v971_v16  ;;  %5236 = vmatprep.subr.bf16.mxu1 %v7638_v14  ;;  %v7517_v31 = vcombine.low %v967_v15, %v971_v16  ;;  %v504_v14 = vld [vmem:[%s8525_s18 + $0x488] sm:$0xff]  ;;  %v7047_v16 = vcombine.low %v496_v6, %v500_v7 }
 0x160   : > { %v1099_v19 = vld [vmem:[%s8525_s18 + $0x1720] sm:$0xff]  ;;  %5237 = vmatpush1.bf16.msra.mxu1 %v7637_v24  ;;  %v508_v15 = vld [vmem:[%s8525_s18 + $0x4a8] sm:$0xff] }
 0x161   : > { %v7646_v54 = vcombine.high %v1095_v18, %v1099_v19  ;;  %v975_v26 = vld [vmem:[%s8525_s18 + $0x1340] sm:$0xff]  ;;  %5197 = vmatprep.subr.bf16.mxu0 %v7518_v25  ;;  %v7645_v32 = vcombine.low %v1095_v18, %v1099_v19  ;;  %v6928_v18 = vcombine.high %v376_v13, %v380_v40  ;;  %v7056_v19 = vcombine.high %v504_v14, %v508_v15  ;;  %v388_v24 = vld [vmem:[%s8525_s18 + $0xe8] sm:$0xff] }
 0x162   : > { %v979_v27 = vld [vmem:[%s8525_s18 + $0x1360] sm:$0xff]  ;;  %5198 = vmatpush1.bf16.msra.mxu0 %v7517_v31  ;;  %v512_v25 = vld [vmem:[%s8525_s18 + $0x4c8] sm:$0xff] }
 0x163   : > { %v1103_v55 = vld [vmem:[%s8525_s18 + $0x1740] sm:$0xff]  ;;  %v7526_v33 = vcombine.high %v975_v26, %v979_v27  ;;  %5238 = vmatprep.subr.bf16.mxu1 %v7646_v54  ;;  %v7525_v42 = vcombine.low %v975_v26, %v979_v27  ;;  %v516_v54 = vld [vmem:[%s8525_s18 + $0x4e8] sm:$0xff]  ;;  %v6927_v26 = vcombine.low %v376_v13, %v380_v40  ;;  %v7055_v27 = vcombine.low %v504_v14, %v508_v15 }
 0x164   : > { %v1107_v29 = vld [vmem:[%s8525_s18 + $0x1760] sm:$0xff]  ;;  %5239 = vmatpush1.bf16.msra.mxu1 %v7645_v32  ;;  %v392_v31 = vld [vmem:[%s8525_s18 + $0x108] sm:$0xff] }
 0x165   : > { %v7654_v34 = vcombine.high %v1103_v55, %v1107_v29  ;;  %v983_v35 = vld [vmem:[%s8525_s18 + $0x1380] sm:$0xff]  ;;  %5199 = vmatprep.subr.bf16.mxu0 %v7526_v33  ;;  %v7653_v44 = vcombine.low %v1103_v55, %v1107_v29  ;;  %v6936_v55 = vcombine.high %v384_v22, %v388_v24  ;;  %v7064_v29 = vcombine.high %v512_v25, %v516_v54  ;;  %v396_v32 = vld [vmem:[%s8525_s18 + $0x128] sm:$0xff] }
 0x166   : > { %v987_v36 = vld [vmem:[%s8525_s18 + $0x13a0] sm:$0xff]  ;;  %5200 = vmatpush1.bf16.msra.mxu0 %v7525_v42  ;;  %v520_v33 = vld [vmem:[%s8525_s18 + $0x508] sm:$0xff] }
 0x167   : > { %v1111_v38 = vld [vmem:[%s8525_s18 + $0x1780] sm:$0xff]  ;;  %v7534_v45 = vcombine.high %v983_v35, %v987_v36  ;;  %5240 = vmatprep.subr.bf16.mxu1 %v7654_v34  ;;  %v7533_v51 = vcombine.low %v983_v35, %v987_v36  ;;  %v524_v34 = vld [vmem:[%s8525_s18 + $0x528] sm:$0xff]  ;;  %v6935_v35 = vcombine.low %v384_v22, %v388_v24  ;;  %v7063_v36 = vcombine.low %v512_v25, %v516_v54 }
 0x168   : > { %v1115_v39 = vld [vmem:[%s8525_s18 + $0x17a0] sm:$0xff]  ;;  %5241 = vmatpush1.bf16.msra.mxu1 %v7653_v44  ;;  %v400_v42 = vld [vmem:[%s8525_s18 + $0x148] sm:$0xff] }
 0x169   : > { %v7662_v20 = vcombine.high %v1111_v38, %v1115_v39  ;;  %v991_v46 = vld [vmem:[%s8525_s18 + $0x13c0] sm:$0xff]  ;;  %5201 = vmatprep.subr.bf16.mxu0 %v7534_v45  ;;  %v7661_v52 = vcombine.low %v1111_v38, %v1115_v39  ;;  %v6944_v38 = vcombine.high %v392_v31, %v396_v32  ;;  %v7072_v39 = vcombine.high %v520_v33, %v524_v34  ;;  %v404_v44 = vld [vmem:[%s8525_s18 + $0x168] sm:$0xff] }
 0x16a   : > { %v995_v47 = vld [vmem:[%s8525_s18 + $0x13e0] sm:$0xff]  ;;  %5202 = vmatpush1.bf16.msra.mxu0 %v7533_v51  ;;  %v528_v45 = vld [vmem:[%s8525_s18 + $0x548] sm:$0xff]  ;;  %v6951_v57 = vcombine.low %v400_v42, %v404_v44 }
 0x16b   : > { %v1119_v23 = vld [vmem:[%s8525_s18 + $0x17c0] sm:$0xff]  ;;  %v7542_v53 = vcombine.high %v991_v46, %v995_v47  ;;  %5242 = vmatprep.subr.bf16.mxu1 %v7662_v20  ;;  %v7541_v63 = vcombine.low %v991_v46, %v995_v47  ;;  %v532_v20 = vld [vmem:[%s8525_s18 + $0x568] sm:$0xff]  ;;  %v6943_v46 = vcombine.low %v392_v31, %v396_v32  ;;  %v7071_v47 = vcombine.low %v520_v33, %v524_v34 }
 0x16c   : > { %v1123_v49 = vld [vmem:[%s8525_s18 + $0x17e0] sm:$0xff]  ;;  %5243 = vmatpush1.bf16.msra.mxu1 %v7661_v52  ;;  %v408_v51 = vld [vmem:[%s8525_s18 + $0x188] sm:$0xff]  ;;  %v7079_v58 = vcombine.low %v528_v45, %v532_v20 }
 0x16d   : > { %v7670_v56 = vcombine.high %v1119_v23, %v1123_v49  ;;  %5203 = vmatprep.subr.bf16.mxu0 %v7542_v53  ;;  %v7669_v0 = vcombine.low %v1119_v23, %v1123_v49  ;;  %v6952_v23 = vcombine.high %v400_v42, %v404_v44  ;;  %v7080_v49 = vcombine.high %v528_v45, %v532_v20  ;;  %v412_v52 = vld [vmem:[%s8525_s18 + $0x1a8] sm:$0xff] }
 0x16e   : > { %5204 = vmatpush1.bf16.msra.mxu0 %v7541_v63  ;;  %v536_v53 = vld [vmem:[%s8525_s18 + $0x588] sm:$0xff]  ;;  %v6960_v61 = vcombine.high %v408_v51, %v412_v52  ;;  %v6959_v3 = vcombine.low %v408_v51, %v412_v52 }
 0x16f   : > { %5244 = vmatprep.subr.bf16.mxu1 %v7670_v56  ;;  %5255 = vmatprep.subr.bf16.mxu0 %v6912_v1  ;;  %v540_v56 = vld [vmem:[%s8525_s18 + $0x5a8] sm:$0xff] }
 0x170   : > { %5245 = vmatpush1.bf16.msra.mxu1 %v7669_v0  ;;  %v7088_v62 = vcombine.high %v536_v53, %v540_v56  ;;  %v416_v63 = vld [vmem:[%s8525_s18 + $0x1c8] sm:$0xff]  ;;  %v7087_v4 = vcombine.low %v536_v53, %v540_v56 }
 0x171   : > { %5296 = vmatprep.subr.bf16.mxu1 %v7040_v2  ;;  %5206 = vmatmul.mubr.bf16.vlgmr.msra.gmra.mrb[8].mxu0 %v8808_v5  ;;  %v420_v0 = vld [vmem:[%s8525_s18 + $0x1e8] sm:$0xff] }
 0x172   : > { %5256 = vmatpush1.bf16.msra.mxu0 %v6911_v9  ;;  %5287 = vmatprep.mubr.bf16.mxu0 %v8578_v59  ;;  %v544_v1 = vld [vmem:[%s8525_s18 + $0x5c8] sm:$0xff]  ;;  %v6968_v6 = vcombine.high %v416_v63, %v420_v0  ;;  %v6967_v13 = vcombine.low %v416_v63, %v420_v0 }
 0x173   : > { %5247 = vmatmul.mubr.bf16.vlgmr.msra.gmra.mrb[8].mxu1 %v8814_v8  ;;  %5257 = vmatprep.subr.bf16.mxu0 %v6920_v11  ;;  %v548_v2 = vld [vmem:[%s8525_s18 + $0x5e8] sm:$0xff] }
 0x174   : > { %5297 = vmatpush1.bf16.msra.mxu1 %v7039_v10  ;;  %5328 = vmatprep.mubr.bf16.mxu1 %v8582_v60  ;;  %v7096_v7 = vcombine.high %v544_v1, %v548_v2  ;;  %v424_v9 = vld [vmem:[%s8525_s18 + $0x208] sm:$0xff]  ;;  %v7095_v40 = vcombine.low %v544_v1, %v548_v2 }
 0x175   : > { %5298 = vmatprep.subr.bf16.mxu1 %v7048_v12  ;;  %v428_v10 = vld [vmem:[%s8525_s18 + $0x228] sm:$0xff] }
 0x176   : > { %5258 = vmatpush1.bf16.msra.mxu0 %v6919_v43  ;;  %v552_v11 = vld [vmem:[%s8525_s18 + $0x608] sm:$0xff]  ;;  %v6976_v14 = vcombine.high %v424_v9, %v428_v10  ;;  %v6975_v22 = vcombine.low %v424_v9, %v428_v10 }
 0x177   : > { %5259 = vmatprep.subr.bf16.mxu0 %v6928_v18  ;;  %v556_v12 = vld [vmem:[%s8525_s18 + $0x628] sm:$0xff] }
 0x178   : > { %5299 = vmatpush1.bf16.msra.mxu1 %v7047_v16  ;;  %v7104_v15 = vcombine.high %v552_v11, %v556_v12  ;;  %v432_v43 = vld [vmem:[%s8525_s18 + $0x248] sm:$0xff]  ;;  %v7103_v24 = vcombine.low %v552_v11, %v556_v12 }
 0x179   : > { %5300 = vmatprep.subr.bf16.mxu1 %v7056_v19  ;;  %v436_v16 = vld [vmem:[%s8525_s18 + $0x268] sm:$0xff] }
 0x17a   : > { %5260 = vmatpush1.bf16.msra.mxu0 %v6927_v26  ;;  %v560_v18 = vld [vmem:[%s8525_s18 + $0x648] sm:$0xff]  ;;  %v6984_v25 = vcombine.high %v432_v43, %v436_v16  ;;  %v6983_v31 = vcombine.low %v432_v43, %v436_v16 }
 0x17b   : > { %5261 = vmatprep.subr.bf16.mxu0 %v6936_v55  ;;  %v564_v19 = vld [vmem:[%s8525_s18 + $0x668] sm:$0xff] }
 0x17c   : > { %5301 = vmatpush1.bf16.msra.mxu1 %v7055_v27  ;;  %v7112_v54 = vcombine.high %v560_v18, %v564_v19  ;;  %v440_v26 = vld [vmem:[%s8525_s18 + $0x288] sm:$0xff]  ;;  %v7111_v32 = vcombine.low %v560_v18, %v564_v19 }
 0x17d   : > { %5302 = vmatprep.subr.bf16.mxu1 %v7064_v29  ;;  %v444_v27 = vld [vmem:[%s8525_s18 + $0x2a8] sm:$0xff] }
 0x17e   : > { %5262 = vmatpush1.bf16.msra.mxu0 %v6935_v35  ;;  %v568_v55 = vld [vmem:[%s8525_s18 + $0x688] sm:$0xff]  ;;  %v6992_v33 = vcombine.high %v440_v26, %v444_v27  ;;  %v6991_v42 = vcombine.low %v440_v26, %v444_v27 }
 0x17f   : > { %5263 = vmatprep.subr.bf16.mxu0 %v6944_v38  ;;  %v572_v29 = vld [vmem:[%s8525_s18 + $0x6a8] sm:$0xff] }
 0x180   : > { %5303 = vmatpush1.bf16.msra.mxu1 %v7063_v36  ;;  %v7120_v34 = vcombine.high %v568_v55, %v572_v29  ;;  %v448_v35 = vld [vmem:[%s8525_s18 + $0x2c8] sm:$0xff]  ;;  %v7119_v44 = vcombine.low %v568_v55, %v572_v29 }
 0x181   : > { %5304 = vmatprep.subr.bf16.mxu1 %v7072_v39  ;;  %v452_v36 = vld [vmem:[%s8525_s18 + $0x2e8] sm:$0xff] }
 0x182   : > { %5264 = vmatpush1.bf16.msra.mxu0 %v6943_v46  ;;  %v576_v38 = vld [vmem:[%s8525_s18 + $0x6c8] sm:$0xff]  ;;  %v7000_v45 = vcombine.high %v448_v35, %v452_v36  ;;  %v6999_v51 = vcombine.low %v448_v35, %v452_v36 }
 0x183   : > { %5265 = vmatprep.subr.bf16.mxu0 %v6952_v23  ;;  %v580_v39 = vld [vmem:[%s8525_s18 + $0x6e8] sm:$0xff] }
 0x184   : > { %5305 = vmatpush1.bf16.msra.mxu1 %v7071_v47  ;;  %v7128_v20 = vcombine.high %v576_v38, %v580_v39  ;;  %v456_v46 = vld [vmem:[%s8525_s18 + $0x308] sm:$0xff]  ;;  %v7127_v52 = vcombine.low %v576_v38, %v580_v39 }
 0x185   : > { %5306 = vmatprep.subr.bf16.mxu1 %v7080_v49  ;;  %v460_v47 = vld [vmem:[%s8525_s18 + $0x328] sm:$0xff] }
 0x186   : > { %5266 = vmatpush1.bf16.msra.mxu0 %v6951_v57  ;;  %v584_v23 = vld [vmem:[%s8525_s18 + $0x708] sm:$0xff]  ;;  %v7008_v53 = vcombine.high %v456_v46, %v460_v47  ;;  %v7007_v63 = vcombine.low %v456_v46, %v460_v47 }
 0x187   : > { %5267 = vmatprep.subr.bf16.mxu0 %v6960_v61  ;;  %v588_v49 = vld [vmem:[%s8525_s18 + $0x728] sm:$0xff] }
 0x188   : > { %5307 = vmatpush1.bf16.msra.mxu1 %v7079_v58  ;;  %v7136_v56 = vcombine.high %v584_v23, %v588_v49  ;;  %v464_v57 = vld [vmem:[%s8525_s18 + $0x348] sm:$0xff]  ;;  %v7135_v0 = vcombine.low %v584_v23, %v588_v49 }
 0x189   : > { %5308 = vmatprep.subr.bf16.mxu1 %v7088_v62  ;;  %v468_v58 = vld [vmem:[%s8525_s18 + $0x368] sm:$0xff] }
 0x18a   : > { %5268 = vmatpush1.bf16.msra.mxu0 %v6959_v3  ;;  %v592_v61 = vld [vmem:[%s8525_s18 + $0x748] sm:$0xff]  ;;  %v7016_v1 = vcombine.high %v464_v57, %v468_v58  ;;  %v7015_v9 = vcombine.low %v464_v57, %v468_v58 }
 0x18b   : > { %5269 = vmatprep.subr.bf16.mxu0 %v6968_v6  ;;  %v596_v62 = vld [vmem:[%s8525_s18 + $0x768] sm:$0xff] }
 0x18c   : > { %5309 = vmatpush1.bf16.msra.mxu1 %v7087_v4  ;;  %v7144_v2 = vcombine.high %v592_v61, %v596_v62  ;;  %v472_v3 = vld [vmem:[%s8525_s18 + $0x388] sm:$0xff]  ;;  %v7143_v10 = vcombine.low %v592_v61, %v596_v62 }
 0x18d   : > { %5310 = vmatprep.subr.bf16.mxu1 %v7096_v7  ;;  %v476_v4 = vld [vmem:[%s8525_s18 + $0x3a8] sm:$0xff] }
 0x18e   : > { %5270 = vmatpush1.bf16.msra.mxu0 %v6967_v13  ;;  %v600_v6 = vld [vmem:[%s8525_s18 + $0x788] sm:$0xff]  ;;  %v7024_v11 = vcombine.high %v472_v3, %v476_v4  ;;  %v7023_v43 = vcombine.low %v472_v3, %v476_v4 }
 0x18f   : > { %5271 = vmatprep.subr.bf16.mxu0 %v6976_v14  ;;  %v604_v7 = vld [vmem:[%s8525_s18 + $0x7a8] sm:$0xff] }
 0x190   : > { %5311 = vmatpush1.bf16.msra.mxu1 %v7095_v40  ;;  %v7152_v12 = vcombine.high %v600_v6, %v604_v7  ;;  %v480_v13 = vld [vmem:[%s8525_s18 + $0x3c8] sm:$0xff]  ;;  %v7151_v16 = vcombine.low %v600_v6, %v604_v7 }
 0x191   : > { %5312 = vmatprep.subr.bf16.mxu1 %v7104_v15  ;;  %v484_v40 = vld [vmem:[%s8525_s18 + $0x3e8] sm:$0xff] }
 0x192   : > { %5272 = vmatpush1.bf16.msra.mxu0 %v6975_v22  ;;  %v608_v14 = vld [vmem:[%s8525_s18 + $0x7c8] sm:$0xff]  ;;  %v7032_v18 = vcombine.high %v480_v13, %v484_v40  ;;  %v7031_v26 = vcombine.low %v480_v13, %v484_v40 }
 0x193   : > { %5273 = vmatprep.subr.bf16.mxu0 %v6984_v25  ;;  %v612_v15 = vld [vmem:[%s8525_s18 + $0x7e8] sm:$0xff] }
 0x194   : > { %5313 = vmatpush1.bf16.msra.mxu1 %v7103_v24  ;;  %v7160_v19 = vcombine.high %v608_v14, %v612_v15  ;;  %v616_v22 = vld [vmem:[%s8525_s18 + $0x808] sm:$0xff]  ;;  %v7159_v27 = vcombine.low %v608_v14, %v612_v15 }
 0x195   : > { %5314 = vmatprep.subr.bf16.mxu1 %v7112_v54  ;;  %v620_v24 = vld [vmem:[%s8525_s18 + $0x828] sm:$0xff] }
 0x196   : > { %5274 = vmatpush1.bf16.msra.mxu0 %v6983_v31  ;;  %v744_v25 = vld [vmem:[%s8525_s18 + $0xc08] sm:$0xff]  ;;  %v7168_v55 = vcombine.high %v616_v22, %v620_v24  ;;  %v7167_v35 = vcombine.low %v616_v22, %v620_v24 }
 0x197   : > { %5275 = vmatprep.subr.bf16.mxu0 %v6992_v33  ;;  %v748_v54 = vld [vmem:[%s8525_s18 + $0xc28] sm:$0xff] }
 0x198   : > { %5315 = vmatpush1.bf16.msra.mxu1 %v7111_v32  ;;  %v7296_v29 = vcombine.high %v744_v25, %v748_v54  ;;  %v624_v31 = vld [vmem:[%s8525_s18 + $0x848] sm:$0xff]  ;;  %v7295_v36 = vcombine.low %v744_v25, %v748_v54 }
 0x199   : > { %5316 = vmatprep.subr.bf16.mxu1 %v7120_v34  ;;  %v628_v32 = vld [vmem:[%s8525_s18 + $0x868] sm:$0xff] }
 0x19a   : > { %5276 = vmatpush1.bf16.msra.mxu0 %v6991_v42  ;;  %v752_v33 = vld [vmem:[%s8525_s18 + $0xc48] sm:$0xff]  ;;  %v7176_v38 = vcombine.high %v624_v31, %v628_v32  ;;  %v7175_v46 = vcombine.low %v624_v31, %v628_v32 }
 0x19b   : > { %5277 = vmatprep.subr.bf16.mxu0 %v7000_v45  ;;  %v756_v34 = vld [vmem:[%s8525_s18 + $0xc68] sm:$0xff] }
 0x19c   : > { %5317 = vmatpush1.bf16.msra.mxu1 %v7119_v44  ;;  %v7304_v39 = vcombine.high %v752_v33, %v756_v34  ;;  %v632_v42 = vld [vmem:[%s8525_s18 + $0x888] sm:$0xff]  ;;  %v7303_v47 = vcombine.low %v752_v33, %v756_v34 }
 0x19d   : > { %5318 = vmatprep.subr.bf16.mxu1 %v7128_v20  ;;  %v636_v44 = vld [vmem:[%s8525_s18 + $0x8a8] sm:$0xff] }
 0x19e   : > { %5278 = vmatpush1.bf16.msra.mxu0 %v6999_v51  ;;  %v760_v45 = vld [vmem:[%s8525_s18 + $0xc88] sm:$0xff]  ;;  %v7184_v23 = vcombine.high %v632_v42, %v636_v44  ;;  %v7183_v57 = vcombine.low %v632_v42, %v636_v44 }
 0x19f   : > { %5279 = vmatprep.subr.bf16.mxu0 %v7008_v53  ;;  %v764_v20 = vld [vmem:[%s8525_s18 + $0xca8] sm:$0xff] }
 0x1a0   : > { %5319 = vmatpush1.bf16.msra.mxu1 %v7127_v52  ;;  %v7312_v49 = vcombine.high %v760_v45, %v764_v20  ;;  %v640_v51 = vld [vmem:[%s8525_s18 + $0x8c8] sm:$0xff]  ;;  %v7311_v58 = vcombine.low %v760_v45, %v764_v20 }
 0x1a1   : > { %5320 = vmatprep.subr.bf16.mxu1 %v7136_v56  ;;  %v644_v52 = vld [vmem:[%s8525_s18 + $0x8e8] sm:$0xff] }
 0x1a2   : > { %5280 = vmatpush1.bf16.msra.mxu0 %v7007_v63  ;;  %v768_v53 = vld [vmem:[%s8525_s18 + $0xcc8] sm:$0xff]  ;;  %v7192_v61 = vcombine.high %v640_v51, %v644_v52  ;;  %v7191_v3 = vcombine.low %v640_v51, %v644_v52 }
 0x1a3   : > { %5281 = vmatprep.subr.bf16.mxu0 %v7016_v1  ;;  %v772_v56 = vld [vmem:[%s8525_s18 + $0xce8] sm:$0xff] }
 0x1a4   : > { %5321 = vmatpush1.bf16.msra.mxu1 %v7135_v0  ;;  %v7320_v62 = vcombine.high %v768_v53, %v772_v56  ;;  %v648_v63 = vld [vmem:[%s8525_s18 + $0x908] sm:$0xff]  ;;  %v7319_v4 = vcombine.low %v768_v53, %v772_v56 }
 0x1a5   : > { %5322 = vmatprep.subr.bf16.mxu1 %v7144_v2  ;;  %v652_v0 = vld [vmem:[%s8525_s18 + $0x928] sm:$0xff] }
 0x1a6   : > { %5282 = vmatpush1.bf16.msra.mxu0 %v7015_v9  ;;  %v776_v1 = vld [vmem:[%s8525_s18 + $0xd08] sm:$0xff]  ;;  %v7200_v6 = vcombine.high %v648_v63, %v652_v0  ;;  %v7199_v13 = vcombine.low %v648_v63, %v652_v0 }
 0x1a7   : > { %5283 = vmatprep.subr.bf16.mxu0 %v7024_v11  ;;  %v780_v2 = vld [vmem:[%s8525_s18 + $0xd28] sm:$0xff] }
 0x1a8   : > { %5323 = vmatpush1.bf16.msra.mxu1 %v7143_v10  ;;  %v7328_v7 = vcombine.high %v776_v1, %v780_v2  ;;  %v656_v9 = vld [vmem:[%s8525_s18 + $0x948] sm:$0xff]  ;;  %v7327_v40 = vcombine.low %v776_v1, %v780_v2 }
 0x1a9   : > { %5324 = vmatprep.subr.bf16.mxu1 %v7152_v12  ;;  %v660_v10 = vld [vmem:[%s8525_s18 + $0x968] sm:$0xff] }
 0x1aa   : > { %5284 = vmatpush1.bf16.msra.mxu0 %v7023_v43  ;;  %v784_v11 = vld [vmem:[%s8525_s18 + $0xd48] sm:$0xff]  ;;  %v7208_v14 = vcombine.high %v656_v9, %v660_v10  ;;  %v7207_v22 = vcombine.low %v656_v9, %v660_v10 }
 0x1ab   : > { %5285 = vmatprep.subr.bf16.mxu0 %v7032_v18  ;;  %v788_v12 = vld [vmem:[%s8525_s18 + $0xd68] sm:$0xff] }
 0x1ac   : > { %5325 = vmatpush1.bf16.msra.mxu1 %v7151_v16  ;;  %v7336_v15 = vcombine.high %v784_v11, %v788_v12  ;;  %v664_v43 = vld [vmem:[%s8525_s18 + $0x988] sm:$0xff]  ;;  %v7335_v24 = vcombine.low %v784_v11, %v788_v12 }
 0x1ad   : > { %5326 = vmatprep.subr.bf16.mxu1 %v7160_v19  ;;  %v668_v16 = vld [vmem:[%s8525_s18 + $0x9a8] sm:$0xff] }
 0x1ae   : > { %5286 = vmatpush1.bf16.msra.mxu0 %v7031_v26  ;;  %v792_v18 = vld [vmem:[%s8525_s18 + $0xd88] sm:$0xff]  ;;  %v7216_v25 = vcombine.high %v664_v43, %v668_v16 }
 0x1af   : > { %5337 = vmatprep.subr.bf16.mxu0 %v7168_v55  ;;  %v796_v19 = vld [vmem:[%s8525_s18 + $0xda8] sm:$0xff] }
 0x1b0   : > { %5327 = vmatpush1.bf16.msra.mxu1 %v7159_v27  ;;  %v7344_v26 = vcombine.high %v792_v18, %v796_v19  ;;  %v672_v27 = vld [vmem:[%s8525_s18 + $0x9c8] sm:$0xff]  ;;  %v7343_v45 = vcombine.low %v792_v18, %v796_v19 }
 0x1b1   : > { %5378 = vmatprep.subr.bf16.mxu1 %v7296_v29  ;;  %5288 = vmatmul.mubr.bf16.vlgmr.msra.gmra.mrb[12].mxu0 %v8628_v17  ;;  %v676_v55 = vld [vmem:[%s8525_s18 + $0x9e8] sm:$0xff] }
 0x1b2   : > { %5338 = vmatpush1.bf16.msra.mxu0 %v7167_v35  ;;  %5369 = vmatprep.mubr.bf16.mxu0 %v8646_v28  ;;  %v800_v32 = vld [vmem:[%s8525_s18 + $0xdc8] sm:$0xff]  ;;  %v7224_v20 = vcombine.high %v672_v27, %v676_v55  ;;  %v7223_v53 = vcombine.low %v672_v27, %v676_v55 }
 0x1b3   : > { %5329 = vmatmul.mubr.bf16.vlgmr.msra.gmra.mrb[12].mxu1 %v8637_v21  ;;  %5339 = vmatprep.subr.bf16.mxu0 %v7176_v38  ;;  %v804_v33 = vld [vmem:[%s8525_s18 + $0xde8] sm:$0xff]  ;;  %v7215_v38 = vcombine.low %v664_v43, %v668_v16 }
 0x1b4   : > { %5379 = vmatpush1.bf16.msra.mxu1 %v7295_v36  ;;  %5410 = vmatprep.mubr.bf16.mxu1 %v8653_v30  ;;  %v808_v51 = vld [vmem:[%s8525_s18 + $0xe08] sm:$0xff]  ;;  %v7351_v56 = vcombine.low %v800_v32, %v804_v33 }
 0x1b5   : > { %5380 = vmatprep.subr.bf16.mxu1 %v7304_v39  ;;  %v812_v52 = vld [vmem:[%s8525_s18 + $0xe28] sm:$0xff] }
 0x1b6   : > { %5340 = vmatpush1.bf16.msra.mxu0 %v7175_v46  ;;  %v816_v63 = vld [vmem:[%s8525_s18 + $0xe48] sm:$0xff]  ;;  %v7359_v2 = vcombine.low %v808_v51, %v812_v52 }
 0x1b7   : > { %5341 = vmatprep.subr.bf16.mxu0 %v7184_v23  ;;  %v680_v23 = vld [vmem:[%s8525_s18 + $0xa08] sm:$0xff] }
 0x1b8   : > { %5381 = vmatpush1.bf16.msra.mxu1 %v7303_v47  ;;  %v7352_v47 = vcombine.high %v800_v32, %v804_v33  ;;  %v820_v0 = vld [vmem:[%s8525_s18 + $0xe68] sm:$0xff] }
 0x1b9   : > { %5382 = vmatprep.subr.bf16.mxu1 %v7312_v49  ;;  %v684_v49 = vld [vmem:[%s8525_s18 + $0xa28] sm:$0xff]  ;;  %v7367_v12 = vcombine.low %v816_v63, %v820_v0 }
 0x1ba   : > { %5342 = vmatpush1.bf16.msra.mxu0 %v7183_v57  ;;  %v7232_v57 = vcombine.high %v680_v23, %v684_v49  ;;  %v7231_v1 = vcombine.low %v680_v23, %v684_v49  ;;  %v824_v9 = vld [vmem:[%s8525_s18 + $0xe88] sm:$0xff] }
 0x1bb   : > { %5343 = vmatprep.subr.bf16.mxu0 %v7192_v61  ;;  %v688_v61 = vld [vmem:[%s8525_s18 + $0xa48] sm:$0xff] }
 0x1bc   : > { %5383 = vmatpush1.bf16.msra.mxu1 %v7311_v58  ;;  %v7360_v58 = vcombine.high %v808_v51, %v812_v52  ;;  %v828_v10 = vld [vmem:[%s8525_s18 + $0xea8] sm:$0xff] }
 0x1bd   : > { %5384 = vmatprep.subr.bf16.mxu1 %v7320_v62  ;;  %v692_v62 = vld [vmem:[%s8525_s18 + $0xa68] sm:$0xff]  ;;  %v7375_v19 = vcombine.low %v824_v9, %v828_v10 }
 0x1be   : > { %5344 = vmatpush1.bf16.msra.mxu0 %v7191_v3  ;;  %v7240_v3 = vcombine.high %v688_v61, %v692_v62  ;;  %v7239_v11 = vcombine.low %v688_v61, %v692_v62  ;;  %v832_v43 = vld [vmem:[%s8525_s18 + $0xec8] sm:$0xff] }
 0x1bf   : > { %5345 = vmatprep.subr.bf16.mxu0 %v7200_v6  ;;  %v696_v6 = vld [vmem:[%s8525_s18 + $0xa88] sm:$0xff] }
 0x1c0   : > { %5385 = vmatpush1.bf16.msra.mxu1 %v7319_v4  ;;  %v7368_v4 = vcombine.high %v816_v63, %v820_v0  ;;  %v836_v16 = vld [vmem:[%s8525_s18 + $0xee8] sm:$0xff] }
 0x1c1   : > { %5386 = vmatprep.subr.bf16.mxu1 %v7328_v7  ;;  %v700_v7 = vld [vmem:[%s8525_s18 + $0xaa8] sm:$0xff] }
 0x1c2   : > { %5346 = vmatpush1.bf16.msra.mxu0 %v7199_v13  ;;  %v5043_v54 = vpop.f32.mrb[0].mxu0  ;;  %v7248_v13 = vcombine.high %v696_v6, %v700_v7  ;;  %v7247_v18 = vcombine.low %v696_v6, %v700_v7  ;;  %v844_v27 = vld [vmem:[%s8525_s18 + $0xf28] sm:$0xff] }
 0x1c3   : > { %5347 = vmatprep.subr.bf16.mxu0 %v7208_v14  ;;  %v5045_v31 = vpop.f32.mrb[1].mxu0  ;;  %v704_v14 = vld [vmem:[%s8525_s18 + $0xac8] sm:$0xff] }
 0x1c4   : > { %5387 = vmatpush1.bf16.msra.mxu1 %v7327_v40  ;;  %v5084_v29 = vpop.f32.mrb[0].mxu1  ;;  %v5047_v36 = vpop.f32.mrb[2].mxu0  ;;  %v7376_v40 = vcombine.high %v824_v9, %v828_v10  ;;  %v720_v33 = vld [vmem:[%s8525_s18 + $0xb48] sm:$0xff] }
 0x1c5   : > { %5388 = vmatprep.subr.bf16.mxu1 %v7336_v15  ;;  %v8912_v34 = vadd.f32 %v5084_v29, %v5043_v54  ;;  %v5086_v35 = vpop.f32.mrb[1].mxu1  ;;  %v5048_v44 = vpop.f32.mrb[3].mxu0  ;;  %v708_v15 = vld [vmem:[%s8525_s18 + $0xae8] sm:$0xff]  ;;  %v7383_v29 = vcombine.low %v832_v43, %v836_v16 }
 0x1c6   : > { %5348 = vmatpush1.bf16.msra.mxu0 %v7207_v22  ;;  %v8914_v39 = vadd.f32 %v5086_v35, %v5045_v31  ;;  %v5088_v42 = vpop.f32.mrb[2].mxu1  ;;  %v7256_v22 = vcombine.high %v704_v14, %v708_v15  ;;  %v716_v54 = vld [vmem:[%s8525_s18 + $0xb28] sm:$0xff]  ;;  %v7255_v55 = vcombine.low %v704_v14, %v708_v15 }
 0x1c7   : > { %5349 = vmatprep.subr.bf16.mxu0 %v7216_v25  ;;  %v5089_v46 = vpop.f32.mrb[3].mxu1  ;;  %v712_v25 = vld [vmem:[%s8525_s18 + $0xb08] sm:$0xff] }
 0x1c8   : > { %5389 = vmatpush1.bf16.msra.mxu1 %v7335_v24  ;;  %v7384_v24 = vcombine.high %v832_v43, %v836_v16  ;;  %v7264_v31 = vcombine.high %v712_v25, %v716_v54  ;;  %v724_v35 = vld [vmem:[%s8525_s18 + $0xb68] sm:$0xff]  ;;  %v7263_v42 = vcombine.low %v712_v25, %v716_v54 }
 0x1c9   : > { %5390 = vmatprep.subr.bf16.mxu1 %v7344_v26  ;;  %v840_v26 = vld [vmem:[%s8525_s18 + $0xf08] sm:$0xff]  ;;  %v7271_v51 = vcombine.low %v720_v33, %v724_v35 }
 0x1ca   : > { %5350 = vmatpush1.bf16.msra.mxu0 %v7215_v38  ;;  %v7392_v32 = vcombine.high %v840_v26, %v844_v27  ;;  %v848_v36 = vld [vmem:[%s8525_s18 + $0xf48] sm:$0xff]  ;;  %v7391_v44 = vcombine.low %v840_v26, %v844_v27 }
 0x1cb   : > { %5351 = vmatprep.subr.bf16.mxu0 %v7224_v20  ;;  %v852_v38 = vld [vmem:[%s8525_s18 + $0xf68] sm:$0xff] }
 0x1cc   : > { %5391 = vmatpush1.bf16.msra.mxu1 %v7343_v45  ;;  %v7272_v45 = vcombine.high %v720_v33, %v724_v35  ;;  %v7400_v20 = vcombine.high %v848_v36, %v852_v38  ;;  %v728_v46 = vld [vmem:[%s8525_s18 + $0xb88] sm:$0xff]  ;;  %v7399_v52 = vcombine.low %v848_v36, %v852_v38 }
 0x1cd   : > { %5392 = vmatprep.subr.bf16.mxu1 %v7352_v47  ;;  %v732_v47 = vld [vmem:[%s8525_s18 + $0xba8] sm:$0xff] }
 0x1ce   : > { %5352 = vmatpush1.bf16.msra.mxu0 %v7223_v53  ;;  %v856_v23 = vld [vmem:[%s8525_s18 + $0xf88] sm:$0xff]  ;;  %v7280_v53 = vcombine.high %v728_v46, %v732_v47  ;;  %v7279_v63 = vcombine.low %v728_v46, %v732_v47 }
 0x1cf   : > { %5353 = vmatprep.subr.bf16.mxu0 %v7232_v57  ;;  %v860_v49 = vld [vmem:[%s8525_s18 + $0xfa8] sm:$0xff] }
 0x1d0   : > { %5393 = vmatpush1.bf16.msra.mxu1 %v7351_v56  ;;  %v7408_v56 = vcombine.high %v856_v23, %v860_v49  ;;  %v736_v57 = vld [vmem:[%s8525_s18 + $0xbc8] sm:$0xff]  ;;  %v7407_v0 = vcombine.low %v856_v23, %v860_v49 }
 0x1d1   : > { %5394 = vmatprep.subr.bf16.mxu1 %v7360_v58  ;;  %v740_v58 = vld [vmem:[%s8525_s18 + $0xbe8] sm:$0xff] }
 0x1d2   : > { %5354 = vmatpush1.bf16.msra.mxu0 %v7231_v1  ;;  %v864_v61 = vld [vmem:[%s8525_s18 + $0xfc8] sm:$0xff]  ;;  %v7288_v1 = vcombine.high %v736_v57, %v740_v58  ;;  %v7287_v9 = vcombine.low %v736_v57, %v740_v58 }
 0x1d3   : > { %5355 = vmatprep.subr.bf16.mxu0 %v7240_v3  ;;  %v868_v62 = vld [vmem:[%s8525_s18 + $0xfe8] sm:$0xff] }
 0x1d4   : > { %5395 = vmatpush1.bf16.msra.mxu1 %v7359_v2  ;;  %v7416_v2 = vcombine.high %v864_v61, %v868_v62  ;;  %v872_v3 = vld [vmem:[%s8525_s18 + $0x1008] sm:$0xff]  ;;  %v7415_v10 = vcombine.low %v864_v61, %v868_v62 }
 0x1d5   : > { %5396 = vmatprep.subr.bf16.mxu1 %v7368_v4  ;;  %v876_v4 = vld [vmem:[%s8525_s18 + $0x1028] sm:$0xff] }
 0x1d6   : > { %5356 = vmatpush1.bf16.msra.mxu0 %v7239_v11  ;;  %v1000_v6 = vld [vmem:[%s8525_s18 + $0x1408] sm:$0xff]  ;;  %v7424_v11 = vcombine.high %v872_v3, %v876_v4  ;;  %v7423_v43 = vcombine.low %v872_v3, %v876_v4 }
 0x1d7   : > { %5357 = vmatprep.subr.bf16.mxu0 %v7248_v13  ;;  %v1004_v7 = vld [vmem:[%s8525_s18 + $0x1428] sm:$0xff] }
 0x1d8   : > { %5397 = vmatpush1.bf16.msra.mxu1 %v7367_v12  ;;  %v7552_v12 = vcombine.high %v1000_v6, %v1004_v7  ;;  %v880_v13 = vld [vmem:[%s8525_s18 + $0x1048] sm:$0xff]  ;;  %v7551_v16 = vcombine.low %v1000_v6, %v1004_v7 }
 0x1d9   : > { %5398 = vmatprep.subr.bf16.mxu1 %v7376_v40  ;;  %v884_v40 = vld [vmem:[%s8525_s18 + $0x1068] sm:$0xff] }
 0x1da   : > { %5358 = vmatpush1.bf16.msra.mxu0 %v7247_v18  ;;  %v1008_v14 = vld [vmem:[%s8525_s18 + $0x1448] sm:$0xff]  ;;  %v7432_v18 = vcombine.high %v880_v13, %v884_v40  ;;  %v7431_v26 = vcombine.low %v880_v13, %v884_v40 }
 0x1db   : > { %5359 = vmatprep.subr.bf16.mxu0 %v7256_v22  ;;  %v1012_v15 = vld [vmem:[%s8525_s18 + $0x1468] sm:$0xff] }
 0x1dc   : > { %5399 = vmatpush1.bf16.msra.mxu1 %v7375_v19  ;;  %v7560_v19 = vcombine.high %v1008_v14, %v1012_v15  ;;  %v888_v22 = vld [vmem:[%s8525_s18 + $0x1088] sm:$0xff]  ;;  %v7559_v27 = vcombine.low %v1008_v14, %v1012_v15 }
 0x1dd   : > { %5400 = vmatprep.subr.bf16.mxu1 %v7384_v24  ;;  %v892_v24 = vld [vmem:[%s8525_s18 + $0x10a8] sm:$0xff] }
 0x1de   : > { %5360 = vmatpush1.bf16.msra.mxu0 %v7255_v55  ;;  %v1016_v25 = vld [vmem:[%s8525_s18 + $0x1488] sm:$0xff]  ;;  %v7440_v55 = vcombine.high %v888_v22, %v892_v24  ;;  %v7439_v36 = vcombine.low %v888_v22, %v892_v24 }
 0x1df   : > { %5361 = vmatprep.subr.bf16.mxu0 %v7264_v31  ;;  %v1020_v54 = vld [vmem:[%s8525_s18 + $0x14a8] sm:$0xff] }
 0x1e0   : > { %5401 = vmatpush1.bf16.msra.mxu1 %v7383_v29  ;;  %v7568_v29 = vcombine.high %v1016_v25, %v1020_v54  ;;  %v896_v31 = vld [vmem:[%s8525_s18 + $0x10c8] sm:$0xff]  ;;  %v7567_v38 = vcombine.low %v1016_v25, %v1020_v54 }
 0x1e1   : > { %5402 = vmatprep.subr.bf16.mxu1 %v7392_v32  ;;  %v900_v32 = vld [vmem:[%s8525_s18 + $0x10e8] sm:$0xff] }
 0x1e2   : > { %5362 = vmatpush1.bf16.msra.mxu0 %v7263_v42  ;;  %v1024_v33 = vld [vmem:[%s8525_s18 + $0x14c8] sm:$0xff]  ;;  %v7448_v42 = vcombine.high %v896_v31, %v900_v32  ;;  %v7447_v23 = vcombine.low %v896_v31, %v900_v32 }
 0x1e3   : > { %5363 = vmatprep.subr.bf16.mxu0 %v7272_v45  ;;  %v1028_v35 = vld [vmem:[%s8525_s18 + $0x14e8] sm:$0xff] }
 0x1e4   : > { %5403 = vmatpush1.bf16.msra.mxu1 %v7391_v44  ;;  %v7576_v44 = vcombine.high %v1024_v33, %v1028_v35  ;;  %v904_v45 = vld [vmem:[%s8525_s18 + $0x1108] sm:$0xff]  ;;  %v7575_v49 = vcombine.low %v1024_v33, %v1028_v35 }
 0x1e5   : > { %5404 = vmatprep.subr.bf16.mxu1 %v7400_v20  ;;  %v908_v20 = vld [vmem:[%s8525_s18 + $0x1128] sm:$0xff] }
 0x1e6   : > { %5364 = vmatpush1.bf16.msra.mxu0 %v7271_v51  ;;  %v1032_v46 = vld [vmem:[%s8525_s18 + $0x1508] sm:$0xff]  ;;  %v7456_v51 = vcombine.high %v904_v45, %v908_v20  ;;  %v7455_v61 = vcombine.low %v904_v45, %v908_v20 }
 0x1e7   : > { %5365 = vmatprep.subr.bf16.mxu0 %v7280_v53  ;;  %v1036_v47 = vld [vmem:[%s8525_s18 + $0x1528] sm:$0xff] }
 0x1e8   : > { %5405 = vmatpush1.bf16.msra.mxu1 %v7399_v52  ;;  %v7584_v52 = vcombine.high %v1032_v46, %v1036_v47  ;;  %v912_v53 = vld [vmem:[%s8525_s18 + $0x1148] sm:$0xff]  ;;  %v7583_v62 = vcombine.low %v1032_v46, %v1036_v47 }
 0x1e9   : > { %5406 = vmatprep.subr.bf16.mxu1 %v7408_v56  ;;  %v916_v56 = vld [vmem:[%s8525_s18 + $0x1168] sm:$0xff] }
 0x1ea   : > { %5366 = vmatpush1.bf16.msra.mxu0 %v7279_v63  ;;  %v1040_v57 = vld [vmem:[%s8525_s18 + $0x1548] sm:$0xff]  ;;  %v7464_v63 = vcombine.high %v912_v53, %v916_v56  ;;  %v7463_v6 = vcombine.low %v912_v53, %v916_v56 }
 0x1eb   : > { %5367 = vmatprep.subr.bf16.mxu0 %v7288_v1  ;;  %v1044_v58 = vld [vmem:[%s8525_s18 + $0x1568] sm:$0xff] }
 0x1ec   : > { %5407 = vmatpush1.bf16.msra.mxu1 %v7407_v0  ;;  %v7592_v0 = vcombine.high %v1040_v57, %v1044_v58  ;;  %v920_v1 = vld [vmem:[%s8525_s18 + $0x1188] sm:$0xff]  ;;  %v7591_v7 = vcombine.low %v1040_v57, %v1044_v58 }
 0x1ed   : > { %5408 = vmatprep.subr.bf16.mxu1 %v7416_v2  ;;  %v924_v2 = vld [vmem:[%s8525_s18 + $0x11a8] sm:$0xff] }
 0x1ee   : > { %5368 = vmatpush1.bf16.msra.mxu0 %v7287_v9  ;;  %v1048_v3 = vld [vmem:[%s8525_s18 + $0x1588] sm:$0xff]  ;;  %v7472_v9 = vcombine.high %v920_v1, %v924_v2  ;;  %v7471_v24 = vcombine.low %v920_v1, %v924_v2 }
 0x1ef   : > { %5419 = vmatprep.subr.bf16.mxu0 %v7424_v11  ;;  %v1052_v4 = vld [vmem:[%s8525_s18 + $0x15a8] sm:$0xff] }
 0x1f0   : > { %5409 = vmatpush1.bf16.msra.mxu1 %v7415_v10  ;;  %v7600_v11 = vcombine.high %v1048_v3, %v1052_v4  ;;  %v932_v13 = vld [vmem:[%s8525_s18 + $0x11e8] sm:$0xff] }
 0x1f1   : > { %5460 = vmatprep.subr.bf16.mxu1 %v7552_v12  ;;  %5370 = vmatmul.mubr.bf16.vlgmr.msra.gmra.mrb[16].mxu0 %v8718_v37  ;;  %v928_v12 = vld [vmem:[%s8525_s18 + $0x11c8] sm:$0xff] }
 0x1f2   : > { %5420 = vmatpush1.bf16.msra.mxu0 %v7423_v43  ;;  %5451 = vmatprep.mubr.bf16.mxu0 %v8736_v48  ;;  %v1056_v43 = vld [vmem:[%s8525_s18 + $0x15c8] sm:$0xff] }
 0x1f3   : > { %5411 = vmatmul.mubr.bf16.vlgmr.msra.gmra.mrb[16].mxu1 %v8727_v41  ;;  %5421 = vmatprep.subr.bf16.mxu0 %v7432_v18  ;;  %v936_v31 = vld [vmem:[%s8525_s18 + $0x1208] sm:$0xff] }
 0x1f4   : > { %5461 = vmatpush1.bf16.msra.mxu1 %v7551_v16  ;;  %5492 = vmatprep.mubr.bf16.mxu1 %v8743_v50  ;;  %v1060_v16 = vld [vmem:[%s8525_s18 + $0x15e8] sm:$0xff] }
 0x1f5   : > { %5462 = vmatprep.subr.bf16.mxu1 %v7560_v19  ;;  %v940_v32 = vld [vmem:[%s8525_s18 + $0x1228] sm:$0xff] }
 0x1f6   : > { %5422 = vmatpush1.bf16.msra.mxu0 %v7431_v26  ;;  %v1064_v33 = vld [vmem:[%s8525_s18 + $0x1608] sm:$0xff] }
 0x1f7   : > { %5423 = vmatprep.subr.bf16.mxu0 %v7440_v55  ;;  %v1068_v35 = vld [vmem:[%s8525_s18 + $0x1628] sm:$0xff] }
 0x1f8   : > { %5463 = vmatpush1.bf16.msra.mxu1 %v7559_v27  ;;  %v7480_v27 = vcombine.high %v928_v12, %v932_v13  ;;  %v944_v45 = vld [vmem:[%s8525_s18 + $0x1248] sm:$0xff] }
 0x1f9   : > { %5464 = vmatprep.subr.bf16.mxu1 %v7568_v29  ;;  %v7608_v29 = vcombine.high %v1056_v43, %v1060_v16  ;;  %v948_v20 = vld [vmem:[%s8525_s18 + $0x1268] sm:$0xff] }
 0x1fa   : > { %5424 = vmatpush1.bf16.msra.mxu0 %v7439_v36  ;;  %v7479_v36 = vcombine.low %v928_v12, %v932_v13  ;;  %v1072_v46 = vld [vmem:[%s8525_s18 + $0x1648] sm:$0xff] }
 0x1fb   : > { %5425 = vmatprep.subr.bf16.mxu0 %v7448_v42  ;;  %v7488_v42 = vcombine.high %v936_v31, %v940_v32  ;;  %v1076_v47 = vld [vmem:[%s8525_s18 + $0x1668] sm:$0xff] }
 0x1fc   : > { %5465 = vmatpush1.bf16.msra.mxu1 %v7567_v38  ;;  %v7607_v38 = vcombine.low %v1056_v43, %v1060_v16  ;;  %v952_v53 = vld [vmem:[%s8525_s18 + $0x1288] sm:$0xff] }
 0x1fd   : > { %5466 = vmatprep.subr.bf16.mxu1 %v7576_v44  ;;  %v7616_v44 = vcombine.high %v1064_v33, %v1068_v35  ;;  %v956_v56 = vld [vmem:[%s8525_s18 + $0x12a8] sm:$0xff] }
 0x1fe   : > { %5426 = vmatpush1.bf16.msra.mxu0 %v7447_v23  ;;  %v7487_v23 = vcombine.low %v936_v31, %v940_v32  ;;  %v1080_v57 = vld [vmem:[%s8525_s18 + $0x1688] sm:$0xff] }
 0x1ff   : > { %5427 = vmatprep.subr.bf16.mxu0 %v7456_v51  ;;  %v7496_v51 = vcombine.high %v944_v45, %v948_v20  ;;  %v1084_v58 = vld [vmem:[%s8525_s18 + $0x16a8] sm:$0xff] }
 0x200   : > { %5467 = vmatpush1.bf16.msra.mxu1 %v7575_v49  ;;  %v7615_v49 = vcombine.low %v1064_v33, %v1068_v35  ;;  %v960_v1 = vld [vmem:[%s8525_s18 + $0x12c8] sm:$0xff] }
 0x201   : > { %5468 = vmatprep.subr.bf16.mxu1 %v7584_v52  ;;  %v7624_v52 = vcombine.high %v1072_v46, %v1076_v47  ;;  %v964_v2 = vld [vmem:[%s8525_s18 + $0x12e8] sm:$0xff] }
 0x202   : > { %5428 = vmatpush1.bf16.msra.mxu0 %v7455_v61  ;;  %v7495_v61 = vcombine.low %v944_v45, %v948_v20  ;;  %v972_v12 = vld [vmem:[%s8525_s18 + $0x1328] sm:$0xff] }
 0x203   : > { %5429 = vmatprep.subr.bf16.mxu0 %v7464_v63  ;;  %v5125_v10 = vpop.f32.mrb[4].mxu0  ;;  %v7504_v63 = vcombine.high %v952_v53, %v956_v56  ;;  %v1096_v13 = vld [vmem:[%s8525_s18 + $0x1708] sm:$0xff] }
 0x204   : > { %5469 = vmatpush1.bf16.msra.mxu1 %v7583_v62  ;;  %v5126_v40 = vadd.f32 %v5125_v10, %v8912_v34  ;;  %v5127_v15 = vpop.f32.mrb[5].mxu0  ;;  %v7599_v34 = vcombine.low %v1048_v3, %v1052_v4  ;;  %v7623_v62 = vcombine.low %v1072_v46, %v1076_v47  ;;  %v1088_v3 = vld [vmem:[%s8525_s18 + $0x16c8] sm:$0xff] }
 0x205   : > { %5470 = vmatprep.subr.bf16.mxu1 %v7592_v0  ;;  %v5166_v14 = vpop.f32.mrb[4].mxu1  ;;  %v5128_v18 = vadd.f32 %v5127_v15, %v8914_v39  ;;  %v5129_v22 = vpop.f32.mrb[6].mxu0  ;;  %v7632_v0 = vcombine.high %v1080_v57, %v1084_v58  ;;  %v1092_v4 = vld [vmem:[%s8525_s18 + $0x16e8] sm:$0xff] }
 0x206   : > { %v5168_v19 = vpop.f32.mrb[5].mxu1  ;;  %5430 = vmatpush1.bf16.msra.mxu0 %v7463_v6  ;;  %v8986_v25 = vadd.f32 %v5166_v14, %v5126_v40  ;;  %v5130_v26 = vpop.f32.mrb[7].mxu0  ;;  %v7503_v6 = vcombine.low %v952_v53, %v956_v56  ;;  %v7640_v10 = vcombine.high %v1088_v3, %v1092_v4  ;;  %v1100_v40 = vld [vmem:[%s8525_s18 + $0x1728] sm:$0xff]  ;;  %v7511_v14 = vcombine.low %v960_v1, %v964_v2  ;;  %v489_v53 = vld [vmem:[%s8525_s18 + $0x410] sm:$0xff] }
 0x207   : > { %v5170_v54 = vpop.f32.mrb[6].mxu1  ;;  %5431 = vmatprep.subr.bf16.mxu0 %v7472_v9  ;;  %v8988_v55 = vadd.f32 %v5168_v19, %v5128_v18  ;;  %v7512_v9 = vcombine.high %v960_v1, %v964_v2  ;;  %v7639_v15 = vcombine.low %v1088_v3, %v1092_v4  ;;  %v7648_v16 = vcombine.high %v1096_v13, %v1100_v40  ;;  %v976_v18 = vld [vmem:[%s8525_s18 + $0x1348] sm:$0xff]  ;;  %v493_v56 = vld [vmem:[%s8525_s18 + $0x430] sm:$0xff] }
 0x208   : > { %5471 = vmatpush1.bf16.msra.mxu1 %v7591_v7  ;;  %v5171_v39 = vpop.f32.mrb[7].mxu1  ;;  %v7631_v7 = vcombine.low %v1080_v57, %v1084_v58  ;;  %v980_v19 = vld [vmem:[%s8525_s18 + $0x1368] sm:$0xff]  ;;  %v7647_v26 = vcombine.low %v1096_v13, %v1100_v40  ;;  %v497_v1 = vld [vmem:[%s8525_s18 + $0x450] sm:$0xff]  ;;  %v7041_v4 = vcombine.low %v489_v53, %v493_v56 }
 0x209   : > { %5472 = vmatprep.subr.bf16.mxu1 %v7600_v11  ;;  %v968_v11 = vld [vmem:[%s8525_s18 + $0x1308] sm:$0xff]  ;;  %v7527_v33 = vcombine.low %v976_v18, %v980_v19  ;;  %v501_v2 = vld [vmem:[%s8525_s18 + $0x470] sm:$0xff] }
 0x20a   : > { %5432 = vmatpush1.bf16.msra.mxu0 %v7471_v24  ;;  %v7520_v43 = vcombine.high %v968_v11, %v972_v12  ;;  %v1104_v22 = vld [vmem:[%s8525_s18 + $0x1748] sm:$0xff]  ;;  %v7519_v54 = vcombine.low %v968_v11, %v972_v12  ;;  %v505_v11 = vld [vmem:[%s8525_s18 + $0x490] sm:$0xff]  ;;  %v7049_v40 = vcombine.low %v497_v1, %v501_v2 }
 0x20b   : > { %5433 = vmatprep.subr.bf16.mxu0 %v7480_v27  ;;  %v1108_v24 = vld [vmem:[%s8525_s18 + $0x1768] sm:$0xff]  ;;  %v509_v12 = vld [vmem:[%s8525_s18 + $0x4b0] sm:$0xff] }
 0x20c   : > { %5473 = vmatpush1.bf16.msra.mxu1 %v7599_v34  ;;  %v7528_v34 = vcombine.high %v976_v18, %v980_v19  ;;  %v7656_v27 = vcombine.high %v1104_v22, %v1108_v24  ;;  %v984_v39 = vld [vmem:[%s8525_s18 + $0x1388] sm:$0xff]  ;;  %v7655_v35 = vcombine.low %v1104_v22, %v1108_v24  ;;  %v513_v18 = vld [vmem:[%s8525_s18 + $0x4d0] sm:$0xff]  ;;  %v7057_v24 = vcombine.low %v505_v11, %v509_v12 }
 0x20d   : > { %5474 = vmatprep.subr.bf16.mxu1 %v7608_v29  ;;  %v988_v29 = vld [vmem:[%s8525_s18 + $0x13a8] sm:$0xff]  ;;  %v517_v19 = vld [vmem:[%s8525_s18 + $0x4f0] sm:$0xff] }
 0x20e   : > { %5434 = vmatpush1.bf16.msra.mxu0 %v7479_v36  ;;  %v1112_v31 = vld [vmem:[%s8525_s18 + $0x1788] sm:$0xff]  ;;  %v7536_v36 = vcombine.high %v984_v39, %v988_v29  ;;  %v7535_v46 = vcombine.low %v984_v39, %v988_v29  ;;  %v521_v39 = vld [vmem:[%s8525_s18 + $0x510] sm:$0xff] }
 0x20f   : > { %5435 = vmatprep.subr.bf16.mxu0 %v7488_v42  ;;  %v1116_v32 = vld [vmem:[%s8525_s18 + $0x17a8] sm:$0xff]  ;;  %v525_v29 = vld [vmem:[%s8525_s18 + $0x530] sm:$0xff] }
 0x210   : > { %5475 = vmatpush1.bf16.msra.mxu1 %v7607_v38  ;;  %v7664_v38 = vcombine.high %v1112_v31, %v1116_v32  ;;  %v992_v42 = vld [vmem:[%s8525_s18 + $0x13c8] sm:$0xff]  ;;  %v7663_v47 = vcombine.low %v1112_v31, %v1116_v32  ;;  %v7065_v32 = vcombine.low %v513_v18, %v517_v19 }
 0x211   : > { %5476 = vmatprep.subr.bf16.mxu1 %v7616_v44  ;;  %v996_v44 = vld [vmem:[%s8525_s18 + $0x13e8] sm:$0xff] }
 0x212   : > { %5436 = vmatpush1.bf16.msra.mxu0 %v7487_v23  ;;  %v1120_v45 = vld [vmem:[%s8525_s18 + $0x17c8] sm:$0xff]  ;;  %v7544_v23 = vcombine.high %v992_v42, %v996_v44  ;;  %v7543_v57 = vcombine.low %v992_v42, %v996_v44  ;;  %v529_v42 = vld [vmem:[%s8525_s18 + $0x550] sm:$0xff] }
 0x213   : > { %5437 = vmatprep.subr.bf16.mxu0 %v7496_v51  ;;  %v1124_v20 = vld [vmem:[%s8525_s18 + $0x17e8] sm:$0xff]  ;;  %v361_v51 = vld [vmem:[%s8525_s18 + $0x10] sm:$0xff] }
 0x214   : > { %5477 = vmatpush1.bf16.msra.mxu1 %v7615_v49  ;;  %v7672_v49 = vcombine.high %v1120_v45, %v1124_v20  ;;  %v7671_v58 = vcombine.low %v1120_v45, %v1124_v20  ;;  %v533_v44 = vld [vmem:[%s8525_s18 + $0x570] sm:$0xff]  ;;  %v7073_v20 = vcombine.low %v521_v39, %v525_v29 }
 0x215   : > { %5478 = vmatprep.subr.bf16.mxu1 %v7624_v52  ;;  %v365_v52 = vld [vmem:[%s8525_s18 + $0x30] sm:$0xff] }
 0x216   : > { %5438 = vmatpush1.bf16.msra.mxu0 %v7495_v61  ;;  %v6914_v61 = vcombine.high %v361_v51, %v365_v52  ;;  %v6913_v3 = vcombine.low %v361_v51, %v365_v52  ;;  %v537_v51 = vld [vmem:[%s8525_s18 + $0x590] sm:$0xff] }
 0x217   : > { %5439 = vmatprep.subr.bf16.mxu0 %v7504_v63  ;;  %v369_v63 = vld [vmem:[%s8525_s18 + $0x50] sm:$0xff] }
 0x218   : > { %5479 = vmatpush1.bf16.msra.mxu1 %v7623_v62  ;;  %v7042_v62 = vcombine.high %v489_v53, %v493_v56  ;;  %v541_v52 = vld [vmem:[%s8525_s18 + $0x5b0] sm:$0xff]  ;;  %v7081_v56 = vcombine.low %v529_v42, %v533_v44 }
 0x219   : > { %5480 = vmatprep.subr.bf16.mxu1 %v7632_v0  ;;  %v373_v0 = vld [vmem:[%s8525_s18 + $0x70] sm:$0xff] }
 0x21a   : > { %5440 = vmatpush1.bf16.msra.mxu0 %v7503_v6  ;;  %v6922_v6 = vcombine.high %v369_v63, %v373_v0  ;;  %v6921_v13 = vcombine.low %v369_v63, %v373_v0  ;;  %v421_v63 = vld [vmem:[%s8525_s18 + $0x1f0] sm:$0xff] }
 0x21b   : > { %5441 = vmatprep.subr.bf16.mxu0 %v7512_v9  ;;  %v377_v9 = vld [vmem:[%s8525_s18 + $0x90] sm:$0xff] }
 0x21c   : > { %5481 = vmatpush1.bf16.msra.mxu1 %v7631_v7  ;;  %v7050_v7 = vcombine.high %v497_v1, %v501_v2 }
 0x21d   : > { %5482 = vmatprep.subr.bf16.mxu1 %v7640_v10  ;;  %v381_v10 = vld [vmem:[%s8525_s18 + $0xb0] sm:$0xff] }
 0x21e   : > { %5442 = vmatpush1.bf16.msra.mxu0 %v7511_v14  ;;  %v6930_v14 = vcombine.high %v377_v9, %v381_v10  ;;  %v6929_v22 = vcombine.low %v377_v9, %v381_v10 }
 0x21f   : > { %5443 = vmatprep.subr.bf16.mxu0 %v7520_v43  ;;  %v385_v43 = vld [vmem:[%s8525_s18 + $0xd0] sm:$0xff] }
 0x220   : > { %5483 = vmatpush1.bf16.msra.mxu1 %v7639_v15  ;;  %v7058_v15 = vcombine.high %v505_v11, %v509_v12 }
 0x221   : > { %5484 = vmatprep.subr.bf16.mxu1 %v7648_v16  ;;  %v389_v16 = vld [vmem:[%s8525_s18 + $0xf0] sm:$0xff] }
 0x222   : > { %5444 = vmatpush1.bf16.msra.mxu0 %v7519_v54  ;;  %v6938_v54 = vcombine.high %v385_v43, %v389_v16  ;;  %v6937_v31 = vcombine.low %v385_v43, %v389_v16 }
 0x223   : > { %5445 = vmatprep.subr.bf16.mxu0 %v7528_v34  ;;  %v393_v34 = vld [vmem:[%s8525_s18 + $0x110] sm:$0xff] }
 0x224   : > { %5485 = vmatpush1.bf16.msra.mxu1 %v7647_v26  ;;  %v7066_v26 = vcombine.high %v513_v18, %v517_v19  ;;  %v425_v18 = vld [vmem:[%s8525_s18 + $0x210] sm:$0xff] }
 0x225   : > { %5486 = vmatprep.subr.bf16.mxu1 %v7656_v27  ;;  %v397_v27 = vld [vmem:[%s8525_s18 + $0x130] sm:$0xff] }
 0x226   : > { %5446 = vmatpush1.bf16.msra.mxu0 %v7527_v33  ;;  %v6946_v33 = vcombine.high %v393_v34, %v397_v27  ;;  %v6945_v45 = vcombine.low %v393_v34, %v397_v27  ;;  %v429_v19 = vld [vmem:[%s8525_s18 + $0x230] sm:$0xff] }
 0x227   : > { %5447 = vmatprep.subr.bf16.mxu0 %v7536_v36  ;;  %v401_v36 = vld [vmem:[%s8525_s18 + $0x150] sm:$0xff] }
 0x228   : > { %5487 = vmatpush1.bf16.msra.mxu1 %v7655_v35  ;;  %v7074_v35 = vcombine.high %v521_v39, %v525_v29  ;;  %v6978_v39 = vcombine.high %v425_v18, %v429_v19 }
 0x229   : > { %5488 = vmatprep.subr.bf16.mxu1 %v7664_v38  ;;  %v405_v38 = vld [vmem:[%s8525_s18 + $0x170] sm:$0xff] }
 0x22a   : > { %5448 = vmatpush1.bf16.msra.mxu0 %v7535_v46  ;;  %v6954_v46 = vcombine.high %v401_v36, %v405_v38  ;;  %v6953_v53 = vcombine.low %v401_v36, %v405_v38  ;;  %v6977_v36 = vcombine.low %v425_v18, %v429_v19  ;;  %v601_v18 = vld [vmem:[%s8525_s18 + $0x790] sm:$0xff] }
 0x22b   : > { %5449 = vmatprep.subr.bf16.mxu0 %v7544_v23  ;;  %v409_v23 = vld [vmem:[%s8525_s18 + $0x190] sm:$0xff] }
 0x22c   : > { %5489 = vmatpush1.bf16.msra.mxu1 %v7663_v47  ;;  %v7082_v47 = vcombine.high %v529_v42, %v533_v44  ;;  %v605_v19 = vld [vmem:[%s8525_s18 + $0x7b0] sm:$0xff] }
 0x22d   : > { %5490 = vmatprep.subr.bf16.mxu1 %v7672_v49  ;;  %v413_v49 = vld [vmem:[%s8525_s18 + $0x1b0] sm:$0xff] }
 0x22e   : > { %5450 = vmatpush1.bf16.msra.mxu0 %v7543_v57  ;;  %v6962_v57 = vcombine.high %v409_v23, %v413_v49  ;;  %v6961_v11 = vcombine.low %v409_v23, %v413_v49 }
 0x22f   : > { %5501 = vmatprep.subr.bf16.mxu0 %v6914_v61  ;;  %v7090_v61 = vcombine.high %v537_v51, %v541_v52 }
 0x230   : > { %5491 = vmatpush1.bf16.msra.mxu1 %v7671_v58 }
 0x231   : > { %5542 = vmatprep.subr.bf16.mxu1 %v7042_v62  ;;  %5452 = vmatmul.mubr.bf16.vlgmr.msra.gmra.mrb[20].mxu0 %v8808_v5  ;;  %v417_v62 = vld [vmem:[%s8525_s18 + $0x1d0] sm:$0xff] }
 0x232   : > { %5502 = vmatpush1.bf16.msra.mxu0 %v6913_v3  ;;  %5533 = vmatprep.mubr.bf16.mxu0 %v8578_v59  ;;  %v545_v3 = vld [vmem:[%s8525_s18 + $0x5d0] sm:$0xff]  ;;  %v6969_v34 = vcombine.low %v417_v62, %v421_v63 }
 0x233   : > { %5493 = vmatmul.mubr.bf16.vlgmr.msra.gmra.mrb[20].mxu1 %v8814_v8  ;;  %5503 = vmatprep.subr.bf16.mxu0 %v6922_v6  ;;  %v345_v6 = vld [vmem:[#allocation2] sm:$0xff] }
 0x234   : > { %5543 = vmatpush1.bf16.msra.mxu1 %v7041_v4  ;;  %5574 = vmatprep.mubr.bf16.mxu1 %v8582_v60  ;;  %v549_v4 = vld [vmem:[%s8525_s18 + $0x5f0] sm:$0xff] }
 0x235   : > { %5544 = vmatprep.subr.bf16.mxu1 %v7050_v7  ;;  %v7097_v27 = vcombine.low %v545_v3, %v549_v4 }
 0x236   : > { %5504 = vmatpush1.bf16.msra.mxu0 %v6921_v13  ;;  %v346_v13 = vld [vmem:[#allocation2 + $0x8] sm:$0xff] }
 0x237   : > { %5505 = vmatprep.subr.bf16.mxu0 %v6930_v14  ;;  %v7089_v14 = vcombine.low %v537_v51, %v541_v52 }
 0x238   : > { %5545 = vmatpush1.bf16.msra.mxu1 %v7049_v40 }
 0x239   : > { %5546 = vmatprep.subr.bf16.mxu1 %v7058_v15  ;;  %v6970_v15 = vcombine.high %v417_v62, %v421_v63 }
 0x23a   : > { %5506 = vmatpush1.bf16.msra.mxu0 %v6929_v22 }
 0x23b   : > { %5507 = vmatprep.subr.bf16.mxu0 %v6938_v54  ;;  %v557_v54 = vld [vmem:[%s8525_s18 + $0x630] sm:$0xff] }
 0x23c   : > { %5547 = vmatpush1.bf16.msra.mxu1 %v7057_v24  ;;  %v553_v24 = vld [vmem:[%s8525_s18 + $0x610] sm:$0xff] }
 0x23d   : > { %5548 = vmatprep.subr.bf16.mxu1 %v7066_v26  ;;  %v7106_v29 = vcombine.high %v553_v24, %v557_v54  ;;  %v7105_v38 = vcombine.low %v553_v24, %v557_v54 }
 0x23e   : > { %5508 = vmatpush1.bf16.msra.mxu0 %v6937_v31  ;;  %v433_v31 = vld [vmem:[%s8525_s18 + $0x250] sm:$0xff] }
 0x23f   : > { %5509 = vmatprep.subr.bf16.mxu0 %v6946_v33  ;;  %v561_v33 = vld [vmem:[%s8525_s18 + $0x650] sm:$0xff] }
 0x240   : > { %5549 = vmatpush1.bf16.msra.mxu1 %v7065_v32  ;;  %v437_v32 = vld [vmem:[%s8525_s18 + $0x270] sm:$0xff] }
 0x241   : > { %5550 = vmatprep.subr.bf16.mxu1 %v7074_v35  ;;  %v565_v35 = vld [vmem:[%s8525_s18 + $0x670] sm:$0xff]  ;;  %v6986_v42 = vcombine.high %v433_v31, %v437_v32  ;;  %v6985_v23 = vcombine.low %v433_v31, %v437_v32  ;;  %v7153_v32 = vcombine.low %v601_v18, %v605_v19 }
 0x242   : > { %5510 = vmatpush1.bf16.msra.mxu0 %v6945_v45  ;;  %v7114_v44 = vcombine.high %v561_v33, %v565_v35  ;;  %v441_v45 = vld [vmem:[%s8525_s18 + $0x290] sm:$0xff]  ;;  %v7113_v49 = vcombine.low %v561_v33, %v565_v35 }
 0x243   : > { %5511 = vmatprep.subr.bf16.mxu0 %v6954_v46  ;;  %v569_v46 = vld [vmem:[%s8525_s18 + $0x690] sm:$0xff] }
 0x244   : > { %5551 = vmatpush1.bf16.msra.mxu1 %v7073_v20  ;;  %v5207_v58 = vpop.f32.mrb[8].mxu0  ;;  %v445_v20 = vld [vmem:[%s8525_s18 + $0x2b0] sm:$0xff] }
 0x245   : > { %5552 = vmatprep.subr.bf16.mxu1 %v7082_v47  ;;  %v5208_v0 = vadd.f32 %v5207_v58, %v8986_v25  ;;  %v5209_v2 = vpop.f32.mrb[9].mxu0  ;;  %v573_v47 = vld [vmem:[%s8525_s18 + $0x6b0] sm:$0xff]  ;;  %v6994_v51 = vcombine.high %v441_v45, %v445_v20 }
 0x246   : > { %v5248_v1 = vpop.f32.mrb[8].mxu1  ;;  %v5210_v7 = vadd.f32 %v5209_v2, %v8988_v55  ;;  %v5211_v10 = vpop.f32.mrb[10].mxu0  ;;  %5512 = vmatpush1.bf16.msra.mxu0 %v6953_v53  ;;  %v7098_v55 = vcombine.high %v545_v3, %v549_v4  ;;  %v7122_v52 = vcombine.high %v569_v46, %v573_v47  ;;  %v449_v53 = vld [vmem:[%s8525_s18 + $0x2d0] sm:$0xff]  ;;  %v7121_v62 = vcombine.low %v569_v46, %v573_v47 }
 0x247   : > { %v5250_v9 = vpop.f32.mrb[9].mxu1  ;;  %v5249_v12 = vadd.f32 %v5248_v1, %v5208_v0  ;;  %v5212_v25 = vpop.f32.mrb[11].mxu0  ;;  %5513 = vmatprep.subr.bf16.mxu0 %v6962_v57  ;;  %v577_v57 = vld [vmem:[%s8525_s18 + $0x6d0] sm:$0xff] }
 0x248   : > { %v5252_v40 = vpop.f32.mrb[10].mxu1  ;;  %5553 = vmatpush1.bf16.msra.mxu1 %v7081_v56  ;;  %v5251_v43 = vadd.f32 %v5250_v9, %v5210_v7  ;;  %v453_v56 = vld [vmem:[%s8525_s18 + $0x2f0] sm:$0xff] }
 0x249   : > { %v5253_v16 = vpop.f32.mrb[11].mxu1  ;;  %5554 = vmatprep.subr.bf16.mxu1 %v7090_v61  ;;  %v5993_v22 = vadd.f32 %v5249_v12, %v345_v6  ;;  %v581_v58 = vld [vmem:[%s8525_s18 + $0x6f0] sm:$0xff]  ;;  %v6993_v61 = vcombine.low %v441_v45, %v445_v20  ;;  %v7002_v63 = vcombine.high %v449_v53, %v453_v56  ;;  %v7001_v6 = vcombine.low %v449_v53, %v453_v56 }
 0x24a   : > { %v5994_v26 = vadd.f32 %v5251_v43, %v346_v13  ;;  %5514 = vmatpush1.bf16.msra.mxu0 %v6961_v11  ;;  %v7130_v0 = vcombine.high %v577_v57, %v581_v58  ;;  %v457_v1 = vld [vmem:[%s8525_s18 + $0x310] sm:$0xff]  ;;  %v7129_v7 = vcombine.low %v577_v57, %v581_v58 }
 0x24b   : > { %6001 = vst [vmem:[#allocation2] sm:$0xff] %v5993_v22  ;;  %5515 = vmatprep.subr.bf16.mxu0 %v6970_v15  ;;  %v461_v2 = vld [vmem:[%s8525_s18 + $0x330] sm:$0xff] }
 0x24c   : > { %5555 = vmatpush1.bf16.msra.mxu1 %v7089_v14  ;;  %6002 = vst [vmem:[#allocation2 + $0x8] sm:$0xff] %v5994_v26  ;;  %v585_v3 = vld [vmem:[%s8525_s18 + $0x710] sm:$0xff]  ;;  %v7010_v9 = vcombine.high %v457_v1, %v461_v2  ;;  %v7009_v25 = vcombine.low %v457_v1, %v461_v2  ;;  %v7154_v26 = vcombine.high %v601_v18, %v605_v19 }
 0x24d   : > { %5556 = vmatprep.subr.bf16.mxu1 %v7098_v55  ;;  %v589_v4 = vld [vmem:[%s8525_s18 + $0x730] sm:$0xff] }
 0x24e   : > { %5516 = vmatpush1.bf16.msra.mxu0 %v6969_v34  ;;  %v7138_v10 = vcombine.high %v585_v3, %v589_v4  ;;  %v465_v11 = vld [vmem:[%s8525_s18 + $0x350] sm:$0xff]  ;;  %v7137_v14 = vcombine.low %v585_v3, %v589_v4 }
 0x24f   : > { %5517 = vmatprep.subr.bf16.mxu0 %v6978_v39  ;;  %v469_v12 = vld [vmem:[%s8525_s18 + $0x370] sm:$0xff] }
 0x250   : > { %5557 = vmatpush1.bf16.msra.mxu1 %v7097_v27  ;;  %v593_v13 = vld [vmem:[%s8525_s18 + $0x750] sm:$0xff]  ;;  %v7018_v15 = vcombine.high %v465_v11, %v469_v12  ;;  %v7017_v22 = vcombine.low %v465_v11, %v469_v12 }
 0x251   : > { %5558 = vmatprep.subr.bf16.mxu1 %v7106_v29  ;;  %v597_v40 = vld [vmem:[%s8525_s18 + $0x770] sm:$0xff] }
 0x252   : > { %5518 = vmatpush1.bf16.msra.mxu0 %v6977_v36  ;;  %v7146_v43 = vcombine.high %v593_v13, %v597_v40  ;;  %v473_v16 = vld [vmem:[%s8525_s18 + $0x390] sm:$0xff]  ;;  %v7145_v24 = vcombine.low %v593_v13, %v597_v40 }
 0x253   : > { %5519 = vmatprep.subr.bf16.mxu0 %v6986_v42  ;;  %v477_v55 = vld [vmem:[%s8525_s18 + $0x3b0] sm:$0xff] }
 0x254   : > { %5559 = vmatpush1.bf16.msra.mxu1 %v7105_v38  ;;  %v7026_v54 = vcombine.high %v473_v16, %v477_v55  ;;  %v481_v34 = vld [vmem:[%s8525_s18 + $0x3d0] sm:$0xff]  ;;  %v7025_v31 = vcombine.low %v473_v16, %v477_v55 }
 0x255   : > { %5560 = vmatprep.subr.bf16.mxu1 %v7114_v44  ;;  %v485_v27 = vld [vmem:[%s8525_s18 + $0x3f0] sm:$0xff] }
 0x256   : > { %5520 = vmatpush1.bf16.msra.mxu0 %v6985_v23  ;;  %v609_v39 = vld [vmem:[%s8525_s18 + $0x7d0] sm:$0xff]  ;;  %v7034_v33 = vcombine.high %v481_v34, %v485_v27  ;;  %v7033_v45 = vcombine.low %v481_v34, %v485_v27 }
 0x257   : > { %5521 = vmatprep.subr.bf16.mxu0 %v6994_v51  ;;  %v613_v29 = vld [vmem:[%s8525_s18 + $0x7f0] sm:$0xff] }
 0x258   : > { %5561 = vmatpush1.bf16.msra.mxu1 %v7113_v49  ;;  %v7162_v35 = vcombine.high %v609_v39, %v613_v29  ;;  %v617_v36 = vld [vmem:[%s8525_s18 + $0x810] sm:$0xff]  ;;  %v7161_v20 = vcombine.low %v609_v39, %v613_v29 }
 0x259   : > { %5562 = vmatprep.subr.bf16.mxu1 %v7122_v52  ;;  %v621_v38 = vld [vmem:[%s8525_s18 + $0x830] sm:$0xff] }
 0x25a   : > { %5522 = vmatpush1.bf16.msra.mxu0 %v6993_v61  ;;  %v745_v42 = vld [vmem:[%s8525_s18 + $0xc10] sm:$0xff]  ;;  %v7170_v46 = vcombine.high %v617_v36, %v621_v38  ;;  %v7169_v53 = vcombine.low %v617_v36, %v621_v38 }
 0x25b   : > { %5523 = vmatprep.subr.bf16.mxu0 %v7002_v63  ;;  %v749_v44 = vld [vmem:[%s8525_s18 + $0xc30] sm:$0xff] }
 0x25c   : > { %5563 = vmatpush1.bf16.msra.mxu1 %v7121_v62  ;;  %v7298_v47 = vcombine.high %v745_v42, %v749_v44  ;;  %v625_v23 = vld [vmem:[%s8525_s18 + $0x850] sm:$0xff]  ;;  %v7297_v56 = vcombine.low %v745_v42, %v749_v44 }
 0x25d   : > { %5564 = vmatprep.subr.bf16.mxu1 %v7130_v0  ;;  %v629_v49 = vld [vmem:[%s8525_s18 + $0x870] sm:$0xff] }
 0x25e   : > { %5524 = vmatpush1.bf16.msra.mxu0 %v7001_v6  ;;  %v753_v51 = vld [vmem:[%s8525_s18 + $0xc50] sm:$0xff]  ;;  %v7178_v57 = vcombine.high %v625_v23, %v629_v49  ;;  %v7177_v1 = vcombine.low %v625_v23, %v629_v49 }
 0x25f   : > { %5525 = vmatprep.subr.bf16.mxu0 %v7010_v9  ;;  %v757_v52 = vld [vmem:[%s8525_s18 + $0xc70] sm:$0xff] }
 0x260   : > { %5565 = vmatpush1.bf16.msra.mxu1 %v7129_v7  ;;  %v7306_v58 = vcombine.high %v753_v51, %v757_v52  ;;  %v633_v61 = vld [vmem:[%s8525_s18 + $0x890] sm:$0xff]  ;;  %v7305_v2 = vcombine.low %v753_v51, %v757_v52 }
 0x261   : > { %5566 = vmatprep.subr.bf16.mxu1 %v7138_v10  ;;  %v637_v62 = vld [vmem:[%s8525_s18 + $0x8b0] sm:$0xff] }
 0x262   : > { %5526 = vmatpush1.bf16.msra.mxu0 %v7009_v25  ;;  %v761_v63 = vld [vmem:[%s8525_s18 + $0xc90] sm:$0xff]  ;;  %v7186_v3 = vcombine.high %v633_v61, %v637_v62  ;;  %v7185_v11 = vcombine.low %v633_v61, %v637_v62 }
 0x263   : > { %5527 = vmatprep.subr.bf16.mxu0 %v7018_v15  ;;  %v765_v0 = vld [vmem:[%s8525_s18 + $0xcb0] sm:$0xff] }
 0x264   : > { %5567 = vmatpush1.bf16.msra.mxu1 %v7137_v14  ;;  %v7314_v4 = vcombine.high %v761_v63, %v765_v0  ;;  %v641_v6 = vld [vmem:[%s8525_s18 + $0x8d0] sm:$0xff]  ;;  %v7313_v12 = vcombine.low %v761_v63, %v765_v0 }
 0x265   : > { %5568 = vmatprep.subr.bf16.mxu1 %v7146_v43  ;;  %v645_v7 = vld [vmem:[%s8525_s18 + $0x8f0] sm:$0xff] }
 0x266   : > { %5528 = vmatpush1.bf16.msra.mxu0 %v7017_v22  ;;  %v769_v9 = vld [vmem:[%s8525_s18 + $0xcd0] sm:$0xff]  ;;  %v7194_v13 = vcombine.high %v641_v6, %v645_v7  ;;  %v7193_v16 = vcombine.low %v641_v6, %v645_v7 }
 0x267   : > { %5529 = vmatprep.subr.bf16.mxu0 %v7026_v54  ;;  %v773_v10 = vld [vmem:[%s8525_s18 + $0xcf0] sm:$0xff] }
 0x268   : > { %5569 = vmatpush1.bf16.msra.mxu1 %v7145_v24  ;;  %v7322_v40 = vcombine.high %v769_v9, %v773_v10  ;;  %v649_v25 = vld [vmem:[%s8525_s18 + $0x910] sm:$0xff]  ;;  %v7321_v55 = vcombine.low %v769_v9, %v773_v10 }
 0x269   : > { %5570 = vmatprep.subr.bf16.mxu1 %v7154_v26  ;;  %v653_v14 = vld [vmem:[%s8525_s18 + $0x930] sm:$0xff] }
 0x26a   : > { %5530 = vmatpush1.bf16.msra.mxu0 %v7025_v31  ;;  %v777_v15 = vld [vmem:[%s8525_s18 + $0xd10] sm:$0xff]  ;;  %v7202_v18 = vcombine.high %v649_v25, %v653_v14  ;;  %v7201_v34 = vcombine.low %v649_v25, %v653_v14 }
 0x26b   : > { %5531 = vmatprep.subr.bf16.mxu0 %v7034_v33  ;;  %v781_v43 = vld [vmem:[%s8525_s18 + $0xd30] sm:$0xff] }
 0x26c   : > { %5571 = vmatpush1.bf16.msra.mxu1 %v7153_v32  ;;  %v7330_v19 = vcombine.high %v777_v15, %v781_v43  ;;  %v657_v22 = vld [vmem:[%s8525_s18 + $0x950] sm:$0xff]  ;;  %v7329_v27 = vcombine.low %v777_v15, %v781_v43 }
 0x26d   : > { %5572 = vmatprep.subr.bf16.mxu1 %v7162_v35  ;;  %v661_v24 = vld [vmem:[%s8525_s18 + $0x970] sm:$0xff] }
 0x26e   : > { %5532 = vmatpush1.bf16.msra.mxu0 %v7033_v45  ;;  %v785_v54 = vld [vmem:[%s8525_s18 + $0xd50] sm:$0xff]  ;;  %v7210_v39 = vcombine.high %v657_v22, %v661_v24  ;;  %v7209_v36 = vcombine.low %v657_v22, %v661_v24 }
 0x26f   : > { %5583 = vmatprep.subr.bf16.mxu0 %v7170_v46  ;;  %v789_v26 = vld [vmem:[%s8525_s18 + $0xd70] sm:$0xff] }
 0x270   : > { %5573 = vmatpush1.bf16.msra.mxu1 %v7161_v20  ;;  %v7338_v29 = vcombine.high %v785_v54, %v789_v26  ;;  %v665_v31 = vld [vmem:[%s8525_s18 + $0x990] sm:$0xff]  ;;  %v7337_v38 = vcombine.low %v785_v54, %v789_v26 }
 0x271   : > { %5624 = vmatprep.subr.bf16.mxu1 %v7298_v47  ;;  %5534 = vmatmul.mubr.bf16.vlgmr.msra.gmra.mrb[24].mxu0 %v8628_v17  ;;  %v669_v32 = vld [vmem:[%s8525_s18 + $0x9b0] sm:$0xff] }
 0x272   : > { %5584 = vmatpush1.bf16.msra.mxu0 %v7169_v53  ;;  %5615 = vmatprep.mubr.bf16.mxu0 %v8646_v28  ;;  %v793_v33 = vld [vmem:[%s8525_s18 + $0xd90] sm:$0xff]  ;;  %v7218_v42 = vcombine.high %v665_v31, %v669_v32 }
 0x273   : > { %5575 = vmatmul.mubr.bf16.vlgmr.msra.gmra.mrb[24].mxu1 %v8637_v21  ;;  %5585 = vmatprep.subr.bf16.mxu0 %v7178_v57  ;;  %v797_v35 = vld [vmem:[%s8525_s18 + $0xdb0] sm:$0xff]  ;;  %v7217_v57 = vcombine.low %v665_v31, %v669_v32 }
 0x274   : > { %5625 = vmatpush1.bf16.msra.mxu1 %v7297_v56  ;;  %5656 = vmatprep.mubr.bf16.mxu1 %v8653_v30  ;;  %v7346_v45 = vcombine.high %v793_v33, %v797_v35  ;;  %v673_v20 = vld [vmem:[%s8525_s18 + $0x9d0] sm:$0xff]  ;;  %v7345_v63 = vcombine.low %v793_v33, %v797_v35 }
 0x275   : > { %5626 = vmatprep.subr.bf16.mxu1 %v7306_v58  ;;  %v677_v46 = vld [vmem:[%s8525_s18 + $0x9f0] sm:$0xff] }
 0x276   : > { %5586 = vmatpush1.bf16.msra.mxu0 %v7177_v1  ;;  %v801_v49 = vld [vmem:[%s8525_s18 + $0xdd0] sm:$0xff]  ;;  %v7226_v0 = vcombine.high %v673_v20, %v677_v46  ;;  %v7225_v9 = vcombine.low %v673_v20, %v677_v46 }
 0x277   : > { %5587 = vmatprep.subr.bf16.mxu0 %v7186_v3  ;;  %v805_v51 = vld [vmem:[%s8525_s18 + $0xdf0] sm:$0xff] }
 0x278   : > { %5627 = vmatpush1.bf16.msra.mxu1 %v7305_v2  ;;  %v7354_v2 = vcombine.high %v801_v49, %v805_v51  ;;  %v681_v3 = vld [vmem:[%s8525_s18 + $0xa10] sm:$0xff]  ;;  %v7353_v10 = vcombine.low %v801_v49, %v805_v51 }
 0x279   : > { %5628 = vmatprep.subr.bf16.mxu1 %v7314_v4  ;;  %v685_v4 = vld [vmem:[%s8525_s18 + $0xa30] sm:$0xff] }
 0x27a   : > { %5588 = vmatpush1.bf16.msra.mxu0 %v7185_v11  ;;  %v809_v6 = vld [vmem:[%s8525_s18 + $0xe10] sm:$0xff]  ;;  %v7234_v11 = vcombine.high %v681_v3, %v685_v4  ;;  %v7233_v15 = vcombine.low %v681_v3, %v685_v4 }
 0x27b   : > { %5589 = vmatprep.subr.bf16.mxu0 %v7194_v13  ;;  %v813_v7 = vld [vmem:[%s8525_s18 + $0xe30] sm:$0xff] }
 0x27c   : > { %5629 = vmatpush1.bf16.msra.mxu1 %v7313_v12  ;;  %v7362_v12 = vcombine.high %v809_v6, %v813_v7  ;;  %v689_v13 = vld [vmem:[%s8525_s18 + $0xa50] sm:$0xff]  ;;  %v7361_v43 = vcombine.low %v809_v6, %v813_v7 }
 0x27d   : > { %5630 = vmatprep.subr.bf16.mxu1 %v7322_v40  ;;  %v693_v40 = vld [vmem:[%s8525_s18 + $0xa70] sm:$0xff] }
 0x27e   : > { %5590 = vmatpush1.bf16.msra.mxu0 %v7193_v16  ;;  %v817_v25 = vld [vmem:[%s8525_s18 + $0xe50] sm:$0xff]  ;;  %v7242_v16 = vcombine.high %v689_v13, %v693_v40  ;;  %v7241_v54 = vcombine.low %v689_v13, %v693_v40 }
 0x27f   : > { %5591 = vmatprep.subr.bf16.mxu0 %v7202_v18  ;;  %v821_v14 = vld [vmem:[%s8525_s18 + $0xe70] sm:$0xff] }
 0x280   : > { %5631 = vmatpush1.bf16.msra.mxu1 %v7321_v55  ;;  %v7370_v55 = vcombine.high %v817_v25, %v821_v14  ;;  %v697_v18 = vld [vmem:[%s8525_s18 + $0xa90] sm:$0xff]  ;;  %v7369_v26 = vcombine.low %v817_v25, %v821_v14 }
 0x281   : > { %5632 = vmatprep.subr.bf16.mxu1 %v7330_v19  ;;  %v701_v19 = vld [vmem:[%s8525_s18 + $0xab0] sm:$0xff] }
 0x282   : > { %5592 = vmatpush1.bf16.msra.mxu0 %v7201_v34  ;;  %v825_v22 = vld [vmem:[%s8525_s18 + $0xe90] sm:$0xff]  ;;  %v7250_v34 = vcombine.high %v697_v18, %v701_v19  ;;  %v7249_v33 = vcombine.low %v697_v18, %v701_v19 }
 0x283   : > { %5593 = vmatprep.subr.bf16.mxu0 %v7210_v39  ;;  %v829_v24 = vld [vmem:[%s8525_s18 + $0xeb0] sm:$0xff] }
 0x284   : > { %5633 = vmatpush1.bf16.msra.mxu1 %v7329_v27  ;;  %v5289_v44 = vpop.f32.mrb[12].mxu0  ;;  %v7378_v27 = vcombine.high %v825_v22, %v829_v24  ;;  %v705_v39 = vld [vmem:[%s8525_s18 + $0xad0] sm:$0xff]  ;;  %v7377_v35 = vcombine.low %v825_v22, %v829_v24 }
 0x285   : > { %5634 = vmatprep.subr.bf16.mxu1 %v7338_v29  ;;  %v5291_v23 = vpop.f32.mrb[13].mxu0  ;;  %v709_v29 = vld [vmem:[%s8525_s18 + $0xaf0] sm:$0xff] }
 0x286   : > { %v5330_v47 = vpop.f32.mrb[12].mxu1  ;;  %v5293_v56 = vpop.f32.mrb[14].mxu0  ;;  %5594 = vmatpush1.bf16.msra.mxu0 %v7209_v36  ;;  %v833_v31 = vld [vmem:[%s8525_s18 + $0xed0] sm:$0xff]  ;;  %v7258_v36 = vcombine.high %v705_v39, %v709_v29  ;;  %v7257_v46 = vcombine.low %v705_v39, %v709_v29 }
 0x287   : > { %v9128_v52 = vadd.f32 %v5330_v47, %v5289_v44  ;;  %v5332_v53 = vpop.f32.mrb[13].mxu1  ;;  %v5294_v62 = vpop.f32.mrb[15].mxu0  ;;  %5595 = vmatprep.subr.bf16.mxu0 %v7218_v42  ;;  %v837_v32 = vld [vmem:[%s8525_s18 + $0xef0] sm:$0xff] }
 0x288   : > { %v9130_v58 = vadd.f32 %v5332_v53, %v5291_v23  ;;  %v5334_v61 = vpop.f32.mrb[14].mxu1  ;;  %5635 = vmatpush1.bf16.msra.mxu1 %v7337_v38  ;;  %v7386_v38 = vcombine.high %v833_v31, %v837_v32  ;;  %v713_v42 = vld [vmem:[%s8525_s18 + $0xb10] sm:$0xff]  ;;  %v7385_v47 = vcombine.low %v833_v31, %v837_v32 }
 0x289   : > { %v5335_v1 = vpop.f32.mrb[15].mxu1  ;;  %5636 = vmatprep.subr.bf16.mxu1 %v7346_v45  ;;  %v717_v44 = vld [vmem:[%s8525_s18 + $0xb30] sm:$0xff] }
 0x28a   : > { %5596 = vmatpush1.bf16.msra.mxu0 %v7217_v57  ;;  %v841_v45 = vld [vmem:[%s8525_s18 + $0xf10] sm:$0xff]  ;;  %v7266_v23 = vcombine.high %v713_v42, %v717_v44  ;;  %v7265_v61 = vcombine.low %v713_v42, %v717_v44 }
 0x28b   : > { %5597 = vmatprep.subr.bf16.mxu0 %v7226_v0  ;;  %v845_v20 = vld [vmem:[%s8525_s18 + $0xf30] sm:$0xff] }
 0x28c   : > { %5637 = vmatpush1.bf16.msra.mxu1 %v7345_v63  ;;  %v7394_v49 = vcombine.high %v841_v45, %v845_v20  ;;  %v721_v51 = vld [vmem:[%s8525_s18 + $0xb50] sm:$0xff]  ;;  %v7393_v62 = vcombine.low %v841_v45, %v845_v20 }
 0x28d   : > { %5638 = vmatprep.subr.bf16.mxu1 %v7354_v2  ;;  %v725_v53 = vld [vmem:[%s8525_s18 + $0xb70] sm:$0xff] }
 0x28e   : > { %5598 = vmatpush1.bf16.msra.mxu0 %v7225_v9  ;;  %v849_v56 = vld [vmem:[%s8525_s18 + $0xf50] sm:$0xff]  ;;  %v7274_v63 = vcombine.high %v721_v51, %v725_v53  ;;  %v7273_v6 = vcombine.low %v721_v51, %v725_v53 }
 0x28f   : > { %5599 = vmatprep.subr.bf16.mxu0 %v7234_v11  ;;  %v853_v57 = vld [vmem:[%s8525_s18 + $0xf70] sm:$0xff] }
 0x290   : > { %5639 = vmatpush1.bf16.msra.mxu1 %v7353_v10  ;;  %v7402_v0 = vcombine.high %v849_v56, %v853_v57  ;;  %v729_v1 = vld [vmem:[%s8525_s18 + $0xb90] sm:$0xff]  ;;  %v7401_v7 = vcombine.low %v849_v56, %v853_v57 }
 0x291   : > { %5640 = vmatprep.subr.bf16.mxu1 %v7362_v12  ;;  %v733_v2 = vld [vmem:[%s8525_s18 + $0xbb0] sm:$0xff] }
 0x292   : > { %5600 = vmatpush1.bf16.msra.mxu0 %v7233_v15  ;;  %v857_v3 = vld [vmem:[%s8525_s18 + $0xf90] sm:$0xff]  ;;  %v7282_v9 = vcombine.high %v729_v1, %v733_v2  ;;  %v7281_v25 = vcombine.low %v729_v1, %v733_v2 }
 0x293   : > { %5601 = vmatprep.subr.bf16.mxu0 %v7242_v16  ;;  %v861_v4 = vld [vmem:[%s8525_s18 + $0xfb0] sm:$0xff] }
 0x294   : > { %5641 = vmatpush1.bf16.msra.mxu1 %v7361_v43  ;;  %v7410_v10 = vcombine.high %v857_v3, %v861_v4  ;;  %v737_v11 = vld [vmem:[%s8525_s18 + $0xbd0] sm:$0xff]  ;;  %v7409_v14 = vcombine.low %v857_v3, %v861_v4 }
 0x295   : > { %5642 = vmatprep.subr.bf16.mxu1 %v7370_v55  ;;  %v741_v12 = vld [vmem:[%s8525_s18 + $0xbf0] sm:$0xff] }
 0x296   : > { %5602 = vmatpush1.bf16.msra.mxu0 %v7241_v54  ;;  %v865_v13 = vld [vmem:[%s8525_s18 + $0xfd0] sm:$0xff]  ;;  %v7290_v15 = vcombine.high %v737_v11, %v741_v12  ;;  %v7289_v22 = vcombine.low %v737_v11, %v741_v12 }
 0x297   : > { %5603 = vmatprep.subr.bf16.mxu0 %v7250_v34  ;;  %v869_v40 = vld [vmem:[%s8525_s18 + $0xff0] sm:$0xff] }
 0x298   : > { %5643 = vmatpush1.bf16.msra.mxu1 %v7369_v26  ;;  %v7418_v43 = vcombine.high %v865_v13, %v869_v40  ;;  %v873_v16 = vld [vmem:[%s8525_s18 + $0x1010] sm:$0xff]  ;;  %v7417_v24 = vcombine.low %v865_v13, %v869_v40 }
 0x299   : > { %5644 = vmatprep.subr.bf16.mxu1 %v7378_v27  ;;  %v877_v55 = vld [vmem:[%s8525_s18 + $0x1030] sm:$0xff] }
 0x29a   : > { %5604 = vmatpush1.bf16.msra.mxu0 %v7249_v33  ;;  %v1001_v18 = vld [vmem:[%s8525_s18 + $0x1410] sm:$0xff]  ;;  %v7426_v54 = vcombine.high %v873_v16, %v877_v55  ;;  %v7425_v31 = vcombine.low %v873_v16, %v877_v55 }
 0x29b   : > { %5605 = vmatprep.subr.bf16.mxu0 %v7258_v36  ;;  %v1005_v19 = vld [vmem:[%s8525_s18 + $0x1430] sm:$0xff] }
 0x29c   : > { %5645 = vmatpush1.bf16.msra.mxu1 %v7377_v35  ;;  %v7554_v26 = vcombine.high %v1001_v18, %v1005_v19  ;;  %v881_v34 = vld [vmem:[%s8525_s18 + $0x1050] sm:$0xff]  ;;  %v7553_v32 = vcombine.low %v1001_v18, %v1005_v19 }
 0x29d   : > { %5646 = vmatprep.subr.bf16.mxu1 %v7386_v38  ;;  %v885_v27 = vld [vmem:[%s8525_s18 + $0x1070] sm:$0xff] }
 0x29e   : > { %5606 = vmatpush1.bf16.msra.mxu0 %v7257_v46  ;;  %v1009_v39 = vld [vmem:[%s8525_s18 + $0x1450] sm:$0xff]  ;;  %v7434_v33 = vcombine.high %v881_v34, %v885_v27  ;;  %v7433_v45 = vcombine.low %v881_v34, %v885_v27 }
 0x29f   : > { %5607 = vmatprep.subr.bf16.mxu0 %v7266_v23  ;;  %v1013_v29 = vld [vmem:[%s8525_s18 + $0x1470] sm:$0xff] }
 0x2a0   : > { %5647 = vmatpush1.bf16.msra.mxu1 %v7385_v47  ;;  %v7562_v35 = vcombine.high %v1009_v39, %v1013_v29  ;;  %v889_v36 = vld [vmem:[%s8525_s18 + $0x1090] sm:$0xff]  ;;  %v7561_v20 = vcombine.low %v1009_v39, %v1013_v29 }
 0x2a1   : > { %5648 = vmatprep.subr.bf16.mxu1 %v7394_v49  ;;  %v893_v38 = vld [vmem:[%s8525_s18 + $0x10b0] sm:$0xff] }
 0x2a2   : > { %5608 = vmatpush1.bf16.msra.mxu0 %v7265_v61  ;;  %v1017_v42 = vld [vmem:[%s8525_s18 + $0x1490] sm:$0xff]  ;;  %v7442_v46 = vcombine.high %v889_v36, %v893_v38  ;;  %v7441_v56 = vcombine.low %v889_v36, %v893_v38 }
 0x2a3   : > { %5609 = vmatprep.subr.bf16.mxu0 %v7274_v63  ;;  %v1021_v44 = vld [vmem:[%s8525_s18 + $0x14b0] sm:$0xff] }
 0x2a4   : > { %5649 = vmatpush1.bf16.msra.mxu1 %v7393_v62  ;;  %v7570_v47 = vcombine.high %v1017_v42, %v1021_v44  ;;  %v897_v23 = vld [vmem:[%s8525_s18 + $0x10d0] sm:$0xff]  ;;  %v7569_v57 = vcombine.low %v1017_v42, %v1021_v44 }
 0x2a5   : > { %5650 = vmatprep.subr.bf16.mxu1 %v7402_v0  ;;  %v901_v49 = vld [vmem:[%s8525_s18 + $0x10f0] sm:$0xff] }
 0x2a6   : > { %5610 = vmatpush1.bf16.msra.mxu0 %v7273_v6  ;;  %v1025_v51 = vld [vmem:[%s8525_s18 + $0x14d0] sm:$0xff]  ;;  %v7450_v61 = vcombine.high %v897_v23, %v901_v49  ;;  %v7449_v3 = vcombine.low %v897_v23, %v901_v49 }
 0x2a7   : > { %5611 = vmatprep.subr.bf16.mxu0 %v7282_v9  ;;  %v1029_v53 = vld [vmem:[%s8525_s18 + $0x14f0] sm:$0xff] }
 0x2a8   : > { %5651 = vmatpush1.bf16.msra.mxu1 %v7401_v7  ;;  %v7578_v62 = vcombine.high %v1025_v51, %v1029_v53  ;;  %v905_v63 = vld [vmem:[%s8525_s18 + $0x1110] sm:$0xff]  ;;  %v7577_v4 = vcombine.low %v1025_v51, %v1029_v53 }
 0x2a9   : > { %5652 = vmatprep.subr.bf16.mxu1 %v7410_v10  ;;  %v909_v0 = vld [vmem:[%s8525_s18 + $0x1130] sm:$0xff] }
 0x2aa   : > { %5612 = vmatpush1.bf16.msra.mxu0 %v7281_v25  ;;  %v1033_v1 = vld [vmem:[%s8525_s18 + $0x1510] sm:$0xff]  ;;  %v7458_v6 = vcombine.high %v905_v63, %v909_v0  ;;  %v7457_v13 = vcombine.low %v905_v63, %v909_v0 }
 0x2ab   : > { %5613 = vmatprep.subr.bf16.mxu0 %v7290_v15  ;;  %v1037_v2 = vld [vmem:[%s8525_s18 + $0x1530] sm:$0xff] }
 0x2ac   : > { %5653 = vmatpush1.bf16.msra.mxu1 %v7409_v14  ;;  %v7586_v7 = vcombine.high %v1033_v1, %v1037_v2  ;;  %v913_v9 = vld [vmem:[%s8525_s18 + $0x1150] sm:$0xff]  ;;  %v7585_v40 = vcombine.low %v1033_v1, %v1037_v2 }
 0x2ad   : > { %5654 = vmatprep.subr.bf16.mxu1 %v7418_v43  ;;  %v917_v10 = vld [vmem:[%s8525_s18 + $0x1170] sm:$0xff] }
 0x2ae   : > { %5614 = vmatpush1.bf16.msra.mxu0 %v7289_v22  ;;  %v1041_v11 = vld [vmem:[%s8525_s18 + $0x1550] sm:$0xff]  ;;  %v7466_v25 = vcombine.high %v913_v9, %v917_v10  ;;  %v7465_v18 = vcombine.low %v913_v9, %v917_v10 }
 0x2af   : > { %5665 = vmatprep.subr.bf16.mxu0 %v7426_v54  ;;  %v1045_v12 = vld [vmem:[%s8525_s18 + $0x1570] sm:$0xff] }
 0x2b0   : > { %5655 = vmatpush1.bf16.msra.mxu1 %v7417_v24  ;;  %v7594_v14 = vcombine.high %v1041_v11, %v1045_v12  ;;  %v921_v15 = vld [vmem:[%s8525_s18 + $0x1190] sm:$0xff]  ;;  %v7593_v19 = vcombine.low %v1041_v11, %v1045_v12 }
 0x2b1   : > { %5706 = vmatprep.subr.bf16.mxu1 %v7554_v26  ;;  %5616 = vmatmul.mubr.bf16.vlgmr.msra.gmra.mrb[28].mxu0 %v8718_v37  ;;  %v925_v43 = vld [vmem:[%s8525_s18 + $0x11b0] sm:$0xff] }
 0x2b2   : > { %5666 = vmatpush1.bf16.msra.mxu0 %v7425_v31  ;;  %5697 = vmatprep.mubr.bf16.mxu0 %v8736_v48  ;;  %v1049_v16 = vld [vmem:[%s8525_s18 + $0x1590] sm:$0xff]  ;;  %v7474_v22 = vcombine.high %v921_v15, %v925_v43  ;;  %v7473_v38 = vcombine.low %v921_v15, %v925_v43 }
 0x2b3   : > { %5657 = vmatmul.mubr.bf16.vlgmr.msra.gmra.mrb[28].mxu1 %v8727_v41  ;;  %5667 = vmatprep.subr.bf16.mxu0 %v7434_v33  ;;  %v1053_v55 = vld [vmem:[%s8525_s18 + $0x15b0] sm:$0xff] }
 0x2b4   : > { %5707 = vmatpush1.bf16.msra.mxu1 %v7553_v32  ;;  %5738 = vmatprep.mubr.bf16.mxu1 %v8743_v50  ;;  %v7602_v54 = vcombine.high %v1049_v16, %v1053_v55  ;;  %v929_v26 = vld [vmem:[%s8525_s18 + $0x11d0] sm:$0xff] }
 0x2b5   : > { %5708 = vmatprep.subr.bf16.mxu1 %v7562_v35  ;;  %v933_v34 = vld [vmem:[%s8525_s18 + $0x11f0] sm:$0xff] }
 0x2b6   : > { %5668 = vmatpush1.bf16.msra.mxu0 %v7433_v45  ;;  %v1057_v31 = vld [vmem:[%s8525_s18 + $0x15d0] sm:$0xff] }
 0x2b7   : > { %5669 = vmatprep.subr.bf16.mxu0 %v7442_v46  ;;  %v1061_v32 = vld [vmem:[%s8525_s18 + $0x15f0] sm:$0xff] }
 0x2b8   : > { %5709 = vmatpush1.bf16.msra.mxu1 %v7561_v20  ;;  %v7482_v20 = vcombine.high %v929_v26, %v933_v34  ;;  %v937_v23 = vld [vmem:[%s8525_s18 + $0x1210] sm:$0xff] }
 0x2b9   : > { %5710 = vmatprep.subr.bf16.mxu1 %v7570_v47  ;;  %v7610_v47 = vcombine.high %v1057_v31, %v1061_v32  ;;  %v941_v49 = vld [vmem:[%s8525_s18 + $0x1230] sm:$0xff] }
 0x2ba   : > { %5670 = vmatpush1.bf16.msra.mxu0 %v7441_v56  ;;  %v1065_v51 = vld [vmem:[%s8525_s18 + $0x1610] sm:$0xff]  ;;  %v7481_v56 = vcombine.low %v929_v26, %v933_v34 }
 0x2bb   : > { %5671 = vmatprep.subr.bf16.mxu0 %v7450_v61  ;;  %v1069_v53 = vld [vmem:[%s8525_s18 + $0x1630] sm:$0xff]  ;;  %v7490_v61 = vcombine.high %v937_v23, %v941_v49 }
 0x2bc   : > { %5711 = vmatpush1.bf16.msra.mxu1 %v7569_v57  ;;  %v7609_v57 = vcombine.low %v1057_v31, %v1061_v32  ;;  %v945_v63 = vld [vmem:[%s8525_s18 + $0x1250] sm:$0xff] }
 0x2bd   : > { %5712 = vmatprep.subr.bf16.mxu1 %v7578_v62  ;;  %v7618_v62 = vcombine.high %v1065_v51, %v1069_v53  ;;  %v949_v0 = vld [vmem:[%s8525_s18 + $0x1270] sm:$0xff] }
 0x2be   : > { %5672 = vmatpush1.bf16.msra.mxu0 %v7449_v3  ;;  %v1073_v1 = vld [vmem:[%s8525_s18 + $0x1650] sm:$0xff]  ;;  %v7489_v3 = vcombine.low %v937_v23, %v941_v49 }
 0x2bf   : > { %5673 = vmatprep.subr.bf16.mxu0 %v7458_v6  ;;  %v1077_v2 = vld [vmem:[%s8525_s18 + $0x1670] sm:$0xff]  ;;  %v7498_v6 = vcombine.high %v945_v63, %v949_v0 }
 0x2c0   : > { %5713 = vmatpush1.bf16.msra.mxu1 %v7577_v4  ;;  %v7617_v4 = vcombine.low %v1065_v51, %v1069_v53  ;;  %v953_v9 = vld [vmem:[%s8525_s18 + $0x1290] sm:$0xff] }
 0x2c1   : > { %5714 = vmatprep.subr.bf16.mxu1 %v7586_v7  ;;  %v7626_v7 = vcombine.high %v1073_v1, %v1077_v2  ;;  %v957_v10 = vld [vmem:[%s8525_s18 + $0x12b0] sm:$0xff] }
 0x2c2   : > { %5674 = vmatpush1.bf16.msra.mxu0 %v7457_v13  ;;  %v1081_v11 = vld [vmem:[%s8525_s18 + $0x1690] sm:$0xff]  ;;  %v7497_v13 = vcombine.low %v945_v63, %v949_v0 }
 0x2c3   : > { %5675 = vmatprep.subr.bf16.mxu0 %v7466_v25  ;;  %v1085_v12 = vld [vmem:[%s8525_s18 + $0x16b0] sm:$0xff]  ;;  %v7506_v25 = vcombine.high %v953_v9, %v957_v10 }
 0x2c4   : > { %5715 = vmatpush1.bf16.msra.mxu1 %v7585_v40  ;;  %v5371_v24 = vpop.f32.mrb[16].mxu0  ;;  %v7625_v40 = vcombine.low %v1073_v1, %v1077_v2  ;;  %v961_v15 = vld [vmem:[%s8525_s18 + $0x12d0] sm:$0xff] }
 0x2c5   : > { %5716 = vmatprep.subr.bf16.mxu1 %v7594_v14  ;;  %v5372_v27 = vadd.f32 %v5371_v24, %v9128_v52  ;;  %v5373_v29 = vpop.f32.mrb[17].mxu0  ;;  %v7601_v52 = vcombine.low %v1049_v16, %v1053_v55  ;;  %v7634_v14 = vcombine.high %v1081_v11, %v1085_v12  ;;  %v965_v43 = vld [vmem:[%s8525_s18 + $0x12f0] sm:$0xff] }
 0x2c6   : > { %v5412_v39 = vpop.f32.mrb[16].mxu1  ;;  %v5374_v33 = vadd.f32 %v5373_v29, %v9130_v58  ;;  %v5375_v36 = vpop.f32.mrb[18].mxu0  ;;  %5676 = vmatpush1.bf16.msra.mxu0 %v7465_v18  ;;  %v1089_v16 = vld [vmem:[%s8525_s18 + $0x16d0] sm:$0xff]  ;;  %v7505_v18 = vcombine.low %v953_v9, %v957_v10  ;;  %v490_v9 = vld [vmem:[%s8525_s18 + $0x418] sm:$0xff] }
 0x2c7   : > { %v5414_v35 = vpop.f32.mrb[17].mxu1  ;;  %v9202_v42 = vadd.f32 %v5412_v39, %v5372_v27  ;;  %v5376_v45 = vpop.f32.mrb[19].mxu0  ;;  %5677 = vmatprep.subr.bf16.mxu0 %v7474_v22  ;;  %v1093_v55 = vld [vmem:[%s8525_s18 + $0x16f0] sm:$0xff]  ;;  %v7514_v22 = vcombine.high %v961_v15, %v965_v43  ;;  %v7513_v39 = vcombine.low %v961_v15, %v965_v43  ;;  %v494_v10 = vld [vmem:[%s8525_s18 + $0x438] sm:$0xff] }
 0x2c8   : > { %v5416_v44 = vpop.f32.mrb[18].mxu1  ;;  %5717 = vmatpush1.bf16.msra.mxu1 %v7593_v19  ;;  %v9204_v46 = vadd.f32 %v5414_v35, %v5374_v33  ;;  %v7633_v19 = vcombine.low %v1081_v11, %v1085_v12  ;;  %v7642_v24 = vcombine.high %v1089_v16, %v1093_v55  ;;  %v973_v26 = vld [vmem:[%s8525_s18 + $0x1330] sm:$0xff]  ;;  %v7641_v29 = vcombine.low %v1089_v16, %v1093_v55  ;;  %v498_v15 = vld [vmem:[%s8525_s18 + $0x458] sm:$0xff] }
 0x2c9   : > { %v5417_v58 = vpop.f32.mrb[19].mxu1  ;;  %5718 = vmatprep.subr.bf16.mxu1 %v7602_v54  ;;  %v969_v54 = vld [vmem:[%s8525_s18 + $0x1310] sm:$0xff]  ;;  %v502_v43 = vld [vmem:[%s8525_s18 + $0x478] sm:$0xff]  ;;  %v7043_v55 = vcombine.low %v490_v9, %v494_v10 }
 0x2ca   : > { %5678 = vmatpush1.bf16.msra.mxu0 %v7473_v38  ;;  %v1097_v34 = vld [vmem:[%s8525_s18 + $0x1710] sm:$0xff]  ;;  %v7522_v31 = vcombine.high %v969_v54, %v973_v26  ;;  %v7521_v44 = vcombine.low %v969_v54, %v973_v26  ;;  %v506_v54 = vld [vmem:[%s8525_s18 + $0x498] sm:$0xff] }
 0x2cb   : > { %5679 = vmatprep.subr.bf16.mxu0 %v7482_v20  ;;  %v1101_v27 = vld [vmem:[%s8525_s18 + $0x1730] sm:$0xff]  ;;  %v510_v26 = vld [vmem:[%s8525_s18 + $0x4b8] sm:$0xff] }
 0x2cc   : > { %5719 = vmatpush1.bf16.msra.mxu1 %v7601_v52  ;;  %v7650_v32 = vcombine.high %v1097_v34, %v1101_v27  ;;  %v977_v33 = vld [vmem:[%s8525_s18 + $0x1350] sm:$0xff]  ;;  %v7649_v45 = vcombine.low %v1097_v34, %v1101_v27  ;;  %v7051_v27 = vcombine.low %v498_v15, %v502_v43 }
 0x2cd   : > { %5720 = vmatprep.subr.bf16.mxu1 %v7610_v47  ;;  %v981_v35 = vld [vmem:[%s8525_s18 + $0x1370] sm:$0xff] }
 0x2ce   : > { %5680 = vmatpush1.bf16.msra.mxu0 %v7481_v56  ;;  %v1105_v36 = vld [vmem:[%s8525_s18 + $0x1750] sm:$0xff]  ;;  %v7530_v52 = vcombine.high %v977_v33, %v981_v35  ;;  %v7529_v51 = vcombine.low %v977_v33, %v981_v35  ;;  %v514_v33 = vld [vmem:[%s8525_s18 + $0x4d8] sm:$0xff] }
 0x2cf   : > { %5681 = vmatprep.subr.bf16.mxu0 %v7490_v61  ;;  %v1109_v38 = vld [vmem:[%s8525_s18 + $0x1770] sm:$0xff]  ;;  %v518_v35 = vld [vmem:[%s8525_s18 + $0x4f8] sm:$0xff] }
 0x2d0   : > { %5721 = vmatpush1.bf16.msra.mxu1 %v7609_v57  ;;  %v7658_v20 = vcombine.high %v1105_v36, %v1109_v38  ;;  %v985_v58 = vld [vmem:[%s8525_s18 + $0x1390] sm:$0xff]  ;;  %v7657_v53 = vcombine.low %v1105_v36, %v1109_v38  ;;  %v7059_v38 = vcombine.low %v506_v54, %v510_v26 }
 0x2d1   : > { %5722 = vmatprep.subr.bf16.mxu1 %v7618_v62  ;;  %v989_v47 = vld [vmem:[%s8525_s18 + $0x13b0] sm:$0xff] }
 0x2d2   : > { %5682 = vmatpush1.bf16.msra.mxu0 %v7489_v3  ;;  %v1113_v23 = vld [vmem:[%s8525_s18 + $0x1790] sm:$0xff]  ;;  %v7538_v56 = vcombine.high %v985_v58, %v989_v47  ;;  %v7537_v1 = vcombine.low %v985_v58, %v989_v47  ;;  %v522_v58 = vld [vmem:[%s8525_s18 + $0x518] sm:$0xff] }
 0x2d3   : > { %5683 = vmatprep.subr.bf16.mxu0 %v7498_v6  ;;  %v1117_v49 = vld [vmem:[%s8525_s18 + $0x17b0] sm:$0xff]  ;;  %v362_v6 = vld [vmem:[%s8525_s18 + $0x18] sm:$0xff] }
 0x2d4   : > { %5723 = vmatpush1.bf16.msra.mxu1 %v7617_v4  ;;  %v7666_v57 = vcombine.high %v1113_v23, %v1117_v49  ;;  %v993_v61 = vld [vmem:[%s8525_s18 + $0x13d0] sm:$0xff]  ;;  %v7665_v2 = vcombine.low %v1113_v23, %v1117_v49 }
 0x2d5   : > { %5724 = vmatprep.subr.bf16.mxu1 %v7626_v7  ;;  %v997_v62 = vld [vmem:[%s8525_s18 + $0x13f0] sm:$0xff]  ;;  %v366_v7 = vld [vmem:[%s8525_s18 + $0x38] sm:$0xff] }
 0x2d6   : > { %5684 = vmatpush1.bf16.msra.mxu0 %v7497_v13  ;;  %v1121_v63 = vld [vmem:[%s8525_s18 + $0x17d0] sm:$0xff]  ;;  %v7546_v3 = vcombine.high %v993_v61, %v997_v62  ;;  %v7545_v11 = vcombine.low %v993_v61, %v997_v62  ;;  %v6916_v13 = vcombine.high %v362_v6, %v366_v7  ;;  %v6915_v16 = vcombine.low %v362_v6, %v366_v7 }
 0x2d7   : > { %5685 = vmatprep.subr.bf16.mxu0 %v7506_v25  ;;  %v1125_v0 = vld [vmem:[%s8525_s18 + $0x17f0] sm:$0xff]  ;;  %v370_v25 = vld [vmem:[%s8525_s18 + $0x58] sm:$0xff] }
 0x2d8   : > { %5725 = vmatpush1.bf16.msra.mxu1 %v7625_v40  ;;  %v7674_v4 = vcombine.high %v1121_v63, %v1125_v0  ;;  %v7673_v12 = vcombine.low %v1121_v63, %v1125_v0  ;;  %v7044_v40 = vcombine.high %v490_v9, %v494_v10 }
 0x2d9   : > { %5726 = vmatprep.subr.bf16.mxu1 %v7634_v14  ;;  %v374_v14 = vld [vmem:[%s8525_s18 + $0x78] sm:$0xff] }
 0x2da   : > { %5686 = vmatpush1.bf16.msra.mxu0 %v7505_v18  ;;  %v6924_v18 = vcombine.high %v370_v25, %v374_v14  ;;  %v6923_v34 = vcombine.low %v370_v25, %v374_v14 }
 0x2db   : > { %5687 = vmatprep.subr.bf16.mxu0 %v7514_v22  ;;  %v378_v22 = vld [vmem:[%s8525_s18 + $0x98] sm:$0xff] }
 0x2dc   : > { %5727 = vmatpush1.bf16.msra.mxu1 %v7633_v19  ;;  %v7052_v19 = vcombine.high %v498_v15, %v502_v43  ;;  %v546_v15 = vld [vmem:[%s8525_s18 + $0x5d8] sm:$0xff] }
 0x2dd   : > { %5728 = vmatprep.subr.bf16.mxu1 %v7642_v24  ;;  %v382_v24 = vld [vmem:[%s8525_s18 + $0xb8] sm:$0xff] }
 0x2de   : > { %5688 = vmatpush1.bf16.msra.mxu0 %v7513_v39  ;;  %v6932_v39 = vcombine.high %v378_v22, %v382_v24  ;;  %v6931_v36 = vcombine.low %v378_v22, %v382_v24  ;;  %v550_v43 = vld [vmem:[%s8525_s18 + $0x5f8] sm:$0xff] }
 0x2df   : > { %5689 = vmatprep.subr.bf16.mxu0 %v7522_v31  ;;  %v386_v31 = vld [vmem:[%s8525_s18 + $0xd8] sm:$0xff] }
 0x2e0   : > { %5729 = vmatpush1.bf16.msra.mxu1 %v7641_v29  ;;  %v7060_v29 = vcombine.high %v506_v54, %v510_v26  ;;  %v348_v54 = vld [vmem:[#allocation2 + $0x18] sm:$0xff] }
 0x2e1   : > { %5730 = vmatprep.subr.bf16.mxu1 %v7650_v32  ;;  %v390_v32 = vld [vmem:[%s8525_s18 + $0xf8] sm:$0xff] }
 0x2e2   : > { %5690 = vmatpush1.bf16.msra.mxu0 %v7521_v44  ;;  %v6940_v44 = vcombine.high %v386_v31, %v390_v32  ;;  %v6939_v47 = vcombine.low %v386_v31, %v390_v32  ;;  %v426_v31 = vld [vmem:[%s8525_s18 + $0x218] sm:$0xff] }
 0x2e3   : > { %5691 = vmatprep.subr.bf16.mxu0 %v7530_v52  ;;  %v394_v52 = vld [vmem:[%s8525_s18 + $0x118] sm:$0xff] }
 0x2e4   : > { %5731 = vmatpush1.bf16.msra.mxu1 %v7649_v45  ;;  %v7068_v45 = vcombine.high %v514_v33, %v518_v35  ;;  %v430_v32 = vld [vmem:[%s8525_s18 + $0x238] sm:$0xff] }
 0x2e5   : > { %5732 = vmatprep.subr.bf16.mxu1 %v7658_v20  ;;  %v398_v20 = vld [vmem:[%s8525_s18 + $0x138] sm:$0xff] }
 0x2e6   : > { %5692 = vmatpush1.bf16.msra.mxu0 %v7529_v51  ;;  %v6948_v23 = vcombine.high %v394_v52, %v398_v20  ;;  %v402_v51 = vld [vmem:[%s8525_s18 + $0x158] sm:$0xff]  ;;  %v6947_v61 = vcombine.low %v394_v52, %v398_v20  ;;  %v6980_v52 = vcombine.high %v426_v31, %v430_v32 }
 0x2e7   : > { %5693 = vmatprep.subr.bf16.mxu0 %v7538_v56  ;;  %v530_v56 = vld [vmem:[%s8525_s18 + $0x558] sm:$0xff] }
 0x2e8   : > { %5733 = vmatpush1.bf16.msra.mxu1 %v7657_v53  ;;  %v406_v53 = vld [vmem:[%s8525_s18 + $0x178] sm:$0xff] }
 0x2e9   : > { %5734 = vmatprep.subr.bf16.mxu1 %v7666_v57  ;;  %v534_v57 = vld [vmem:[%s8525_s18 + $0x578] sm:$0xff]  ;;  %v6956_v63 = vcombine.high %v402_v51, %v406_v53  ;;  %v6955_v6 = vcombine.low %v402_v51, %v406_v53 }
 0x2ea   : > { %5694 = vmatpush1.bf16.msra.mxu0 %v7537_v1  ;;  %v7084_v0 = vcombine.high %v530_v56, %v534_v57  ;;  %v410_v1 = vld [vmem:[%s8525_s18 + $0x198] sm:$0xff]  ;;  %v7083_v7 = vcombine.low %v530_v56, %v534_v57 }
 0x2eb   : > { %5695 = vmatprep.subr.bf16.mxu0 %v7546_v3  ;;  %v538_v3 = vld [vmem:[%s8525_s18 + $0x598] sm:$0xff] }
 0x2ec   : > { %5735 = vmatpush1.bf16.msra.mxu1 %v7665_v2  ;;  %v414_v2 = vld [vmem:[%s8525_s18 + $0x1b8] sm:$0xff] }
 0x2ed   : > { %5736 = vmatprep.subr.bf16.mxu1 %v7674_v4  ;;  %v542_v4 = vld [vmem:[%s8525_s18 + $0x5b8] sm:$0xff]  ;;  %v6964_v9 = vcombine.high %v410_v1, %v414_v2  ;;  %v6963_v22 = vcombine.low %v410_v1, %v414_v2 }
 0x2ee   : > { %5696 = vmatpush1.bf16.msra.mxu0 %v7545_v11  ;;  %v7092_v11 = vcombine.high %v538_v3, %v542_v4  ;;  %v442_v56 = vld [vmem:[%s8525_s18 + $0x298] sm:$0xff] }
 0x2ef   : > { %5747 = vmatprep.subr.bf16.mxu0 %v6916_v13  ;;  %v422_v13 = vld [vmem:[%s8525_s18 + $0x1f8] sm:$0xff] }
 0x2f0   : > { %5737 = vmatpush1.bf16.msra.mxu1 %v7673_v12  ;;  %v418_v12 = vld [vmem:[%s8525_s18 + $0x1d8] sm:$0xff] }
 0x2f1   : > { %5788 = vmatprep.subr.bf16.mxu1 %v7044_v40  ;;  %5698 = vmatmul.mubr.bf16.vlgmr.msra.gmra.mrb[32].mxu0 %v8808_v5  ;;  %v446_v57 = vld [vmem:[%s8525_s18 + $0x2b8] sm:$0xff] }
 0x2f2   : > { %5748 = vmatpush1.bf16.msra.mxu0 %v6915_v16  ;;  %5779 = vmatprep.mubr.bf16.mxu0 %v8578_v59  ;;  %v526_v59 = vld [vmem:[%s8525_s18 + $0x538] sm:$0xff]  ;;  %v347_v16 = vld [vmem:[#allocation2 + $0x10] sm:$0xff]  ;;  %v6996_v1 = vcombine.high %v442_v56, %v446_v57 }
 0x2f3   : > { %5739 = vmatmul.mubr.bf16.vlgmr.msra.gmra.mrb[32].mxu1 %v8814_v8  ;;  %5749 = vmatprep.subr.bf16.mxu0 %v6924_v18  ;;  %v7076_v49 = vcombine.high %v522_v58, %v526_v59  ;;  %v7075_v62 = vcombine.low %v522_v58, %v526_v59  ;;  %v434_v58 = vld [vmem:[%s8525_s18 + $0x258] sm:$0xff] }
 0x2f4   : > { %5789 = vmatpush1.bf16.msra.mxu1 %v7043_v55  ;;  %5820 = vmatprep.mubr.bf16.mxu1 %v8582_v60  ;;  %v7067_v60 = vcombine.low %v514_v33, %v518_v35  ;;  %v554_v35 = vld [vmem:[%s8525_s18 + $0x618] sm:$0xff] }
 0x2f5   : > { %5790 = vmatprep.subr.bf16.mxu1 %v7052_v19  ;;  %v438_v59 = vld [vmem:[%s8525_s18 + $0x278] sm:$0xff] }
 0x2f6   : > { %5750 = vmatpush1.bf16.msra.mxu0 %v6923_v34  ;;  %v7091_v34 = vcombine.low %v538_v3, %v542_v4  ;;  %v6988_v51 = vcombine.high %v434_v58, %v438_v59  ;;  %v450_v3 = vld [vmem:[%s8525_s18 + $0x2d8] sm:$0xff] }
 0x2f7   : > { %5751 = vmatprep.subr.bf16.mxu0 %v6932_v39  ;;  %v454_v4 = vld [vmem:[%s8525_s18 + $0x2f8] sm:$0xff] }
 0x2f8   : > { %5791 = vmatpush1.bf16.msra.mxu1 %v7051_v27  ;;  %v6972_v27 = vcombine.high %v418_v12, %v422_v13 }
 0x2f9   : > { %5792 = vmatprep.subr.bf16.mxu1 %v7060_v29 }
 0x2fa   : > { %5752 = vmatpush1.bf16.msra.mxu0 %v6931_v36  ;;  %v558_v36 = vld [vmem:[%s8525_s18 + $0x638] sm:$0xff] }
 0x2fb   : > { %5753 = vmatprep.subr.bf16.mxu0 %v6940_v44  ;;  %v6971_v44 = vcombine.low %v418_v12, %v422_v13  ;;  %v7108_v20 = vcombine.high %v554_v35, %v558_v36  ;;  %v458_v13 = vld [vmem:[%s8525_s18 + $0x318] sm:$0xff] }
 0x2fc   : > { %5793 = vmatpush1.bf16.msra.mxu1 %v7059_v38 }
 0x2fd   : > { %5794 = vmatprep.subr.bf16.mxu1 %v7068_v45  ;;  %v7099_v45 = vcombine.low %v546_v15, %v550_v43 }
 0x2fe   : > { %5754 = vmatpush1.bf16.msra.mxu0 %v6939_v47  ;;  %v562_v47 = vld [vmem:[%s8525_s18 + $0x658] sm:$0xff] }
 0x2ff   : > { %5755 = vmatprep.subr.bf16.mxu0 %v6948_v23  ;;  %v6979_v23 = vcombine.low %v426_v31, %v430_v32 }
 0x300   : > { %5795 = vmatpush1.bf16.msra.mxu1 %v7067_v60  ;;  %v566_v60 = vld [vmem:[%s8525_s18 + $0x678] sm:$0xff] }
 0x301   : > { %5796 = vmatprep.subr.bf16.mxu1 %v7076_v49  ;;  %v7107_v49 = vcombine.low %v554_v35, %v558_v36  ;;  %v7116_v53 = vcombine.high %v562_v47, %v566_v60  ;;  %v482_v36 = vld [vmem:[%s8525_s18 + $0x3d8] sm:$0xff] }
 0x302   : > { %5756 = vmatpush1.bf16.msra.mxu0 %v6947_v61  ;;  %v570_v61 = vld [vmem:[%s8525_s18 + $0x698] sm:$0xff] }
 0x303   : > { %5757 = vmatprep.subr.bf16.mxu0 %v6956_v63  ;;  %v6987_v63 = vcombine.low %v434_v58, %v438_v59 }
 0x304   : > { %5797 = vmatpush1.bf16.msra.mxu1 %v7075_v62  ;;  %v5453_v10 = vpop.f32.mrb[20].mxu0  ;;  %v574_v62 = vld [vmem:[%s8525_s18 + $0x6b8] sm:$0xff] }
 0x305   : > { %5798 = vmatprep.subr.bf16.mxu1 %v7084_v0  ;;  %v5454_v40 = vadd.f32 %v5453_v10, %v9202_v42  ;;  %v5455_v14 = vpop.f32.mrb[21].mxu0  ;;  %v7115_v0 = vcombine.low %v562_v47, %v566_v60  ;;  %v7124_v2 = vcombine.high %v570_v61, %v574_v62  ;;  %v7123_v10 = vcombine.low %v570_v61, %v574_v62  ;;  %v618_v47 = vld [vmem:[%s8525_s18 + $0x818] sm:$0xff] }
 0x306   : > { %v5494_v25 = vpop.f32.mrb[20].mxu1  ;;  %v5456_v55 = vadd.f32 %v5455_v14, %v9204_v46  ;;  %v5457_v19 = vpop.f32.mrb[22].mxu0  ;;  %5758 = vmatpush1.bf16.msra.mxu0 %v6955_v6  ;;  %v7100_v46 = vcombine.high %v546_v15, %v550_v43  ;;  %v578_v6 = vld [vmem:[%s8525_s18 + $0x6d8] sm:$0xff]  ;;  %v7003_v15 = vcombine.low %v450_v3, %v454_v4 }
 0x307   : > { %v5496_v18 = vpop.f32.mrb[21].mxu1  ;;  %v5495_v24 = vadd.f32 %v5494_v25, %v5454_v40  ;;  %v5458_v42 = vpop.f32.mrb[23].mxu0  ;;  %5759 = vmatprep.subr.bf16.mxu0 %v6964_v9  ;;  %v6995_v9 = vcombine.low %v442_v56, %v446_v57  ;;  %v462_v40 = vld [vmem:[%s8525_s18 + $0x338] sm:$0xff] }
 0x308   : > { %v5498_v26 = vpop.f32.mrb[22].mxu1  ;;  %5799 = vmatpush1.bf16.msra.mxu1 %v7083_v7  ;;  %v5497_v39 = vadd.f32 %v5496_v18, %v5456_v55  ;;  %v582_v7 = vld [vmem:[%s8525_s18 + $0x6f8] sm:$0xff] }
 0x309   : > { %v5499_v29 = vpop.f32.mrb[23].mxu1  ;;  %5800 = vmatprep.subr.bf16.mxu1 %v7092_v11  ;;  %v5995_v33 = vadd.f32 %v5495_v24, %v347_v16  ;;  %v7004_v11 = vcombine.high %v450_v3, %v454_v4  ;;  %v7132_v12 = vcombine.high %v578_v6, %v582_v7  ;;  %v586_v25 = vld [vmem:[%s8525_s18 + $0x718] sm:$0xff]  ;;  %v7131_v43 = vcombine.low %v578_v6, %v582_v7 }
 0x30a   : > { %v5996_v38 = vadd.f32 %v5497_v39, %v348_v54  ;;  %5760 = vmatpush1.bf16.msra.mxu0 %v6963_v22  ;;  %v590_v14 = vld [vmem:[%s8525_s18 + $0x738] sm:$0xff]  ;;  %v7012_v16 = vcombine.high %v458_v13, %v462_v40  ;;  %v7011_v54 = vcombine.low %v458_v13, %v462_v40 }
 0x30b   : > { %6003 = vst [vmem:[#allocation2 + $0x10] sm:$0xff] %v5995_v33  ;;  %5761 = vmatprep.subr.bf16.mxu0 %v6972_v27  ;;  %v7140_v55 = vcombine.high %v586_v25, %v590_v14  ;;  %v466_v18 = vld [vmem:[%s8525_s18 + $0x358] sm:$0xff]  ;;  %v7139_v26 = vcombine.low %v586_v25, %v590_v14 }
 0x30c   : > { %5801 = vmatpush1.bf16.msra.mxu1 %v7091_v34  ;;  %6004 = vst [vmem:[#allocation2 + $0x18] sm:$0xff] %v5996_v38  ;;  %v470_v19 = vld [vmem:[%s8525_s18 + $0x378] sm:$0xff] }
 0x30d   : > { %5802 = vmatprep.subr.bf16.mxu1 %v7100_v46  ;;  %v594_v22 = vld [vmem:[%s8525_s18 + $0x758] sm:$0xff]  ;;  %v7020_v42 = vcombine.high %v466_v18, %v470_v19  ;;  %v7019_v31 = vcombine.low %v466_v18, %v470_v19 }
 0x30e   : > { %5762 = vmatpush1.bf16.msra.mxu0 %v6971_v44  ;;  %v598_v24 = vld [vmem:[%s8525_s18 + $0x778] sm:$0xff] }
 0x30f   : > { %5763 = vmatprep.subr.bf16.mxu0 %v6980_v52  ;;  %v7148_v34 = vcombine.high %v594_v22, %v598_v24  ;;  %v474_v27 = vld [vmem:[%s8525_s18 + $0x398] sm:$0xff]  ;;  %v7147_v32 = vcombine.low %v594_v22, %v598_v24 }
 0x310   : > { %5803 = vmatpush1.bf16.msra.mxu1 %v7099_v45  ;;  %v478_v39 = vld [vmem:[%s8525_s18 + $0x3b8] sm:$0xff] }
 0x311   : > { %5804 = vmatprep.subr.bf16.mxu1 %v7108_v20  ;;  %v602_v29 = vld [vmem:[%s8525_s18 + $0x798] sm:$0xff]  ;;  %v7028_v33 = vcombine.high %v474_v27, %v478_v39  ;;  %v7027_v52 = vcombine.low %v474_v27, %v478_v39 }
 0x312   : > { %5764 = vmatpush1.bf16.msra.mxu0 %v6979_v23  ;;  %v606_v46 = vld [vmem:[%s8525_s18 + $0x7b8] sm:$0xff] }
 0x313   : > { %5765 = vmatprep.subr.bf16.mxu0 %v6988_v51  ;;  %v7156_v35 = vcombine.high %v602_v29, %v606_v46  ;;  %v486_v38 = vld [vmem:[%s8525_s18 + $0x3f8] sm:$0xff]  ;;  %v7155_v20 = vcombine.low %v602_v29, %v606_v46 }
 0x314   : > { %5805 = vmatpush1.bf16.msra.mxu1 %v7107_v49  ;;  %v610_v44 = vld [vmem:[%s8525_s18 + $0x7d8] sm:$0xff]  ;;  %v7036_v58 = vcombine.high %v482_v36, %v486_v38  ;;  %v7035_v51 = vcombine.low %v482_v36, %v486_v38 }
 0x315   : > { %5806 = vmatprep.subr.bf16.mxu1 %v7116_v53  ;;  %v614_v45 = vld [vmem:[%s8525_s18 + $0x7f8] sm:$0xff] }
 0x316   : > { %5766 = vmatpush1.bf16.msra.mxu0 %v6987_v63  ;;  %v7164_v59 = vcombine.high %v610_v44, %v614_v45  ;;  %v622_v60 = vld [vmem:[%s8525_s18 + $0x838] sm:$0xff]  ;;  %v7163_v53 = vcombine.low %v610_v44, %v614_v45 }
 0x317   : > { %5767 = vmatprep.subr.bf16.mxu0 %v6996_v1  ;;  %v746_v23 = vld [vmem:[%s8525_s18 + $0xc18] sm:$0xff]  ;;  %v7172_v56 = vcombine.high %v618_v47, %v622_v60  ;;  %v7171_v1 = vcombine.low %v618_v47, %v622_v60 }
 0x318   : > { %5807 = vmatpush1.bf16.msra.mxu1 %v7115_v0  ;;  %v750_v49 = vld [vmem:[%s8525_s18 + $0xc38] sm:$0xff] }
 0x319   : > { %5808 = vmatprep.subr.bf16.mxu1 %v7124_v2  ;;  %v7300_v57 = vcombine.high %v746_v23, %v750_v49  ;;  %v626_v61 = vld [vmem:[%s8525_s18 + $0x858] sm:$0xff]  ;;  %v7299_v2 = vcombine.low %v746_v23, %v750_v49 }
 0x31a   : > { %5768 = vmatpush1.bf16.msra.mxu0 %v6995_v9  ;;  %v630_v62 = vld [vmem:[%s8525_s18 + $0x878] sm:$0xff] }
 0x31b   : > { %5769 = vmatprep.subr.bf16.mxu0 %v7004_v11  ;;  %v754_v63 = vld [vmem:[%s8525_s18 + $0xc58] sm:$0xff]  ;;  %v7180_v3 = vcombine.high %v626_v61, %v630_v62  ;;  %v7179_v11 = vcombine.low %v626_v61, %v630_v62 }
 0x31c   : > { %5809 = vmatpush1.bf16.msra.mxu1 %v7123_v10  ;;  %v758_v0 = vld [vmem:[%s8525_s18 + $0xc78] sm:$0xff] }
 0x31d   : > { %5810 = vmatprep.subr.bf16.mxu1 %v7132_v12  ;;  %v7308_v4 = vcombine.high %v754_v63, %v758_v0  ;;  %v634_v6 = vld [vmem:[%s8525_s18 + $0x898] sm:$0xff]  ;;  %v7307_v12 = vcombine.low %v754_v63, %v758_v0 }
 0x31e   : > { %5770 = vmatpush1.bf16.msra.mxu0 %v7003_v15  ;;  %v638_v7 = vld [vmem:[%s8525_s18 + $0x8b8] sm:$0xff] }
 0x31f   : > { %5771 = vmatprep.subr.bf16.mxu0 %v7012_v16  ;;  %v762_v9 = vld [vmem:[%s8525_s18 + $0xc98] sm:$0xff]  ;;  %v7188_v13 = vcombine.high %v634_v6, %v638_v7 }
 0x320   : > { %5811 = vmatpush1.bf16.msra.mxu1 %v7131_v43  ;;  %v766_v10 = vld [vmem:[%s8525_s18 + $0xcb8] sm:$0xff] }
 0x321   : > { %5812 = vmatprep.subr.bf16.mxu1 %v7140_v55  ;;  %v7316_v40 = vcombine.high %v762_v9, %v766_v10  ;;  %v642_v25 = vld [vmem:[%s8525_s18 + $0x8d8] sm:$0xff]  ;;  %v7315_v43 = vcombine.low %v762_v9, %v766_v10 }
 0x322   : > { %5772 = vmatpush1.bf16.msra.mxu0 %v7011_v54  ;;  %v646_v14 = vld [vmem:[%s8525_s18 + $0x8f8] sm:$0xff] }
 0x323   : > { %5773 = vmatprep.subr.bf16.mxu0 %v7020_v42  ;;  %v774_v15 = vld [vmem:[%s8525_s18 + $0xcf8] sm:$0xff]  ;;  %v7196_v16 = vcombine.high %v642_v25, %v646_v14  ;;  %v7195_v24 = vcombine.low %v642_v25, %v646_v14 }
 0x324   : > { %5813 = vmatpush1.bf16.msra.mxu1 %v7139_v26  ;;  %v650_v18 = vld [vmem:[%s8525_s18 + $0x918] sm:$0xff] }
 0x325   : > { %5814 = vmatprep.subr.bf16.mxu1 %v7148_v34  ;;  %v654_v19 = vld [vmem:[%s8525_s18 + $0x938] sm:$0xff] }
 0x326   : > { %5774 = vmatpush1.bf16.msra.mxu0 %v7019_v31  ;;  %v778_v22 = vld [vmem:[%s8525_s18 + $0xd18] sm:$0xff]  ;;  %v7204_v54 = vcombine.high %v650_v18, %v654_v19  ;;  %v7203_v29 = vcombine.low %v650_v18, %v654_v19 }
 0x327   : > { %5775 = vmatprep.subr.bf16.mxu0 %v7028_v33  ;;  %v658_v42 = vld [vmem:[%s8525_s18 + $0x958] sm:$0xff] }
 0x328   : > { %5815 = vmatpush1.bf16.msra.mxu1 %v7147_v32  ;;  %v662_v34 = vld [vmem:[%s8525_s18 + $0x978] sm:$0xff] }
 0x329   : > { %5816 = vmatprep.subr.bf16.mxu1 %v7156_v35  ;;  %v786_v27 = vld [vmem:[%s8525_s18 + $0xd58] sm:$0xff]  ;;  %v7212_v31 = vcombine.high %v658_v42, %v662_v34  ;;  %v7211_v44 = vcombine.low %v658_v42, %v662_v34 }
 0x32a   : > { %5776 = vmatpush1.bf16.msra.mxu0 %v7027_v52  ;;  %v790_v39 = vld [vmem:[%s8525_s18 + $0xd78] sm:$0xff] }
 0x32b   : > { %5777 = vmatprep.subr.bf16.mxu0 %v7036_v58  ;;  %v7340_v32 = vcombine.high %v786_v27, %v790_v39  ;;  %v666_v33 = vld [vmem:[%s8525_s18 + $0x998] sm:$0xff]  ;;  %v7339_v45 = vcombine.low %v786_v27, %v790_v39 }
 0x32c   : > { %5817 = vmatpush1.bf16.msra.mxu1 %v7155_v20  ;;  %v670_v35 = vld [vmem:[%s8525_s18 + $0x9b8] sm:$0xff] }
 0x32d   : > { %5818 = vmatprep.subr.bf16.mxu1 %v7164_v59  ;;  %v794_v36 = vld [vmem:[%s8525_s18 + $0xd98] sm:$0xff]  ;;  %v7220_v52 = vcombine.high %v666_v33, %v670_v35  ;;  %v7219_v61 = vcombine.low %v666_v33, %v670_v35 }
 0x32e   : > { %5778 = vmatpush1.bf16.msra.mxu0 %v7035_v51  ;;  %v798_v38 = vld [vmem:[%s8525_s18 + $0xdb8] sm:$0xff] }
 0x32f   : > { %5829 = vmatprep.subr.bf16.mxu0 %v7172_v56  ;;  %v7348_v58 = vcombine.high %v794_v36, %v798_v38  ;;  %v674_v59 = vld [vmem:[%s8525_s18 + $0x9d8] sm:$0xff] }
 0x330   : > { %5819 = vmatpush1.bf16.msra.mxu1 %v7163_v53  ;;  %v678_v47 = vld [vmem:[%s8525_s18 + $0x9f8] sm:$0xff] }
 0x331   : > { %5870 = vmatprep.subr.bf16.mxu1 %v7300_v57  ;;  %5780 = vmatmul.mubr.bf16.vlgmr.msra.gmra.mrb[36].mxu0 %v8628_v17  ;;  %v770_v17 = vld [vmem:[%s8525_s18 + $0xcd8] sm:$0xff] }
 0x332   : > { %5830 = vmatpush1.bf16.msra.mxu0 %v7171_v1  ;;  %5861 = vmatprep.mubr.bf16.mxu0 %v8646_v28  ;;  %v7324_v55 = vcombine.high %v770_v17, %v774_v15  ;;  %v782_v28 = vld [vmem:[%s8525_s18 + $0xd38] sm:$0xff]  ;;  %v7347_v1 = vcombine.low %v794_v36, %v798_v38 }
 0x333   : > { %5821 = vmatmul.mubr.bf16.vlgmr.msra.gmra.mrb[36].mxu1 %v8637_v21  ;;  %5831 = vmatprep.subr.bf16.mxu0 %v7180_v3  ;;  %v7187_v21 = vcombine.low %v634_v6, %v638_v7  ;;  %v7332_v26 = vcombine.high %v778_v22, %v782_v28  ;;  %v7331_v46 = vcombine.low %v778_v22, %v782_v28  ;;  %v802_v49 = vld [vmem:[%s8525_s18 + $0xdd8] sm:$0xff] }
 0x334   : > { %5871 = vmatpush1.bf16.msra.mxu1 %v7299_v2  ;;  %5902 = vmatprep.mubr.bf16.mxu1 %v8653_v30  ;;  %v7323_v30 = vcombine.low %v770_v17, %v774_v15  ;;  %v806_v51 = vld [vmem:[%s8525_s18 + $0xdf8] sm:$0xff]  ;;  %v7228_v2 = vcombine.high %v674_v59, %v678_v47 }
 0x335   : > { %5872 = vmatprep.subr.bf16.mxu1 %v7308_v4  ;;  %v7356_v4 = vcombine.high %v802_v49, %v806_v51  ;;  %v682_v6 = vld [vmem:[%s8525_s18 + $0xa18] sm:$0xff] }
 0x336   : > { %5832 = vmatpush1.bf16.msra.mxu0 %v7179_v11  ;;  %v686_v7 = vld [vmem:[%s8525_s18 + $0xa38] sm:$0xff]  ;;  %v7227_v11 = vcombine.low %v674_v59, %v678_v47 }
 0x337   : > { %5833 = vmatprep.subr.bf16.mxu0 %v7188_v13  ;;  %v810_v9 = vld [vmem:[%s8525_s18 + $0xe18] sm:$0xff]  ;;  %v7236_v13 = vcombine.high %v682_v6, %v686_v7 }
 0x338   : > { %5873 = vmatpush1.bf16.msra.mxu1 %v7307_v12  ;;  %v814_v10 = vld [vmem:[%s8525_s18 + $0xe38] sm:$0xff]  ;;  %v7355_v12 = vcombine.low %v802_v49, %v806_v51 }
 0x339   : > { %5874 = vmatprep.subr.bf16.mxu1 %v7316_v40  ;;  %v7364_v40 = vcombine.high %v810_v9, %v814_v10  ;;  %v690_v25 = vld [vmem:[%s8525_s18 + $0xa58] sm:$0xff] }
 0x33a   : > { %5834 = vmatpush1.bf16.msra.mxu0 %v7187_v21  ;;  %v694_v14 = vld [vmem:[%s8525_s18 + $0xa78] sm:$0xff]  ;;  %v7235_v21 = vcombine.low %v682_v6, %v686_v7 }
 0x33b   : > { %5835 = vmatprep.subr.bf16.mxu0 %v7196_v16  ;;  %v818_v17 = vld [vmem:[%s8525_s18 + $0xe58] sm:$0xff]  ;;  %v7244_v16 = vcombine.high %v690_v25, %v694_v14 }
 0x33c   : > { %5875 = vmatpush1.bf16.msra.mxu1 %v7315_v43  ;;  %v822_v15 = vld [vmem:[%s8525_s18 + $0xe78] sm:$0xff]  ;;  %v7363_v43 = vcombine.low %v810_v9, %v814_v10 }
 0x33d   : > { %5876 = vmatprep.subr.bf16.mxu1 %v7324_v55  ;;  %v7372_v55 = vcombine.high %v818_v17, %v822_v15  ;;  %v698_v18 = vld [vmem:[%s8525_s18 + $0xa98] sm:$0xff] }
 0x33e   : > { %5836 = vmatpush1.bf16.msra.mxu0 %v7195_v24  ;;  %v702_v19 = vld [vmem:[%s8525_s18 + $0xab8] sm:$0xff]  ;;  %v7243_v24 = vcombine.low %v690_v25, %v694_v14 }
 0x33f   : > { %5837 = vmatprep.subr.bf16.mxu0 %v7204_v54  ;;  %v826_v22 = vld [vmem:[%s8525_s18 + $0xe98] sm:$0xff]  ;;  %v7252_v54 = vcombine.high %v698_v18, %v702_v19 }
 0x340   : > { %5877 = vmatpush1.bf16.msra.mxu1 %v7323_v30  ;;  %v830_v28 = vld [vmem:[%s8525_s18 + $0xeb8] sm:$0xff]  ;;  %v7371_v30 = vcombine.low %v818_v17, %v822_v15 }
 0x341   : > { %5878 = vmatprep.subr.bf16.mxu1 %v7332_v26  ;;  %v7380_v26 = vcombine.high %v826_v22, %v830_v28  ;;  %v706_v42 = vld [vmem:[%s8525_s18 + $0xad8] sm:$0xff] }
 0x342   : > { %5838 = vmatpush1.bf16.msra.mxu0 %v7203_v29  ;;  %v710_v34 = vld [vmem:[%s8525_s18 + $0xaf8] sm:$0xff]  ;;  %v7251_v29 = vcombine.low %v698_v18, %v702_v19 }
 0x343   : > { %5839 = vmatprep.subr.bf16.mxu0 %v7212_v31  ;;  %v834_v27 = vld [vmem:[%s8525_s18 + $0xed8] sm:$0xff]  ;;  %v7260_v31 = vcombine.high %v706_v42, %v710_v34 }
 0x344   : > { %5879 = vmatpush1.bf16.msra.mxu1 %v7331_v46  ;;  %v5535_v20 = vpop.f32.mrb[24].mxu0  ;;  %v838_v39 = vld [vmem:[%s8525_s18 + $0xef8] sm:$0xff]  ;;  %v7379_v46 = vcombine.low %v826_v22, %v830_v28 }
 0x345   : > { %5880 = vmatprep.subr.bf16.mxu1 %v7340_v32  ;;  %v5537_v23 = vpop.f32.mrb[25].mxu0  ;;  %v7388_v32 = vcombine.high %v834_v27, %v838_v39  ;;  %v714_v33 = vld [vmem:[%s8525_s18 + $0xb18] sm:$0xff] }
 0x346   : > { %v5576_v60 = vpop.f32.mrb[24].mxu1  ;;  %v5539_v57 = vpop.f32.mrb[26].mxu0  ;;  %5840 = vmatpush1.bf16.msra.mxu0 %v7211_v44  ;;  %v718_v35 = vld [vmem:[%s8525_s18 + $0xb38] sm:$0xff]  ;;  %v7259_v44 = vcombine.low %v706_v42, %v710_v34 }
 0x347   : > { %v9344_v53 = vadd.f32 %v5576_v60, %v5535_v20  ;;  %v5578_v56 = vpop.f32.mrb[25].mxu1  ;;  %v5540_v0 = vpop.f32.mrb[27].mxu0  ;;  %5841 = vmatprep.subr.bf16.mxu0 %v7220_v52  ;;  %v842_v36 = vld [vmem:[%s8525_s18 + $0xf18] sm:$0xff]  ;;  %v7268_v52 = vcombine.high %v714_v33, %v718_v35 }
 0x348   : > { %v9346_v62 = vadd.f32 %v5578_v56, %v5537_v23  ;;  %v5580_v63 = vpop.f32.mrb[26].mxu1  ;;  %5881 = vmatpush1.bf16.msra.mxu1 %v7339_v45  ;;  %v846_v38 = vld [vmem:[%s8525_s18 + $0xf38] sm:$0xff]  ;;  %v7387_v45 = vcombine.low %v834_v27, %v838_v39  ;;  %v7267_v23 = vcombine.low %v714_v33, %v718_v35 }
 0x349   : > { %v5581_v3 = vpop.f32.mrb[27].mxu1  ;;  %5882 = vmatprep.subr.bf16.mxu1 %v7348_v58  ;;  %v7396_v20 = vcombine.high %v842_v36, %v846_v38  ;;  %v722_v58 = vld [vmem:[%s8525_s18 + $0xb58] sm:$0xff]  ;;  %v7395_v49 = vcombine.low %v842_v36, %v846_v38 }
 0x34a   : > { %5842 = vmatpush1.bf16.msra.mxu0 %v7219_v61  ;;  %v726_v59 = vld [vmem:[%s8525_s18 + $0xb78] sm:$0xff] }
 0x34b   : > { %5843 = vmatprep.subr.bf16.mxu0 %v7228_v2  ;;  %v850_v47 = vld [vmem:[%s8525_s18 + $0xf58] sm:$0xff]  ;;  %v7276_v51 = vcombine.high %v722_v58, %v726_v59 }
 0x34c   : > { %5883 = vmatpush1.bf16.msra.mxu1 %v7347_v1  ;;  %v854_v60 = vld [vmem:[%s8525_s18 + $0xf78] sm:$0xff]  ;;  %v7275_v1 = vcombine.low %v722_v58, %v726_v59 }
 0x34d   : > { %5884 = vmatprep.subr.bf16.mxu1 %v7356_v4  ;;  %v7404_v56 = vcombine.high %v850_v47, %v854_v60  ;;  %v730_v57 = vld [vmem:[%s8525_s18 + $0xb98] sm:$0xff]  ;;  %v7403_v2 = vcombine.low %v850_v47, %v854_v60 }
 0x34e   : > { %5844 = vmatpush1.bf16.msra.mxu0 %v7227_v11  ;;  %v734_v61 = vld [vmem:[%s8525_s18 + $0xbb8] sm:$0xff] }
 0x34f   : > { %5845 = vmatprep.subr.bf16.mxu0 %v7236_v13  ;;  %v858_v63 = vld [vmem:[%s8525_s18 + $0xf98] sm:$0xff]  ;;  %v7284_v3 = vcombine.high %v730_v57, %v734_v61  ;;  %v7283_v11 = vcombine.low %v730_v57, %v734_v61 }
 0x350   : > { %5885 = vmatpush1.bf16.msra.mxu1 %v7355_v12  ;;  %v862_v0 = vld [vmem:[%s8525_s18 + $0xfb8] sm:$0xff] }
 0x351   : > { %5886 = vmatprep.subr.bf16.mxu1 %v7364_v40  ;;  %v7412_v4 = vcombine.high %v858_v63, %v862_v0  ;;  %v738_v6 = vld [vmem:[%s8525_s18 + $0xbd8] sm:$0xff]  ;;  %v7411_v12 = vcombine.low %v858_v63, %v862_v0 }
 0x352   : > { %5846 = vmatpush1.bf16.msra.mxu0 %v7235_v21  ;;  %v742_v7 = vld [vmem:[%s8525_s18 + $0xbf8] sm:$0xff] }
 0x353   : > { %5847 = vmatprep.subr.bf16.mxu0 %v7244_v16  ;;  %v866_v9 = vld [vmem:[%s8525_s18 + $0xfd8] sm:$0xff]  ;;  %v7292_v13 = vcombine.high %v738_v6, %v742_v7  ;;  %v7291_v21 = vcombine.low %v738_v6, %v742_v7 }
 0x354   : > { %5887 = vmatpush1.bf16.msra.mxu1 %v7363_v43  ;;  %v870_v10 = vld [vmem:[%s8525_s18 + $0xff8] sm:$0xff] }
 0x355   : > { %5888 = vmatprep.subr.bf16.mxu1 %v7372_v55  ;;  %v7420_v40 = vcombine.high %v866_v9, %v870_v10  ;;  %v874_v25 = vld [vmem:[%s8525_s18 + $0x1018] sm:$0xff]  ;;  %v7419_v43 = vcombine.low %v866_v9, %v870_v10 }
 0x356   : > { %5848 = vmatpush1.bf16.msra.mxu0 %v7243_v24  ;;  %v878_v14 = vld [vmem:[%s8525_s18 + $0x1038] sm:$0xff] }
 0x357   : > { %5849 = vmatprep.subr.bf16.mxu0 %v7252_v54  ;;  %v1002_v17 = vld [vmem:[%s8525_s18 + $0x1418] sm:$0xff]  ;;  %v7428_v16 = vcombine.high %v874_v25, %v878_v14  ;;  %v7427_v24 = vcombine.low %v874_v25, %v878_v14 }
 0x358   : > { %5889 = vmatpush1.bf16.msra.mxu1 %v7371_v30  ;;  %v1006_v15 = vld [vmem:[%s8525_s18 + $0x1438] sm:$0xff] }
 0x359   : > { %5890 = vmatprep.subr.bf16.mxu1 %v7380_v26  ;;  %v7556_v55 = vcombine.high %v1002_v17, %v1006_v15  ;;  %v882_v18 = vld [vmem:[%s8525_s18 + $0x1058] sm:$0xff]  ;;  %v7555_v30 = vcombine.low %v1002_v17, %v1006_v15 }
 0x35a   : > { %5850 = vmatpush1.bf16.msra.mxu0 %v7251_v29  ;;  %v886_v19 = vld [vmem:[%s8525_s18 + $0x1078] sm:$0xff] }
 0x35b   : > { %5851 = vmatprep.subr.bf16.mxu0 %v7260_v31  ;;  %v1010_v22 = vld [vmem:[%s8525_s18 + $0x1458] sm:$0xff]  ;;  %v7436_v54 = vcombine.high %v882_v18, %v886_v19  ;;  %v7435_v29 = vcombine.low %v882_v18, %v886_v19 }
 0x35c   : > { %5891 = vmatpush1.bf16.msra.mxu1 %v7379_v46  ;;  %v1014_v28 = vld [vmem:[%s8525_s18 + $0x1478] sm:$0xff] }
 0x35d   : > { %5892 = vmatprep.subr.bf16.mxu1 %v7388_v32  ;;  %v7564_v26 = vcombine.high %v1010_v22, %v1014_v28  ;;  %v890_v42 = vld [vmem:[%s8525_s18 + $0x1098] sm:$0xff]  ;;  %v7563_v46 = vcombine.low %v1010_v22, %v1014_v28 }
 0x35e   : > { %5852 = vmatpush1.bf16.msra.mxu0 %v7259_v44  ;;  %v894_v34 = vld [vmem:[%s8525_s18 + $0x10b8] sm:$0xff] }
 0x35f   : > { %5853 = vmatprep.subr.bf16.mxu0 %v7268_v52  ;;  %v1018_v27 = vld [vmem:[%s8525_s18 + $0x1498] sm:$0xff]  ;;  %v7444_v31 = vcombine.high %v890_v42, %v894_v34 }
 0x360   : > { %5893 = vmatpush1.bf16.msra.mxu1 %v7387_v45  ;;  %v1022_v39 = vld [vmem:[%s8525_s18 + $0x14b8] sm:$0xff] }
 0x361   : > { %5894 = vmatprep.subr.bf16.mxu1 %v7396_v20  ;;  %v7572_v32 = vcombine.high %v1018_v27, %v1022_v39  ;;  %v898_v33 = vld [vmem:[%s8525_s18 + $0x10d8] sm:$0xff]  ;;  %v7571_v38 = vcombine.low %v1018_v27, %v1022_v39 }
 0x362   : > { %5854 = vmatpush1.bf16.msra.mxu0 %v7267_v23  ;;  %v902_v35 = vld [vmem:[%s8525_s18 + $0x10f8] sm:$0xff] }
 0x363   : > { %5855 = vmatprep.subr.bf16.mxu0 %v7276_v51  ;;  %v1030_v36 = vld [vmem:[%s8525_s18 + $0x14f8] sm:$0xff]  ;;  %v7452_v44 = vcombine.high %v898_v33, %v902_v35  ;;  %v7451_v59 = vcombine.low %v898_v33, %v902_v35 }
 0x364   : > { %5895 = vmatpush1.bf16.msra.mxu1 %v7395_v49  ;;  %v906_v52 = vld [vmem:[%s8525_s18 + $0x1118] sm:$0xff] }
 0x365   : > { %5896 = vmatprep.subr.bf16.mxu1 %v7404_v56  ;;  %v910_v20 = vld [vmem:[%s8525_s18 + $0x1138] sm:$0xff] }
 0x366   : > { %5856 = vmatpush1.bf16.msra.mxu0 %v7275_v1  ;;  %v1034_v58 = vld [vmem:[%s8525_s18 + $0x1518] sm:$0xff]  ;;  %v7460_v47 = vcombine.high %v906_v52, %v910_v20  ;;  %v7459_v57 = vcombine.low %v906_v52, %v910_v20 }
 0x367   : > { %5857 = vmatprep.subr.bf16.mxu0 %v7284_v3  ;;  %v914_v23 = vld [vmem:[%s8525_s18 + $0x1158] sm:$0xff] }
 0x368   : > { %5897 = vmatpush1.bf16.msra.mxu1 %v7403_v2  ;;  %v918_v49 = vld [vmem:[%s8525_s18 + $0x1178] sm:$0xff] }
 0x369   : > { %5898 = vmatprep.subr.bf16.mxu1 %v7412_v4  ;;  %v1042_v51 = vld [vmem:[%s8525_s18 + $0x1558] sm:$0xff]  ;;  %v7468_v63 = vcombine.high %v914_v23, %v918_v49  ;;  %v7467_v6 = vcombine.low %v914_v23, %v918_v49 }
 0x36a   : > { %5858 = vmatpush1.bf16.msra.mxu0 %v7283_v11  ;;  %v1046_v56 = vld [vmem:[%s8525_s18 + $0x1578] sm:$0xff] }
 0x36b   : > { %5859 = vmatprep.subr.bf16.mxu0 %v7292_v13  ;;  %v7596_v0 = vcombine.high %v1042_v51, %v1046_v56  ;;  %v922_v1 = vld [vmem:[%s8525_s18 + $0x1198] sm:$0xff]  ;;  %v7595_v7 = vcombine.low %v1042_v51, %v1046_v56 }
 0x36c   : > { %5899 = vmatpush1.bf16.msra.mxu1 %v7411_v12  ;;  %v926_v2 = vld [vmem:[%s8525_s18 + $0x11b8] sm:$0xff] }
 0x36d   : > { %5900 = vmatprep.subr.bf16.mxu1 %v7420_v40  ;;  %v1050_v3 = vld [vmem:[%s8525_s18 + $0x1598] sm:$0xff]  ;;  %v7476_v9 = vcombine.high %v922_v1, %v926_v2 }
 0x36e   : > { %5860 = vmatpush1.bf16.msra.mxu0 %v7291_v21  ;;  %v1054_v4 = vld [vmem:[%s8525_s18 + $0x15b8] sm:$0xff] }
 0x36f   : > { %5911 = vmatprep.subr.bf16.mxu0 %v7428_v16  ;;  %v7604_v11 = vcombine.high %v1050_v3, %v1054_v4  ;;  %v930_v12 = vld [vmem:[%s8525_s18 + $0x11d8] sm:$0xff] }
 0x370   : > { %5901 = vmatpush1.bf16.msra.mxu1 %v7419_v43  ;;  %v934_v13 = vld [vmem:[%s8525_s18 + $0x11f8] sm:$0xff] }
 0x371   : > { %5952 = vmatprep.subr.bf16.mxu1 %v7556_v55  ;;  %5862 = vmatmul.mubr.bf16.vlgmr.msra.gmra.mrb[40].mxu0 %v8718_v37  ;;  %v1026_v37 = vld [vmem:[%s8525_s18 + $0x14d8] sm:$0xff]  ;;  %v7475_v55 = vcombine.low %v922_v1, %v926_v2  ;;  %v7484_v28 = vcombine.high %v930_v12, %v934_v13  ;;  %v7483_v27 = vcombine.low %v930_v12, %v934_v13 }
 0x372   : > { %5912 = vmatpush1.bf16.msra.mxu0 %v7427_v24  ;;  %5943 = vmatprep.mubr.bf16.mxu0 %v8736_v48  ;;  %v7580_v45 = vcombine.high %v1026_v37, %v1030_v36  ;;  %v1038_v48 = vld [vmem:[%s8525_s18 + $0x1538] sm:$0xff] }
 0x373   : > { %5903 = vmatmul.mubr.bf16.vlgmr.msra.gmra.mrb[40].mxu1 %v8727_v41  ;;  %5913 = vmatprep.subr.bf16.mxu0 %v7436_v54  ;;  %v7443_v41 = vcombine.low %v890_v42, %v894_v34  ;;  %v7588_v60 = vcombine.high %v1034_v58, %v1038_v48  ;;  %v7587_v61 = vcombine.low %v1034_v58, %v1038_v48  ;;  %v1058_v17 = vld [vmem:[%s8525_s18 + $0x15d8] sm:$0xff] }
 0x374   : > { %5953 = vmatpush1.bf16.msra.mxu1 %v7555_v30  ;;  %5984 = vmatprep.mubr.bf16.mxu1 %v8743_v50  ;;  %v7579_v50 = vcombine.low %v1026_v37, %v1030_v36  ;;  %v1062_v15 = vld [vmem:[%s8525_s18 + $0x15f8] sm:$0xff] }
 0x375   : > { %5954 = vmatprep.subr.bf16.mxu1 %v7564_v26  ;;  %v7612_v30 = vcombine.high %v1058_v17, %v1062_v15  ;;  %v938_v54 = vld [vmem:[%s8525_s18 + $0x1218] sm:$0xff]  ;;  %v7611_v39 = vcombine.low %v1058_v17, %v1062_v15 }
 0x376   : > { %5914 = vmatpush1.bf16.msra.mxu0 %v7435_v29  ;;  %v942_v26 = vld [vmem:[%s8525_s18 + $0x1238] sm:$0xff] }
 0x377   : > { %5915 = vmatprep.subr.bf16.mxu0 %v7444_v31  ;;  %v1066_v42 = vld [vmem:[%s8525_s18 + $0x1618] sm:$0xff]  ;;  %v7492_v29 = vcombine.high %v938_v54, %v942_v26  ;;  %v7491_v37 = vcombine.low %v938_v54, %v942_v26 }
 0x378   : > { %5955 = vmatpush1.bf16.msra.mxu1 %v7563_v46  ;;  %v1070_v34 = vld [vmem:[%s8525_s18 + $0x1638] sm:$0xff] }
 0x379   : > { %5956 = vmatprep.subr.bf16.mxu1 %v7572_v32  ;;  %v7620_v46 = vcombine.high %v1066_v42, %v1070_v34  ;;  %v946_v31 = vld [vmem:[%s8525_s18 + $0x1258] sm:$0xff]  ;;  %v7619_v36 = vcombine.low %v1066_v42, %v1070_v34 }
 0x37a   : > { %5916 = vmatpush1.bf16.msra.mxu0 %v7443_v41  ;;  %v950_v32 = vld [vmem:[%s8525_s18 + $0x1278] sm:$0xff] }
 0x37b   : > { %5917 = vmatprep.subr.bf16.mxu0 %v7452_v44  ;;  %v1074_v33 = vld [vmem:[%s8525_s18 + $0x1658] sm:$0xff]  ;;  %v7500_v41 = vcombine.high %v946_v31, %v950_v32  ;;  %v7499_v58 = vcombine.low %v946_v31, %v950_v32 }
 0x37c   : > { %5957 = vmatpush1.bf16.msra.mxu1 %v7571_v38  ;;  %v1078_v35 = vld [vmem:[%s8525_s18 + $0x1678] sm:$0xff] }
 0x37d   : > { %5958 = vmatprep.subr.bf16.mxu1 %v7580_v45  ;;  %v7628_v38 = vcombine.high %v1074_v33, %v1078_v35  ;;  %v954_v44 = vld [vmem:[%s8525_s18 + $0x1298] sm:$0xff]  ;;  %v7627_v48 = vcombine.low %v1074_v33, %v1078_v35  ;;  %v349_v33 = vld [vmem:[#allocation2 + $0x20] sm:$0xff] }
 0x37e   : > { %5918 = vmatpush1.bf16.msra.mxu0 %v7451_v59  ;;  %v958_v45 = vld [vmem:[%s8525_s18 + $0x12b8] sm:$0xff] }
 0x37f   : > { %5919 = vmatprep.subr.bf16.mxu0 %v7460_v47  ;;  %v1082_v52 = vld [vmem:[%s8525_s18 + $0x1698] sm:$0xff]  ;;  %v7508_v59 = vcombine.high %v954_v44, %v958_v45  ;;  %v7507_v51 = vcombine.low %v954_v44, %v958_v45 }
 0x380   : > { %5959 = vmatpush1.bf16.msra.mxu1 %v7579_v50  ;;  %v1086_v20 = vld [vmem:[%s8525_s18 + $0x16b8] sm:$0xff] }
 0x381   : > { %5960 = vmatprep.subr.bf16.mxu1 %v7588_v60  ;;  %v7636_v50 = vcombine.high %v1082_v52, %v1086_v20  ;;  %v962_v47 = vld [vmem:[%s8525_s18 + $0x12d8] sm:$0xff]  ;;  %v7635_v56 = vcombine.low %v1082_v52, %v1086_v20 }
 0x382   : > { %5920 = vmatpush1.bf16.msra.mxu0 %v7459_v57  ;;  %v966_v60 = vld [vmem:[%s8525_s18 + $0x12f8] sm:$0xff] }
 0x383   : > { %5921 = vmatprep.subr.bf16.mxu0 %v7468_v63  ;;  %v1090_v23 = vld [vmem:[%s8525_s18 + $0x16d8] sm:$0xff]  ;;  %v7516_v57 = vcombine.high %v962_v47, %v966_v60 }
 0x384   : > { %5961 = vmatpush1.bf16.msra.mxu1 %v7587_v61  ;;  %v5617_v10 = vpop.f32.mrb[28].mxu0  ;;  %v1094_v49 = vld [vmem:[%s8525_s18 + $0x16f8] sm:$0xff] }
 0x385   : > { %5962 = vmatprep.subr.bf16.mxu1 %v7596_v0  ;;  %v5618_v40 = vadd.f32 %v5617_v10, %v9344_v53  ;;  %v5619_v14 = vpop.f32.mrb[29].mxu0  ;;  %v7603_v53 = vcombine.low %v1050_v3, %v1054_v4  ;;  %v7644_v61 = vcombine.high %v1090_v23, %v1094_v49  ;;  %v970_v63 = vld [vmem:[%s8525_s18 + $0x1318] sm:$0xff]  ;;  %v7515_v3 = vcombine.low %v962_v47, %v966_v60 }
 0x386   : > { %v5658_v25 = vpop.f32.mrb[28].mxu1  ;;  %v5620_v21 = vadd.f32 %v5619_v14, %v9346_v62  ;;  %v5621_v16 = vpop.f32.mrb[30].mxu0  ;;  %5922 = vmatpush1.bf16.msra.mxu0 %v7467_v6  ;;  %v974_v0 = vld [vmem:[%s8525_s18 + $0x1338] sm:$0xff]  ;;  %v7643_v4 = vcombine.low %v1090_v23, %v1094_v49 }
 0x387   : > { %v5660_v43 = vpop.f32.mrb[29].mxu1  ;;  %v9418_v18 = vadd.f32 %v5658_v25, %v5618_v40  ;;  %v5622_v22 = vpop.f32.mrb[31].mxu0  ;;  %5923 = vmatprep.subr.bf16.mxu0 %v7476_v9  ;;  %v1098_v1 = vld [vmem:[%s8525_s18 + $0x1718] sm:$0xff]  ;;  %v7524_v6 = vcombine.high %v970_v63, %v974_v0  ;;  %v7523_v13 = vcombine.low %v970_v63, %v974_v0 }
 0x388   : > { %v5662_v19 = vpop.f32.mrb[30].mxu1  ;;  %5963 = vmatpush1.bf16.msra.mxu1 %v7595_v7  ;;  %v9420_v24 = vadd.f32 %v5660_v43, %v5620_v21  ;;  %v1102_v2 = vld [vmem:[%s8525_s18 + $0x1738] sm:$0xff] }
 0x389   : > { %v5663_v62 = vpop.f32.mrb[31].mxu1  ;;  %5964 = vmatprep.subr.bf16.mxu1 %v7604_v11  ;;  %v7652_v7 = vcombine.high %v1098_v1, %v1102_v2  ;;  %v978_v9 = vld [vmem:[%s8525_s18 + $0x1358] sm:$0xff]  ;;  %v7651_v40 = vcombine.low %v1098_v1, %v1102_v2 }
 0x38a   : > { %5924 = vmatpush1.bf16.msra.mxu0 %v7475_v55  ;;  %v982_v10 = vld [vmem:[%s8525_s18 + $0x1378] sm:$0xff] }
 0x38b   : > { %5925 = vmatprep.subr.bf16.mxu0 %v7484_v28  ;;  %v1106_v11 = vld [vmem:[%s8525_s18 + $0x1758] sm:$0xff]  ;;  %v7532_v25 = vcombine.high %v978_v9, %v982_v10  ;;  %v7531_v16 = vcombine.low %v978_v9, %v982_v10 }
 0x38c   : > { %5965 = vmatpush1.bf16.msra.mxu1 %v7603_v53  ;;  %v1110_v12 = vld [vmem:[%s8525_s18 + $0x1778] sm:$0xff] }
 0x38d   : > { %5966 = vmatprep.subr.bf16.mxu1 %v7612_v30  ;;  %v7660_v14 = vcombine.high %v1106_v11, %v1110_v12  ;;  %v986_v17 = vld [vmem:[%s8525_s18 + $0x1398] sm:$0xff]  ;;  %v7659_v55 = vcombine.low %v1106_v11, %v1110_v12 }
 0x38e   : > { %5926 = vmatpush1.bf16.msra.mxu0 %v7483_v27  ;;  %v990_v15 = vld [vmem:[%s8525_s18 + $0x13b8] sm:$0xff] }
 0x38f   : > { %5927 = vmatprep.subr.bf16.mxu0 %v7492_v29  ;;  %v1114_v21 = vld [vmem:[%s8525_s18 + $0x1798] sm:$0xff]  ;;  %v7540_v19 = vcombine.high %v986_v17, %v990_v15  ;;  %v7539_v54 = vcombine.low %v986_v17, %v990_v15 }
 0x390   : > { %5967 = vmatpush1.bf16.msra.mxu1 %v7611_v39  ;;  %v1118_v43 = vld [vmem:[%s8525_s18 + $0x17b8] sm:$0xff] }
 0x391   : > { %5968 = vmatprep.subr.bf16.mxu1 %v7620_v46  ;;  %v7668_v22 = vcombine.high %v1114_v21, %v1118_v43  ;;  %v994_v53 = vld [vmem:[%s8525_s18 + $0x13d8] sm:$0xff]  ;;  %v7667_v26 = vcombine.low %v1114_v21, %v1118_v43 }
 0x392   : > { %5928 = vmatpush1.bf16.msra.mxu0 %v7491_v37  ;;  %v998_v28 = vld [vmem:[%s8525_s18 + $0x13f8] sm:$0xff] }
 0x393   : > { %5929 = vmatprep.subr.bf16.mxu0 %v7500_v41  ;;  %v1122_v62 = vld [vmem:[%s8525_s18 + $0x17d8] sm:$0xff]  ;;  %v7548_v42 = vcombine.high %v994_v53, %v998_v28  ;;  %v7547_v27 = vcombine.low %v994_v53, %v998_v28  ;;  %v7958_v53 = vld [vmem:[#allocation9 + $0x40] sm:$0xff] (!%p7677_p13)  }
 0x394   : > { %5969 = vmatpush1.bf16.msra.mxu1 %v7619_v36  ;;  %v1126_v30 = vld [vmem:[%s8525_s18 + $0x17f8] sm:$0xff]  ;;  %v7959_v28 = vld [vmem:[#allocation9 + $0xc0] sm:$0xff] (!%p7677_p13)  }
 0x395   : > { %5970 = vmatprep.subr.bf16.mxu1 %v7628_v38  ;;  %v7676_v34 = vcombine.high %v1122_v62, %v1126_v30  ;;  %v7675_v39 = vcombine.low %v1122_v62, %v1126_v30  ;;  %v350_v38 = vld [vmem:[#allocation2 + $0x28] sm:$0xff]  ;;  %v352_v15 = vld [vmem:[#allocation2 + $0x38] sm:$0xff] }
 0x396   : > { %5930 = vmatpush1.bf16.msra.mxu0 %v7499_v58  ;;  %v7960_v62 = vld [vmem:[#allocation9] sm:$0xff] (!%p7677_p13)  }
 0x397   : > { %5931 = vmatprep.subr.bf16.mxu0 %v7508_v59  ;;  %v7961_v30 = vld [vmem:[#allocation9 + $0x80] sm:$0xff] (!%p7677_p13)  }
 0x398   : > { %5971 = vmatpush1.bf16.msra.mxu1 %v7627_v48 }
 0x399   : > { %5972 = vmatprep.subr.bf16.mxu1 %v7636_v50 }
 0x39a   : > { %5932 = vmatpush1.bf16.msra.mxu0 %v7507_v51 }
 0x39b   : > { %5933 = vmatprep.subr.bf16.mxu0 %v7516_v57 }
 0x39c   : > { %5973 = vmatpush1.bf16.msra.mxu1 %v7635_v56 }
 0x39d   : > { %5974 = vmatprep.subr.bf16.mxu1 %v7644_v61 }
 0x39e   : > { %5934 = vmatpush1.bf16.msra.mxu0 %v7515_v3 }
 0x39f   : > { %5935 = vmatprep.subr.bf16.mxu0 %v7524_v6 }
 0x3a0   : > { %5975 = vmatpush1.bf16.msra.mxu1 %v7643_v4 }
 0x3a1   : > { %5976 = vmatprep.subr.bf16.mxu1 %v7652_v7 }
 0x3a2   : > { %5936 = vmatpush1.bf16.msra.mxu0 %v7523_v13  ;;  %v351_v13 = vld [vmem:[#allocation2 + $0x30] sm:$0xff] }
 0x3a3   : > { %5937 = vmatprep.subr.bf16.mxu0 %v7532_v25 }
 0x3a4   : > { %5977 = vmatpush1.bf16.msra.mxu1 %v7651_v40 }
 0x3a5   : > { %5978 = vmatprep.subr.bf16.mxu1 %v7660_v14 }
 0x3a6   : > { %5938 = vmatpush1.bf16.msra.mxu0 %v7531_v16 }
 0x3a7   : > { %5939 = vmatprep.subr.bf16.mxu0 %v7540_v19 }
 0x3a8   : > { %5979 = vmatpush1.bf16.msra.mxu1 %v7659_v55 }
 0x3a9   : > { %5980 = vmatprep.subr.bf16.mxu1 %v7668_v22 }
 0x3aa   : > { %5940 = vmatpush1.bf16.msra.mxu0 %v7539_v54  ;;  %v7962_v54 = vld [vmem:[#allocation9 + $0x48] sm:$0xff] (!%p7677_p13)  }
 0x3ab   : > { %5941 = vmatprep.subr.bf16.mxu0 %v7548_v42  ;;  %v7964_v42 = vld [vmem:[#allocation9 + $0x8] sm:$0xff] (!%p7677_p13)  }
 0x3ac   : > { %5981 = vmatpush1.bf16.msra.mxu1 %v7667_v26  ;;  %v7963_v26 = vld [vmem:[#allocation9 + $0xc8] sm:$0xff] (!%p7677_p13)  }
 0x3ad   : > { %5982 = vmatprep.subr.bf16.mxu1 %v7676_v34  ;;  %v7965_v34 = vld [vmem:[#allocation9 + $0x88] sm:$0xff] (!%p7677_p13)  }
 0x3ae   : > { %5942 = vmatpush1.bf16.msra.mxu0 %v7547_v27  ;;  %v7966_v27 = vld [vmem:[#allocation9 + $0x50] sm:$0xff] (!%p7677_p13)  }
 0x3af   : > { %7751 = vmatprep.subr.bf16.mxu0 (!%p7677_p13), %v7958_v53  ;;  %v7999_v53 = vld [vmem:[#allocation9 + $0x1d0] sm:$0xff] (!%p7677_p13)  }
 0x3b0   : > { %5983 = vmatpush1.bf16.msra.mxu1 %v7675_v39  ;;  %v7967_v39 = vld [vmem:[#allocation9 + $0xd0] sm:$0xff] (!%p7677_p13)  }
 0x3b1   : > { %5944 = vmatmul.mubr.bf16.vlgmr.msra.gmra.mrb[44].mxu0 %v8808_v5  ;;  %7773 = vmatprep.subr.bf16.mxu1 (!%p7677_p13), %v7959_v28  ;;  %v8000_v28 = vld [vmem:[#allocation9 + $0x110] sm:$0xff] (!%p7677_p13)  }
 0x3b2   : > { %7752 = vmatpush3.bf16.msra.mxu0 (!%p7677_p13), %v7960_v62  ;;  %v8001_v62 = vld [vmem:[#allocation9 + $0x190] sm:$0xff] (!%p7677_p13)  }
 0x3b3   : > { %5985 = vmatmul.mubr.bf16.vlgmr.msra.gmra.mrb[44].mxu1 %v8814_v8  ;;  %7753 = vmatprep.subr.bf16.mxu0 (!%p7677_p13), %v7962_v54  ;;  %v8003_v54 = vld [vmem:[#allocation9 + $0x1d8] sm:$0xff] (!%p7677_p13)  }
 0x3b4   : > { %7774 = vmatpush3.bf16.msra.mxu1 (!%p7677_p13), %v7961_v30  ;;  %v8002_v30 = vld [vmem:[#allocation9 + $0x158] sm:$0xff] (!%p7677_p13)  }
 0x3b5   : > { %7775 = vmatprep.subr.bf16.mxu1 (!%p7677_p13), %v7963_v26  ;;  %v8004_v26 = vld [vmem:[#allocation9 + $0x118] sm:$0xff] (!%p7677_p13)  }
 0x3b6   : > { %7754 = vmatpush3.bf16.msra.mxu0 (!%p7677_p13), %v7964_v42  ;;  %v8005_v42 = vld [vmem:[#allocation9 + $0x198] sm:$0xff] (!%p7677_p13)  }
 0x3b7   : > { %7755 = vmatprep.subr.bf16.mxu0 (!%p7677_p13), %v7966_v27  ;;  %v8007_v27 = vld [vmem:[#allocation9 + $0x1e0] sm:$0xff] (!%p7677_p13)  }
 0x3b8   : > { %7776 = vmatpush3.bf16.msra.mxu1 (!%p7677_p13), %v7965_v34  ;;  %v8006_v34 = vld [vmem:[#allocation9 + $0x160] sm:$0xff] (!%p7677_p13)  }
 0x3b9   : > { %7777 = vmatprep.subr.bf16.mxu1 (!%p7677_p13), %v7967_v39  ;;  %v8008_v39 = vld [vmem:[#allocation9 + $0x120] sm:$0xff] (!%p7677_p13)  }
 0x3c4   : > { %v5699_v29 = vpop.f32.mrb[32].mxu0 }
 0x3c5   : > { %v5700_v46 = vadd.f32 %v5699_v29, %v9418_v18  ;;  %v5701_v32 = vpop.f32.mrb[33].mxu0  ;;  %v7968_v29 = vld [vmem:[#allocation9 + $0x10] sm:$0xff] (!%p7677_p13)  }
 0x3c6   : > { %v5740_v31 = vpop.f32.mrb[32].mxu1  ;;  %v5702_v35 = vadd.f32 %v5701_v32, %v9420_v24  ;;  %v5703_v36 = vpop.f32.mrb[34].mxu0  ;;  %7756 = vmatpush3.bf16.msra.mxu0 (!%p7677_p13), %v7968_v29  ;;  %v7971_v32 = vld [vmem:[#allocation9 + $0xd8] sm:$0xff] (!%p7677_p13)   ;;  %v8009_v29 = vld [vmem:[#allocation9 + $0x1a0] sm:$0xff] (!%p7677_p13)  }
 0x3c7   : > { %v5742_v37 = vpop.f32.mrb[33].mxu1  ;;  %v5741_v41 = vadd.f32 %v5740_v31, %v5700_v46  ;;  %v5704_v45 = vpop.f32.mrb[35].mxu0  ;;  %v7969_v46 = vld [vmem:[#allocation9 + $0x90] sm:$0xff] (!%p7677_p13)   ;;  %v7970_v31 = vld [vmem:[#allocation9 + $0x58] sm:$0xff] (!%p7677_p13)   ;;  %v7975_v36 = vld [vmem:[#allocation9 + $0xe0] sm:$0xff] (!%p7677_p13)  }
 0x3c8   : > { %v5744_v44 = vpop.f32.mrb[34].mxu1  ;;  %v5743_v52 = vadd.f32 %v5742_v37, %v5702_v35  ;;  %7778 = vmatpush3.bf16.msra.mxu1 (!%p7677_p13), %v7969_v46  ;;  %7757 = vmatprep.subr.bf16.mxu0 (!%p7677_p13), %v7970_v31  ;;  %v7973_v35 = vld [vmem:[#allocation9 + $0x98] sm:$0xff] (!%p7677_p13)   ;;  %v7974_v37 = vld [vmem:[#allocation9 + $0x60] sm:$0xff] (!%p7677_p13)   ;;  %v7978_v45 = vld [vmem:[#allocation9 + $0x68] sm:$0xff] (!%p7677_p13)  }
 0x3c9   : > { %v5745_v20 = vpop.f32.mrb[35].mxu1  ;;  %v5997_v58 = vadd.f32 %v5741_v41, %v349_v33  ;;  %v7972_v33 = vld [vmem:[#allocation9 + $0x18] sm:$0xff] (!%p7677_p13)   ;;  %7779 = vmatprep.subr.bf16.mxu1 (!%p7677_p13), %v7971_v32  ;;  %v7976_v41 = vld [vmem:[#allocation9 + $0x20] sm:$0xff] (!%p7677_p13)   ;;  %v8010_v46 = vld [vmem:[#allocation9 + $0x168] sm:$0xff] (!%p7677_p13)  }
 0x3ca   : > { %v5998_v5 = vadd.f32 %v5743_v52, %v350_v38  ;;  %7758 = vmatpush3.bf16.msra.mxu0 (!%p7677_p13), %v7972_v33  ;;  %v6023_v38 = vlaneseq (!%p7677_p13)  ;;  %v7977_v44 = vld [vmem:[#allocation9 + $0xa0] sm:$0xff] (!%p7677_p13)   ;;  %v7979_v52 = vld [vmem:[#allocation9 + $0xe8] sm:$0xff] (!%p7677_p13)  }
 0x3cb   : > { %6005 = vst [vmem:[#allocation2 + $0x20] sm:$0xff] %v5997_v58  ;;  %7759 = vmatprep.subr.bf16.mxu0 (!%p7677_p13), %v7974_v37  ;;  %v7980_v20 = vld [vmem:[#allocation9 + $0x28] sm:$0xff] (!%p7677_p13)  }
 0x3cc   : > { %6006 = vst [vmem:[#allocation2 + $0x28] sm:$0xff] %v5998_v5  ;;  %7780 = vmatpush3.bf16.msra.mxu1 (!%p7677_p13), %v7973_v35  ;;  %v9459_v58 = vshrl.u32 (!%p7677_p13), %v6023_v38, 7  ;;  %v7981_v5 = vld [vmem:[#allocation9 + $0xa8] sm:$0xff] (!%p7677_p13)   ;;  %v8015_v38 = vld [vmem:[#allocation9 + $0x1f0] sm:$0xff] (!%p7677_p13)  }
 0x3cd   : > { %7781 = vmatprep.subr.bf16.mxu1 (!%p7677_p13), %v7975_v36  ;;  %v8011_v31 = vld [vmem:[#allocation9 + $0x1e8] sm:$0xff] (!%p7677_p13)   ;;  %v8014_v36 = vld [vmem:[#allocation9 + $0x170] sm:$0xff] (!%p7677_p13)  }
 0x3ce   : > { %7760 = vmatpush3.bf16.msra.mxu0 (!%p7677_p13), %v7976_v41  ;;  %v8012_v32 = vld [vmem:[#allocation9 + $0x128] sm:$0xff] (!%p7677_p13)   ;;  %v6045_v33 = vsub.s32 (!%p7677_p13), 5, %v9459_v58  ;;  %v6053_v37 = vsub.s32 (!%p7677_p13), 7, %v9459_v58  ;;  %v6041_v41 = vsub.s32 (!%p7677_p13), 4, %v9459_v58 }
 0x3cf   : > { %7761 = vmatprep.subr.bf16.mxu0 (!%p7677_p13), %v7978_v45  ;;  %v8013_v35 = vld [vmem:[#allocation9 + $0x1a8] sm:$0xff] (!%p7677_p13)   ;;  %v8016_v45 = vld [vmem:[#allocation9 + $0x130] sm:$0xff] (!%p7677_p13)  }
 0x3d0   : > { %7782 = vmatpush3.bf16.msra.mxu1 (!%p7677_p13), %v7977_v44  ;;  %v6049_v44 = vsub.s32 (!%p7677_p13), 6, %v9459_v58 }
 0x3d1   : > { %7783 = vmatprep.subr.bf16.mxu1 (!%p7677_p13), %v7979_v52  ;;  %v8017_v52 = vld [vmem:[#allocation9 + $0x1b0] sm:$0xff] (!%p7677_p13)  }
 0x3d2   : > { %7762 = vmatpush3.bf16.msra.mxu0 (!%p7677_p13), %v7980_v20  ;;  %v8018_v20 = vld [vmem:[#allocation9 + $0x178] sm:$0xff] (!%p7677_p13)  }
 0x3d4   : > { %7784 = vmatpush3.bf16.msra.mxu1 (!%p7677_p13), %v7981_v5 }
 0x404   : > { %v5781_v8 = vpop.f32.mrb[36].mxu0 }
 0x405   : > { %v5783_v18 = vpop.f32.mrb[37].mxu0 }
 0x406   : > { %v5822_v48 = vpop.f32.mrb[36].mxu1  ;;  %v5785_v47 = vpop.f32.mrb[38].mxu0 }
 0x407   : > { %v5823_v59 = vadd.f32 %v5822_v48, %v5781_v8  ;;  %v5824_v50 = vpop.f32.mrb[37].mxu1  ;;  %v5786_v23 = vpop.f32.mrb[39].mxu0  ;;  %v7982_v8 = vld [vmem:[#allocation9 + $0x70] sm:$0xff] (!%p7677_p13)   ;;  %v6037_v47 = vsub.s32 (!%p7677_p13), 3, %v9459_v58 }
 0x408   : > { %v5825_v60 = vadd.f32 %v5824_v50, %v5783_v18  ;;  %v5826_v24 = vpop.f32.mrb[38].mxu1  ;;  %v7983_v48 = vld [vmem:[#allocation9 + $0xf0] sm:$0xff] (!%p7677_p13)   ;;  %7763 = vmatprep.subr.bf16.mxu0 (!%p7677_p13), %v7982_v8  ;;  %v7987_v23 = vld [vmem:[#allocation9 + $0xf8] sm:$0xff] (!%p7677_p13)  }
 0x409   : > { %v5827_v49 = vpop.f32.mrb[39].mxu1  ;;  %v7984_v18 = vld [vmem:[#allocation9 + $0x30] sm:$0xff] (!%p7677_p13)   ;;  %7785 = vmatprep.subr.bf16.mxu1 (!%p7677_p13), %v7983_v48  ;;  %v6025_v24 = vsub.s32 (!%p7677_p13), 0, %v9459_v58  ;;  %v8019_v8 = vld [vmem:[#allocation9 + $0x1f8] sm:$0xff] (!%p7677_p13)  }
 0x40a   : > { %v7985_v50 = vld [vmem:[#allocation9 + $0xb0] sm:$0xff] (!%p7677_p13)   ;;  %7764 = vmatpush3.bf16.msra.mxu0 (!%p7677_p13), %v7984_v18  ;;  %v6033_v49 = vsub.s32 (!%p7677_p13), 2, %v9459_v58 }
 0x40b   : > { %7786 = vmatpush3.bf16.msra.mxu1 (!%p7677_p13), %v7985_v50  ;;  %v8020_v50 = vld [vmem:[#allocation9 + $0x138] sm:$0xff] (!%p7677_p13)  }
 0x40c   : > { %7787 = vmatprep.subr.bf16.mxu1 (!%p7677_p13), %v7987_v23  ;;  %v6017_v23 = vld [vmem:[#allocation2 + $0x20] sm:$0xff] (!%p7677_p13) }
 0x444   : > { %v5863_v51 = vpop.f32.mrb[40].mxu0 }
 0x445   : > { %v5864_v56 = vadd.f32 %v5863_v51, %v5823_v59  ;;  %v5865_v61 = vpop.f32.mrb[41].mxu0  ;;  %v6029_v59 = vsub.s32 (!%p7677_p13), 1, %v9459_v58  ;;  %v7988_v51 = vld [vmem:[#allocation9 + $0x38] sm:$0xff] (!%p7677_p13)  }
 0x446   : > { %v5904_v57 = vpop.f32.mrb[40].mxu1  ;;  %v5866_v63 = vadd.f32 %v5865_v61, %v5825_v60  ;;  %v5867_v1 = vpop.f32.mrb[42].mxu0  ;;  %v7986_v60 = vld [vmem:[#allocation9 + $0x78] sm:$0xff] (!%p7677_p13)  }
 0x447   : > { %v5906_v0 = vpop.f32.mrb[41].mxu1  ;;  %v5905_v2 = vadd.f32 %v5904_v57, %v5864_v56  ;;  %v5868_v4 = vpop.f32.mrb[43].mxu0  ;;  %7765 = vmatprep.subr.bf16.mxu0 (!%p7677_p13), %v7986_v60  ;;  %v7989_v56 = vld [vmem:[#allocation9 + $0xb8] sm:$0xff] (!%p7677_p13)   ;;  %v6014_v57 = vld [vmem:[#allocation2 + $0x8] sm:$0xff] (!%p7677_p13) }
 0x448   : > { %v5908_v3 = vpop.f32.mrb[42].mxu1  ;;  %v5907_v6 = vadd.f32 %v5906_v0, %v5866_v63  ;;  %7766 = vmatpush3.bf16.msra.mxu0 (!%p7677_p13), %v7988_v51  ;;  %v9465_v61 = vld [vmem:[#allocation8] sm:$0xff] (!%p7677_p13)  ;;  %v6016_v63 = vld [vmem:[#allocation2 + $0x18] sm:$0xff] (!%p7677_p13)  ;;  %7788 = vmatpush3.bf16.msra.mxu1 (!%p7677_p13), %v7989_v56  ;;  %v6015_v4 = vld [vmem:[#allocation2 + $0x10] sm:$0xff] (!%p7677_p13) }
 0x449   : > { %v5909_v7 = vpop.f32.mrb[43].mxu1  ;;  %v6030_v0 = vrot.slane (!%p7677_p13), %v9465_v61, %v6029_v59  ;;  %v6038_v1 = vrot.slane (!%p7677_p13), %v9465_v61, %v6037_v47  ;;  %v6026_v3 = vrot.slane (!%p7677_p13), %v9465_v61, %v6025_v24  ;;  %v6046_v5 = vrot.slane (!%p7677_p13), %v9465_v61, %v6045_v33  ;;  %v8021_v58 = vld [vmem:[#allocation9 + $0x1b8] sm:$0xff] (!%p7677_p13)   ;;  %v6018_v47 = vld [vmem:[#allocation2 + $0x28] sm:$0xff] (!%p7677_p13) }
 0x44a   : > { %v7990_v7 = vld [vmem:[#allocation9 + $0x140] sm:$0xff] (!%p7677_p13)   ;;  %v6054_v48 = vrot.slane (!%p7677_p13), %v9465_v61, %v6053_v37  ;;  %v6042_v18 = vrot.slane (!%p7677_p13), %v9465_v61, %v6041_v41  ;;  %v6050_v59 = vrot.slane (!%p7677_p13), %v9465_v61, %v6049_v44 }
 0x44b   : > { %7795 = vmatprep.subr.bf16.mxu0 (!%p7677_p13), %v7990_v7  ;;  %v6068_v60 = vadd.f32 (!%p7677_p13), %v6046_v5, %v6018_v47 }
 0x44c   : > { %v6067_v56 = vadd.f32 (!%p7677_p13), %v6042_v18, %v6017_v23 }
 0x484   : > { %v5945_v9 = vpop.f32.mrb[44].mxu0 }
 0x485   : > { %v5946_v10 = vadd.f32 %v5945_v9, %v5905_v2  ;;  %v5947_v12 = vpop.f32.mrb[45].mxu0  ;;  %v6013_v2 = vld [vmem:[#allocation2] sm:$0xff] (!%p7677_p13)  ;;  %v6064_v9 = vadd.f32 (!%p7677_p13), %v6030_v0, %v6014_v57 }
 0x486   : > { %v5986_v11 = vpop.f32.mrb[44].mxu1  ;;  %v5948_v40 = vadd.f32 %v5947_v12, %v5907_v6  ;;  %v5949_v14 = vpop.f32.mrb[46].mxu0  ;;  %6012 = sbr.rel (%p7677_p13) target bundleno = 1415 (0x587), region = 68  ;;  %v6034_v6 = vrot.slane (!%p7677_p13), %v9465_v61, %v6033_v49 }
 0x487   : > { %v5988_v25 = vpop.f32.mrb[45].mxu1  ;;  %v5987_v17 = vadd.f32 %v5986_v11, %v5946_v10  ;;  %v5950_v43 = vpop.f32.mrb[47].mxu0  ;;  %v6066_v10 = vadd.f32 (!%p7677_p13), %v6038_v1, %v6016_v63  ;;  %v6063_v11 = vadd.f32 (!%p7677_p13), %v6026_v3, %v6013_v2  ;;  %v6076_v63 = vpack.c.bf16 (!%p7677_p13), %v6068_v60, %v6068_v60 }
 0x488   : > { %v5990_v21 = vpop.f32.mrb[46].mxu1  ;;  %v5989_v16 = vadd.f32 %v5988_v25, %v5948_v40  ;;  %v6065_v12 = vadd.f32 (!%p7677_p13), %v6034_v6, %v6015_v4  ;;  %v7992_v40 = vld [vmem:[#allocation9 + $0x100] sm:$0xff] (!%p7677_p13)   ;;  %v6072_v25 = vpack.c.bf16 (!%p7677_p13), %v6064_v9, %v6064_v9  ;;  %v7994_v43 = vld [vmem:[#allocation9 + $0x148] sm:$0xff] (!%p7677_p13)   ;;  %v6075_v1 = vpack.c.bf16 (!%p7677_p13), %v6067_v56, %v6067_v56 }
 0x489   : > { %v5991_v55 = vpop.f32.mrb[47].mxu1  ;;  %v5999_v19 = vadd.f32 %v5987_v17, %v351_v13  ;;  %v7991_v13 = vld [vmem:[#allocation9 + $0x1c0] sm:$0xff] (!%p7677_p13)   ;;  %v6074_v14 = vpack.c.bf16 (!%p7677_p13), %v6066_v10, %v6066_v10  ;;  %v6071_v17 = vpack.c.bf16 (!%p7677_p13), %v6063_v11, %v6063_v11 }
 0x48a   : > { %v6000_v22 = vadd.f32 %v5989_v16, %v352_v15  ;;  %v6073_v15 = vpack.c.bf16 (!%p7677_p13), %v6065_v12, %v6065_v12  ;;  %7817 = vmatprep.subr.bf16.mxu1 (!%p7677_p13), %v7991_v13  ;;  %v7993_v21 = vld [vmem:[#allocation9 + $0x180] sm:$0xff] (!%p7677_p13)   ;;  %6630 = vmatprep.mubr.bf16.mxu0 (!%p7677_p13), %v6072_v25  ;;  %v7995_v16 = vld [vmem:[#allocation9 + $0x1c8] sm:$0xff] (!%p7677_p13)  }
 0x48b   : > { %6007 = vst [vmem:[#allocation2 + $0x30] sm:$0xff] %v5999_v19  ;;  %6670 = vmatprep.mubr.bf16.mxu1 (!%p7677_p13), %v6074_v14  ;;  %6631 = vmatmul.mubr.bf16.vlgmr.msra.gmra.mrb[0].mxu0 (!%p7677_p13), %v6071_v17  ;;  %v7996_v55 = vld [vmem:[#allocation9 + $0x108] sm:$0xff] (!%p7677_p13)   ;;  %v7678_v4 = vld [vmem:[#allocation11] ss:$0 sm:$0xff] (!%p7677_p13) }
 0x48c   : > { %6008 = vst [vmem:[#allocation2 + $0x38] sm:$0xff] %v6000_v22  ;;  %6671 = vmatmul.mubr.bf16.vlgmr.msra.gmra.mrb[0].mxu1 (!%p7677_p13), %v6073_v15  ;;  %7796 = vmatpush3.bf16.msra.mxu0 (!%p7677_p13), %v7992_v40  ;;  %v7997_v19 = vld [vmem:[#allocation9 + $0x188] sm:$0xff] (!%p7677_p13)   ;;  %v7998_v22 = vld [vmem:[#allocation9 + $0x150] sm:$0xff] (!%p7677_p13)  }
 0x48d   : > { %7818 = vmatpush3.bf16.msra.mxu1 %v7993_v21  ;;  %7797 = vmatprep.subr.bf16.mxu0 %v7994_v43 }
 0x48e   : > { %7819 = vmatprep.subr.bf16.mxu1 %v7995_v16  ;;  %6710 = vmatprep.mubr.bf16.mxu0 %v6076_v63 }
 0x490   : > { %7798 = vmatpush3.bf16.msra.mxu0 %v7996_v55 }
 0x491   : > { %7820 = vmatpush3.bf16.msra.mxu1 %v7997_v19  ;;  %7799 = vmatprep.subr.bf16.mxu0 %v7998_v22 }
 0x492   : > { %7821 = vmatprep.subr.bf16.mxu1 %v7999_v53  ;;  %v6019_v49 = vld [vmem:[#allocation2 + $0x30] sm:$0xff] }
 0x493   : > { %v6020_v24 = vld [vmem:[#allocation2 + $0x38] sm:$0xff]  ;;  %v6069_v57 = vadd.f32 %v6050_v59, %v6019_v49 }
 0x494   : > { %7800 = vmatpush3.bf16.msra.mxu0 %v8000_v28  ;;  %v6070_v51 = vadd.f32 %v6054_v48, %v6020_v24 }
 0x495   : > { %7822 = vmatpush3.bf16.msra.mxu1 %v8001_v62  ;;  %7801 = vmatprep.subr.bf16.mxu0 %v8002_v30  ;;  %v6077_v61 = vpack.c.bf16 %v6069_v57, %v6069_v57 }
 0x496   : > { %7823 = vmatprep.subr.bf16.mxu1 %v8003_v54  ;;  %v6078_v0 = vpack.c.bf16 %v6070_v51, %v6070_v51 }
 0x498   : > { %7802 = vmatpush3.bf16.msra.mxu0 %v8004_v26  ;;  %6750 = vmatprep.mubr.bf16.mxu1 %v6078_v0 }
 0x499   : > { %7824 = vmatpush3.bf16.msra.mxu1 %v8005_v42  ;;  %7803 = vmatprep.subr.bf16.mxu0 %v8006_v34 }
 0x49a   : > { %7825 = vmatprep.subr.bf16.mxu1 %v8007_v27 }
 0x49c   : > { %7804 = vmatpush3.bf16.msra.mxu0 %v8008_v39 }
 0x49d   : > { %7826 = vmatpush3.bf16.msra.mxu1 %v8009_v29  ;;  %7805 = vmatprep.subr.bf16.mxu0 %v8010_v46 }
 0x49e   : > { %7827 = vmatprep.subr.bf16.mxu1 %v8011_v31 }
 0x4a0   : > { %7806 = vmatpush3.bf16.msra.mxu0 %v8012_v32 }
 0x4a1   : > { %7828 = vmatpush3.bf16.msra.mxu1 %v8013_v35  ;;  %7807 = vmatprep.subr.bf16.mxu0 %v8014_v36 }
 0x4a2   : > { %7829 = vmatprep.subr.bf16.mxu1 %v8015_v38 }
 0x4a4   : > { %7808 = vmatpush3.bf16.msra.mxu0 %v8016_v45 }
 0x4a5   : > { %7830 = vmatpush3.bf16.msra.mxu1 %v8017_v52  ;;  %7809 = vmatprep.subr.bf16.mxu0 %v8018_v20 }
 0x4a6   : > { %7831 = vmatprep.subr.bf16.mxu1 %v8019_v8 }
 0x4a8   : > { %7810 = vmatpush3.bf16.msra.mxu0 %v8020_v50 }
 0x4a9   : > { %7832 = vmatpush3.bf16.msra.mxu1 %v8021_v58 }
 0x4ab   : > { %6711 = vmatmul.mubr.bf16.vlgmr.msra.gmra.mrb[4].mxu0 %v6075_v1 }
 0x4ac   : > { %6751 = vmatmul.mubr.bf16.vlgmr.msra.gmra.mrb[4].mxu1 %v6077_v61 }
 0x55e   : > { %v7767_v2 = vpop.f32.mrb[0].mxu0 }
 0x55f   : > { %v7789_v3 = vpop.f32.mrb[0].mxu1  ;;  %v7768_v6 = vpop.f32.mrb[1].mxu0 }
 0x560   : > { %v7790_v7 = vpop.f32.mrb[1].mxu1  ;;  %v7769_v9 = vadd.f32 %v7768_v6, %v7767_v2  ;;  %v7770_v11 = vpop.f32.mrb[2].mxu0 }
 0x561   : > { %v7791_v10 = vadd.f32 %v7790_v7, %v7789_v3  ;;  %v7792_v12 = vpop.f32.mrb[2].mxu1  ;;  %v7771_v13 = vpop.f32.mrb[3].mxu0 }
 0x562   : > { %v7793_v40 = vpop.f32.mrb[3].mxu1  ;;  %v6633_v25 = vadd.f32 %v7769_v9, %v7678_v4 }
 0x564   : > { %v6673_v14 = vadd.f32 %v7791_v10, %v6633_v25 }
 0x57e   : > { %v7811_v17 = vpop.f32.mrb[4].mxu0 }
 0x57f   : > { %v7833_v15 = vpop.f32.mrb[4].mxu1  ;;  %v7812_v21 = vpop.f32.mrb[5].mxu0 }
 0x580   : > { %v7834_v43 = vpop.f32.mrb[5].mxu1  ;;  %v7813_v16 = vadd.f32 %v7812_v21, %v7811_v17  ;;  %v7814_v19 = vpop.f32.mrb[6].mxu0 }
 0x581   : > { %v7835_v55 = vadd.f32 %v7834_v43, %v7833_v15  ;;  %v7836_v22 = vpop.f32.mrb[6].mxu1  ;;  %v7815_v53 = vpop.f32.mrb[7].mxu0 }
 0x582   : > { %v7837_v28 = vpop.f32.mrb[7].mxu1  ;;  %v6713_v62 = vadd.f32 %v7813_v16, %v6673_v14 }
 0x584   : > { %v6753_v30 = vadd.f32 %v7835_v55, %v6713_v62 }
 0x586   : > { %6758 = vst [vmem:[#allocation12] sm:$0xff] %v6753_v30 }
 0x587 PF: > { %p7887_p2 = scmp.eq.s32.totalorder %s8330_s24, 1  ;;  %s8270_s21 = smov [#allocation12]  }
 0x588   : > { %s6768_s25 = sshll.u32 %s8270_s21, 4  ;;  %s6769_s25 = int_to_ptr.vmem [resolvable:$true] %s6768_s25 }
 0x589   : > { %s8166_s26 = scalar_lea.vmem %s6769_s25, 128  ;;  %p8173_p8 = scmp.lt.s32.totalorder %s6769_s25, %s6769_s25 }
 0x58a   : > { %p8167_p3 = scmp.ne.s32.totalorder %s6769_s25, %s8166_s26  ;;  %p8174_p10 = scmp.lt.s32.totalorder %s8166_s26, %s8166_s26 }
 0x58c   : > { %p8168_p0 = pnand %p8167_p3, %p7887_p2  ;;  %p8175_p12 = por %p8174_p10, %p8173_p8 }
 0x58e   : > { %p8169_p6 = pneg %p8168_p0 }
 0x590   : > { %p8176_p9 = pnand %p8175_p12, %p8169_p6 }
 0x592   : > { %8179 = shalt.err (!%p8176_p9)
}
 0x593   : > { %s8180_s15 = scalar_lea.hbm %s9525_s5, 128 }
 0x594   : > { %p8181_p11 = scmp.ne.s32.totalorder %s9525_s5, %s8180_s15  ;;  %p8186_p5 = scmp.lt.u32.totalorder %s8180_s15, %s9525_s5 }
 0x596   : > { %p8182_p1 = pnand %p8181_p11, %p7887_p2 }
 0x598   : > { %p8183_p4 = pneg %p8182_p1 }
 0x59a   : > { %p8188_p7 = pnand %p8186_p5, %p8183_p4 }
 0x59c   : > { %8191 = shalt.err (!%p8188_p7)
}
 0x59d   : > { %7860 = dma.vmem_to_hbm [thread:$0]  (%p7887_p2), %s6769_s25, 128, %s9525_s5, [#allocation5]  }
 0x59e   : > { %8233 = dma.done.wait (%p7887_p2), [#allocation5], 128  }
 0x59f   : > { %8235 = vsyncadd (%p7887_p2), [#allocation5], 4294967168 }
 0x5a0 PF: > { %s23_s23 = sadd.s32 1, %s8258_s23   ;;  %s9540_s18 = smov %s8242_s19 }
 0x5a1   : > { %p20_p13 = scmp.ge.s32.totalorder %s23_s23, 4   ;;  %s9541_s19 = smov %s8246_s20 }
 0x5a2   : > { %s9542_s20 = smov %s8444_s29  ;;  %s9543_s21 = smov %s8254_s22 }
 0x5a3   : > { %s9544_s22 = smov %s9546_s16  ;;  %22 = sbr.rel (!%p20_p13) target bundleno = 8 (0x8), region = 111 }
 0x5aa   :  { %6781 = vsyncpa [#allocation4], 1 }
 0x5ab   :  { %6783 = vsyncpa [#allocation4 + $0x1], 1 }
 0x5ac   :  { %6784 = vsyncpa [#allocation7], 1 }
 0x5ad   :  { %6786 = vsyncpa [#allocation7 + $0x1], 1 }
 0x5ae   :  { %6787 = vsyncpa [#allocation10], 1 }
 0x5af   :  { %6788 = vsyncpa [#allocation5], 1 }
 0x5b0   :  { %6790 = vsyncpa [#allocation5 + $0x1], 1 }

</bundles_post_ra>
